<compile_context>
chip_gen: v7x
topology: tpu7x:2x2x1
jax: 0.10.0
libtpu: 0.0.40
codegen_flags: <defaults>
</compile_context>

<pallas_src>
import functools

import jax
import jax.numpy as jnp
from jax import lax
from jax.experimental import pallas as pl
from jax.experimental.pallas import tpu as pltpu  # noqa: F401  (TPU backend)


# ----------------------------------------------------------------------------
# Model dimensions
# ----------------------------------------------------------------------------
ENC_OUT = 512
EMBED = 32            # args.embedding_size
EMBED_PAD = 128       # lane-dense padding for mu / logvar / z
IMG_C, IMG_H, IMG_W = 1, 16, 16
PIX = IMG_C * IMG_H * IMG_W   # 256 (multiple of 128 -> lane-dense output)
NEG_SLOPE = 0.2  # TODO(synk): original CNN_Encoder slope unknown; 0.2 assumed


# ----------------------------------------------------------------------------
# Fused Pallas kernel: whole forward, all intermediates in VMEM
# ----------------------------------------------------------------------------
def _vae_fused_kernel(x_ref, eps_ref,
                      w_c1_ref, b_c1_ref,
                      w_c2_ref, b_c2_ref,
                      w_enc_ref, b_enc_ref,
                      w_mv_ref, b_mv_ref,
                      w_d1_ref, b_d1_ref,
                      w_d2_ref, b_d2_ref,
                      muvar_ref, recon_ref):
    def leaky(v):
        return jnp.where(v > 0, v, NEG_SLOPE * v)

    # conv1 (pre-lowered to a Toeplitz matmul) + bias + LeakyReLU
    h1 = jnp.dot(x_ref[...], w_c1_ref[...], preferred_element_type=jnp.float32)
    h1 = leaky(h1 + b_c1_ref[...])

    # conv2 (Toeplitz matmul) + bias + LeakyReLU
    h2 = jnp.dot(h1.astype(jnp.bfloat16), w_c2_ref[...],
                 preferred_element_type=jnp.float32)
    h2 = leaky(h2 + b_c2_ref[...])

    # encoder fc + LeakyReLU
    h = jnp.dot(h2.astype(jnp.bfloat16), w_enc_ref[...],
                preferred_element_type=jnp.float32)
    h = leaky(h + b_enc_ref[...])

    # fused fc_mu | fc_var projection (mu in lanes [0,128), logvar in [128,256))
    mv = jnp.dot(h.astype(jnp.bfloat16), w_mv_ref[...],
                 preferred_element_type=jnp.float32) + b_mv_ref[...]
    muvar_ref[...] = mv                                   # lane-dense store

    mu = mv[:, :EMBED_PAD]
    logvar = mv[:, EMBED_PAD:]

    # reparameterize: z = mu + eps * exp(0.5 * logvar)   (f32 elementwise)
    # padded lanes feed zero rows of dec_fc1_w -> cannot affect the decode.
    z = mu + eps_ref[...] * jnp.exp(0.5 * logvar)

    # decoder fc1 + ReLU
    d1 = jnp.dot(z.astype(jnp.bfloat16), w_d1_ref[...],
                 preferred_element_type=jnp.float32)
    d1 = jnp.maximum(d1 + b_d1_ref[...], 0.0)

    # decoder fc2 + exact sigmoid (EUP exp, f32 divide)
    d2 = jnp.dot(d1.astype(jnp.bfloat16), w_d2_ref[...],
                 preferred_element_type=jnp.float32) + b_d2_ref[...]
    recon_ref[...] = 1.0 / (1.0 + jnp.exp(-d2))


# ----------------------------------------------------------------------------
# Pallas wrapper: gridless single block (everything fits VMEM at these sizes)
# ----------------------------------------------------------------------------
def _fullspec(a):
    return pl.BlockSpec(a.shape, lambda: (0, 0))


def pallas_vae_forward(x_flat, eps, p):
    """x_flat: (B, 256) bf16, eps: (B, 128) f32 -> (muvar (B,256) f32, recon (B,256) f32)."""
    B = x_flat.shape[0]
    args = (x_flat, eps,
            p["conv1_wm"], p["conv1_bb"],
            p["conv2_wm"], p["conv2_bb"],
            p["enc_fc_w"], p["enc_fc_b"],
            p["muvar_w"], p["muvar_b"],
            p["dec_fc1_w"], p["dec_fc1_b"],
            p["dec_fc2_w"], p["dec_fc2_b"])
    return pl.pallas_call(
        _vae_fused_kernel,
        out_shape=(jax.ShapeDtypeStruct((B, 2 * EMBED_PAD), jnp.float32),
                   jax.ShapeDtypeStruct((B, PIX), jnp.float32)),
        in_specs=[_fullspec(a) for a in args],
        out_specs=(pl.BlockSpec((B, 2 * EMBED_PAD), lambda: (0, 0)),
                   pl.BlockSpec((B, PIX), lambda: (0, 0))),
    )(*args)


# ----------------------------------------------------------------------------
# Init-time helper: lower a conv to a dense matmul over NHWC-flattened tensors
# ----------------------------------------------------------------------------
def _conv_as_matmul(w, in_hw, stride, pad):
    """w: (Cout, Cin, kh, kw) f32 -> (H*W*Cin, Ho*Wo*Cout) matrix such that
    out_flat = in_flat @ M, with NHWC row-major flattening and padding folded in."""
    cout, cin, kh, kw = w.shape
    n_in = in_hw * in_hw * cin
    eye = jnp.eye(n_in, dtype=jnp.float32).reshape(n_in, in_hw, in_hw, cin)
    eye = jnp.transpose(eye, (0, 3, 1, 2))                       # NCHW batch of one-hots
    out = lax.conv_general_dilated(
        eye, w, window_strides=(stride, stride),
        padding=((pad, pad), (pad, pad)),
        dimension_numbers=("NCHW", "OIHW", "NCHW"))
    out = jnp.transpose(out, (0, 2, 3, 1))                       # NHWC
    return out.reshape(n_in, -1)


# ----------------------------------------------------------------------------
# Parameters (deterministic synthetic; conv weights pre-lowered, stored bf16)
# ----------------------------------------------------------------------------
def init_params(key):
    ks = jax.random.split(key, 14)

    def w_init(k, shape, fan_in):
        return jax.random.normal(k, shape, jnp.float32) / jnp.sqrt(float(fan_in))

    def b_init(k, n, fan_in):
        bound = 1.0 / float(fan_in) ** 0.5
        return jax.random.uniform(k, (n,), jnp.float32, -bound, bound)

    p = {}
    # conv1: 1->16, k4 s2 p1, 16x16 -> 8x8
    c1 = w_init(ks[0], (16, 1, 4, 4), 1 * 4 * 4)
    b1 = b_init(ks[1], 16, 1 * 4 * 4)
    p["conv1_wm"] = _conv_as_matmul(c1, IMG_H, 2, 1).astype(jnp.bfloat16)   # (256, 1024)
    p["conv1_bb"] = jnp.tile(b1, 8 * 8)[None, :]                            # (1, 1024)
    # conv2: 16->32, k4 s2 p1, 8x8 -> 4x4
    c2 = w_init(ks[2], (32, 16, 4, 4), 16 * 4 * 4)
    b2 = b_init(ks[3], 32, 16 * 4 * 4)
    p["conv2_wm"] = _conv_as_matmul(c2, 8, 2, 1).astype(jnp.bfloat16)       # (1024, 512)
    p["conv2_bb"] = jnp.tile(b2, 4 * 4)[None, :]                            # (1, 512)
    # encoder fc: 512 -> 512 (input = NHWC-flattened conv2 output, 4*4*32)
    flat = 4 * 4 * 32
    p["enc_fc_w"] = w_init(ks[4], (flat, ENC_OUT), flat).astype(jnp.bfloat16)
    p["enc_fc_b"] = b_init(ks[5], ENC_OUT, flat)[None, :]
    # fused fc_mu | fc_var: each half lane-padded from 32 -> 128
    mu_w = w_init(ks[6], (ENC_OUT, EMBED), ENC_OUT)
    var_w = w_init(ks[7], (ENC_OUT, EMBED), ENC_OUT)
    mu_b = b_init(ks[8], EMBED, ENC_OUT)
    var_b = b_init(ks[9], EMBED, ENC_OUT)
    mv_w = jnp.zeros((ENC_OUT, 2 * EMBED_PAD), jnp.float32)
    mv_w = mv_w.at[:, :EMBED].set(mu_w)
    mv_w = mv_w.at[:, EMBED_PAD:EMBED_PAD + EMBED].set(var_w)
    p["muvar_w"] = mv_w.astype(jnp.bfloat16)
    mv_b = jnp.zeros((1, 2 * EMBED_PAD), jnp.float32)
    mv_b = mv_b.at[0, :EMBED].set(mu_b)
    mv_b = mv_b.at[0, EMBED_PAD:EMBED_PAD + EMBED].set(var_b)
    p["muvar_b"] = mv_b
    # decoder fc1: rows padded 32 -> 128 (extra rows zero)
    d1 = w_init(ks[10], (EMBED, ENC_OUT), EMBED)
    p["dec_fc1_w"] = (jnp.zeros((EMBED_PAD, ENC_OUT), jnp.float32)
                      .at[:EMBED].set(d1)).astype(jnp.bfloat16)
    p["dec_fc1_b"] = b_init(ks[11], ENC_OUT, EMBED)[None, :]
    # decoder fc2 -> C*H*W (= 256, lane-dense)
    p["dec_fc2_w"] = w_init(ks[12], (ENC_OUT, PIX), ENC_OUT).astype(jnp.bfloat16)
    p["dec_fc2_b"] = b_init(ks[13], PIX, ENC_OUT)[None, :]
    return p


# ----------------------------------------------------------------------------
# Forward pass (same semantics as Network.forward: recon, mu, logvar)
# ----------------------------------------------------------------------------
def network_forward(p, x, eps, training=True):
    """x: (B, 1, 16, 16) f32; eps: (B, EMBED_PAD) f32 (only [:, :EMBED] used)."""
    B = x.shape[0]
    # C == 1 -> NCHW flatten == NHWC flatten: a pure reshape, no transpose op.
    x_flat = x.reshape(B, IMG_C * IMG_H * IMG_W).astype(jnp.bfloat16)
    eps_used = eps if training else jnp.zeros_like(eps)   # eval: z = mu exactly

    muvar, recon = pallas_vae_forward(x_flat, eps_used, p)

    mu = muvar[:, :EMBED]
    logvar = muvar[:, EMBED_PAD:EMBED_PAD + EMBED]
    return recon.reshape(B, IMG_C, IMG_H, IMG_W), mu, logvar


# ----------------------------------------------------------------------------
if __name__ == "__main__":
    key = jax.random.PRNGKey(0)
    k_param, k_x, k_eps = jax.random.split(key, 3)

    params = init_params(k_param)
    x = jax.random.normal(k_x, (2, IMG_C, IMG_H, IMG_W), jnp.float32)
    # eps generated directly at the lane-padded width -> no wrapper-side pad op.
    eps = jax.random.normal(k_eps, (2, EMBED_PAD), jnp.float32)

    fwd = jax.jit(functools.partial(network_forward, training=True))
    recon, mu, logvar = fwd(params, x, eps)
    jax.block_until_ready((recon, mu, logvar))

    assert recon.shape == (2, IMG_C, IMG_H, IMG_W)
    assert mu.shape == (2, EMBED) and logvar.shape == (2, EMBED)
    assert bool(jnp.all(jnp.isfinite(recon)))
    assert bool(jnp.all((recon >= 0.0) & (recon <= 1.0)))
    print("KERNEL_OK")
</pallas_src>

<mosaic_0001>
module attributes {stable_mosaic.version = 11 : i64} {
  func.func @_vae_fused_kernel(%arg0: memref<2x256xbf16, #tpu.memory_space<vmem>>, %arg1: memref<2x128xf32, #tpu.memory_space<vmem>>, %arg2: memref<256x1024xbf16, #tpu.memory_space<vmem>>, %arg3: memref<1x1024xf32, #tpu.memory_space<vmem>>, %arg4: memref<1024x512xbf16, #tpu.memory_space<vmem>>, %arg5: memref<1x512xf32, #tpu.memory_space<vmem>>, %arg6: memref<512x512xbf16, #tpu.memory_space<vmem>>, %arg7: memref<1x512xf32, #tpu.memory_space<vmem>>, %arg8: memref<512x256xbf16, #tpu.memory_space<vmem>>, %arg9: memref<1x256xf32, #tpu.memory_space<vmem>>, %arg10: memref<128x512xbf16, #tpu.memory_space<vmem>>, %arg11: memref<1x512xf32, #tpu.memory_space<vmem>>, %arg12: memref<512x256xbf16, #tpu.memory_space<vmem>>, %arg13: memref<1x256xf32, #tpu.memory_space<vmem>>, %arg14: memref<2x256xf32, #tpu.memory_space<vmem>>, %arg15: memref<2x256xf32, #tpu.memory_space<vmem>>) attributes {dimension_semantics = [], scalar_prefetch = 0 : i64, scratch_operands = 0 : i64, tpu.core_type = #tpu.core_type<tc>} {
    %c0 = arith.constant 0 : index
    %c0_0 = arith.constant 0 : index
    %0 = vector.load %arg0[%c0, %c0_0] : memref<2x256xbf16, #tpu.memory_space<vmem>>, vector<2x256xbf16>
    %c0_1 = arith.constant 0 : index
    %c0_2 = arith.constant 0 : index
    %1 = vector.load %arg2[%c0_1, %c0_2] : memref<256x1024xbf16, #tpu.memory_space<vmem>>, vector<256x1024xbf16>
    %cst = arith.constant dense<0.000000e+00> : vector<2x1024xf32>
    %2 = tpu.matmul %0, %1, %cst {dimension_numbers = #tpu.dot_dimension_numbers<[1], [0], [0], [1], [0, 0, 1, 1], [], []>} : vector<2x256xbf16>, vector<256x1024xbf16>, vector<2x1024xf32> -> vector<2x1024xf32>
    %c0_3 = arith.constant 0 : index
    %c0_4 = arith.constant 0 : index
    %3 = vector.load %arg3[%c0_3, %c0_4] : memref<1x1024xf32, #tpu.memory_space<vmem>>, vector<1x1024xf32>
    %4 = vector.broadcast %3 : vector<1x1024xf32> to vector<2x1024xf32>
    %5 = arith.addf %2, %4 : vector<2x1024xf32>
    %cst_5 = arith.constant 0.000000e+00 : f32
    %6 = vector.broadcast %cst_5 : f32 to vector<2x1024xf32>
    %7 = arith.cmpf ogt, %5, %6 : vector<2x1024xf32>
    %cst_6 = arith.constant 2.000000e-01 : f32
    %8 = vector.broadcast %cst_6 : f32 to vector<2x1024xf32>
    %9 = arith.mulf %8, %5 : vector<2x1024xf32>
    %10 = arith.select %7, %5, %9 : vector<2x1024xi1>, vector<2x1024xf32>
    %11 = arith.truncf %10 : vector<2x1024xf32> to vector<2x1024xbf16>
    %c0_7 = arith.constant 0 : index
    %c0_8 = arith.constant 0 : index
    %12 = vector.load %arg4[%c0_7, %c0_8] : memref<1024x512xbf16, #tpu.memory_space<vmem>>, vector<1024x512xbf16>
    %cst_9 = arith.constant dense<0.000000e+00> : vector<2x512xf32>
    %13 = tpu.matmul %11, %12, %cst_9 {dimension_numbers = #tpu.dot_dimension_numbers<[1], [0], [0], [1], [0, 0, 1, 1], [], []>} : vector<2x1024xbf16>, vector<1024x512xbf16>, vector<2x512xf32> -> vector<2x512xf32>
    %c0_10 = arith.constant 0 : index
    %c0_11 = arith.constant 0 : index
    %14 = vector.load %arg5[%c0_10, %c0_11] : memref<1x512xf32, #tpu.memory_space<vmem>>, vector<1x512xf32>
    %15 = vector.broadcast %14 : vector<1x512xf32> to vector<2x512xf32>
    %16 = arith.addf %13, %15 : vector<2x512xf32>
    %cst_12 = arith.constant 0.000000e+00 : f32
    %17 = vector.broadcast %cst_12 : f32 to vector<2x512xf32>
    %18 = arith.cmpf ogt, %16, %17 : vector<2x512xf32>
    %cst_13 = arith.constant 2.000000e-01 : f32
    %19 = vector.broadcast %cst_13 : f32 to vector<2x512xf32>
    %20 = arith.mulf %19, %16 : vector<2x512xf32>
    %21 = arith.select %18, %16, %20 : vector<2x512xi1>, vector<2x512xf32>
    %22 = arith.truncf %21 : vector<2x512xf32> to vector<2x512xbf16>
    %c0_14 = arith.constant 0 : index
    %c0_15 = arith.constant 0 : index
    %23 = vector.load %arg6[%c0_14, %c0_15] : memref<512x512xbf16, #tpu.memory_space<vmem>>, vector<512x512xbf16>
    %cst_16 = arith.constant dense<0.000000e+00> : vector<2x512xf32>
    %24 = tpu.matmul %22, %23, %cst_16 {dimension_numbers = #tpu.dot_dimension_numbers<[1], [0], [0], [1], [0, 0, 1, 1], [], []>} : vector<2x512xbf16>, vector<512x512xbf16>, vector<2x512xf32> -> vector<2x512xf32>
    %c0_17 = arith.constant 0 : index
    %c0_18 = arith.constant 0 : index
    %25 = vector.load %arg7[%c0_17, %c0_18] : memref<1x512xf32, #tpu.memory_space<vmem>>, vector<1x512xf32>
    %26 = vector.broadcast %25 : vector<1x512xf32> to vector<2x512xf32>
    %27 = arith.addf %24, %26 : vector<2x512xf32>
    %cst_19 = arith.constant 0.000000e+00 : f32
    %28 = vector.broadcast %cst_19 : f32 to vector<2x512xf32>
    %29 = arith.cmpf ogt, %27, %28 : vector<2x512xf32>
    %cst_20 = arith.constant 2.000000e-01 : f32
    %30 = vector.broadcast %cst_20 : f32 to vector<2x512xf32>
    %31 = arith.mulf %30, %27 : vector<2x512xf32>
    %32 = arith.select %29, %27, %31 : vector<2x512xi1>, vector<2x512xf32>
    %33 = arith.truncf %32 : vector<2x512xf32> to vector<2x512xbf16>
    %c0_21 = arith.constant 0 : index
    %c0_22 = arith.constant 0 : index
    %34 = vector.load %arg8[%c0_21, %c0_22] : memref<512x256xbf16, #tpu.memory_space<vmem>>, vector<512x256xbf16>
    %cst_23 = arith.constant dense<0.000000e+00> : vector<2x256xf32>
    %35 = tpu.matmul %33, %34, %cst_23 {dimension_numbers = #tpu.dot_dimension_numbers<[1], [0], [0], [1], [0, 0, 1, 1], [], []>} : vector<2x512xbf16>, vector<512x256xbf16>, vector<2x256xf32> -> vector<2x256xf32>
    %c0_24 = arith.constant 0 : index
    %c0_25 = arith.constant 0 : index
    %36 = vector.load %arg9[%c0_24, %c0_25] : memref<1x256xf32, #tpu.memory_space<vmem>>, vector<1x256xf32>
    %37 = vector.broadcast %36 : vector<1x256xf32> to vector<2x256xf32>
    %38 = arith.addf %35, %37 : vector<2x256xf32>
    %c0_26 = arith.constant 0 : index
    %c0_27 = arith.constant 0 : index
    %39 = vector.load %arg14[%c0_26, %c0_27] : memref<2x256xf32, #tpu.memory_space<vmem>>, vector<2x256xf32>
    tpu.vector_store %arg14[%c0_26, %c0_27], %38 {strides = array<i32>} : memref<2x256xf32, #tpu.memory_space<vmem>>, vector<2x256xf32>,
    %40 = vector.extract_strided_slice %38 {offsets = [0, 0], sizes = [2, 128], strides = [1, 1]} : vector<2x256xf32> to vector<2x128xf32>
    %41 = vector.extract_strided_slice %38 {offsets = [0, 128], sizes = [2, 128], strides = [1, 1]} : vector<2x256xf32> to vector<2x128xf32>
    %c0_28 = arith.constant 0 : index
    %c0_29 = arith.constant 0 : index
    %42 = vector.load %arg1[%c0_28, %c0_29] : memref<2x128xf32, #tpu.memory_space<vmem>>, vector<2x128xf32>
    %cst_30 = arith.constant 5.000000e-01 : f32
    %43 = vector.broadcast %cst_30 : f32 to vector<2x128xf32>
    %44 = arith.mulf %43, %41 : vector<2x128xf32>
    %45 = math.exp %44 : vector<2x128xf32>
    %46 = arith.mulf %42, %45 : vector<2x128xf32>
    %47 = arith.addf %40, %46 : vector<2x128xf32>
    %48 = arith.truncf %47 : vector<2x128xf32> to vector<2x128xbf16>
    %c0_31 = arith.constant 0 : index
    %c0_32 = arith.constant 0 : index
    %49 = vector.load %arg10[%c0_31, %c0_32] : memref<128x512xbf16, #tpu.memory_space<vmem>>, vector<128x512xbf16>
    %cst_33 = arith.constant dense<0.000000e+00> : vector<2x512xf32>
    %50 = tpu.matmul %48, %49, %cst_33 {dimension_numbers = #tpu.dot_dimension_numbers<[1], [0], [0], [1], [0, 0, 1, 1], [], []>} : vector<2x128xbf16>, vector<128x512xbf16>, vector<2x512xf32> -> vector<2x512xf32>
    %c0_34 = arith.constant 0 : index
    %c0_35 = arith.constant 0 : index
    %51 = vector.load %arg11[%c0_34, %c0_35] : memref<1x512xf32, #tpu.memory_space<vmem>>, vector<1x512xf32>
    %52 = vector.broadcast %51 : vector<1x512xf32> to vector<2x512xf32>
    %53 = arith.addf %50, %52 : vector<2x512xf32>
    %cst_36 = arith.constant 0.000000e+00 : f32
    %54 = vector.broadcast %cst_36 : f32 to vector<2x512xf32>
    %55 = arith.maximumf %53, %54 : vector<2x512xf32>
    %56 = arith.truncf %55 : vector<2x512xf32> to vector<2x512xbf16>
    %c0_37 = arith.constant 0 : index
    %c0_38 = arith.constant 0 : index
    %57 = vector.load %arg12[%c0_37, %c0_38] : memref<512x256xbf16, #tpu.memory_space<vmem>>, vector<512x256xbf16>
    %cst_39 = arith.constant dense<0.000000e+00> : vector<2x256xf32>
    %58 = tpu.matmul %56, %57, %cst_39 {dimension_numbers = #tpu.dot_dimension_numbers<[1], [0], [0], [1], [0, 0, 1, 1], [], []>} : vector<2x512xbf16>, vector<512x256xbf16>, vector<2x256xf32> -> vector<2x256xf32>
    %c0_40 = arith.constant 0 : index
    %c0_41 = arith.constant 0 : index
    %59 = vector.load %arg13[%c0_40, %c0_41] : memref<1x256xf32, #tpu.memory_space<vmem>>, vector<1x256xf32>
    %60 = vector.broadcast %59 : vector<1x256xf32> to vector<2x256xf32>
    %61 = arith.addf %58, %60 : vector<2x256xf32>
    %cst_42 = arith.constant 0.000000e+00 : f32
    %62 = vector.broadcast %cst_42 : f32 to vector<2x256xf32>
    %63 = arith.subf %62, %61 : vector<2x256xf32>
    %64 = math.exp %63 : vector<2x256xf32>
    %cst_43 = arith.constant 1.000000e+00 : f32
    %65 = vector.broadcast %cst_43 : f32 to vector<2x256xf32>
    %66 = arith.addf %65, %64 : vector<2x256xf32>
    %cst_44 = arith.constant 1.000000e+00 : f32
    %67 = vector.broadcast %cst_44 : f32 to vector<2x256xf32>
    %68 = arith.divf %67, %66 : vector<2x256xf32>
    %c0_45 = arith.constant 0 : index
    %c0_46 = arith.constant 0 : index
    %69 = vector.load %arg15[%c0_45, %c0_46] : memref<2x256xf32, #tpu.memory_space<vmem>>, vector<2x256xf32>
    tpu.vector_store %arg15[%c0_45, %c0_46], %68 {strides = array<i32>} : memref<2x256xf32, #tpu.memory_space<vmem>>, vector<2x256xf32>,
    return
  }
}

</mosaic_0001>

<bundles_post_ra>
// kernel: network_forward.1
= control target key start
LH: loop header
LB: loop body
LE: loop exit
PB: predicated region body
PF: predicated region fallthrough
CT: control target
= control target key end

     0   :  { %21 = vsyncpa [#allocation3], 0  ;;  %s7378_s0 = inlined_call_operand.vmem [shape: bf16[2,256], index: 0, kind: input, shape index: {}]   ;;  %s7379_s1 = inlined_call_operand.vmem [shape: f32[2,128], index: 1, kind: input, shape index: {}]   ;;  %s7380_s2 = inlined_call_operand.hbm [shape: bf16[256,1024], index: 2, kind: input, shape index: {}]   ;;  %s7381_s3 = inlined_call_operand.vmem [shape: f32[1,1024], index: 3, kind: input, shape index: {}]   ;;  %s7382_s4 = inlined_call_operand.hbm [shape: bf16[1024,512], index: 4, kind: input, shape index: {}]   ;;  %s7383_s5 = inlined_call_operand.vmem [shape: f32[1,512], index: 5, kind: input, shape index: {}]   ;;  %s7384_s6 = inlined_call_operand.hbm [shape: bf16[512,512], index: 6, kind: input, shape index: {}]   ;;  %s7385_s7 = inlined_call_operand.vmem [shape: f32[1,512], index: 7, kind: input, shape index: {}]   ;;  %s7386_s8 = inlined_call_operand.hbm [shape: bf16[512,256], index: 8, kind: input, shape index: {}]   ;;  %s7387_s9 = inlined_call_operand.vmem [shape: f32[1,256], index: 9, kind: input, shape index: {}]   ;;  %s7388_s10 = inlined_call_operand.hbm [shape: bf16[128,512], index: 10, kind: input, shape index: {}]   ;;  %s7389_s11 = inlined_call_operand.vmem [shape: f32[1,512], index: 11, kind: input, shape index: {}]   ;;  %s7390_s12 = inlined_call_operand.hbm [shape: bf16[512,256], index: 12, kind: input, shape index: {}]   ;;  %s7391_s13 = inlined_call_operand.vmem [shape: f32[1,256], index: 13, kind: input, shape index: {}]   ;;  %s7392_s14 = inlined_call_operand.vmem [shape: f32[2,256], index: 14, kind: output, shape index: {0}]   ;;  %s7393_s15 = inlined_call_operand.vmem [shape: f32[2,256], index: 15, kind: output, shape index: {1}]  }
   0x1   :  { %22 = vsyncpa [#allocation5], 0 }
   0x2   :  { %23 = vsyncpa [#allocation8], 0 }
   0x3   :  { %24 = vsyncpa [#allocation11], 0  ;;  %s7058_s18 = smov [#allocation4]   ;;  %s6918_s22 = scalar_lea.hbm %s7382_s4, 32768 }
   0x4   :  { %s48_s19 = sshll.u32 %s7058_s18, 4  ;;  %p6919_p0 = scmp.ne.s32.totalorder %s7382_s4, %s6918_s22  ;;  %s49_s19 = int_to_ptr.vmem [resolvable:$true] %s48_s19 }
   0x5   :  { %p6922_p1 = scmp.lt.u32.totalorder %s6918_s22, %s7382_s4 }
   0x7   :  { %p6924_p2 = pnand %p6922_p1, %p6919_p0 }
   0x9   :  { %6927 = shalt.err (!%p6924_p2)
}
   0xa   :  { %s6928_s27 = scalar_lea.vmem %s49_s19, 32768  ;;  %p6933_p4 = scmp.lt.s32.totalorder %s49_s19, %s49_s19 }
   0xb   :  { %p6929_p3 = scmp.ne.s32.totalorder %s49_s19, %s6928_s27  ;;  %p6934_p5 = scmp.lt.s32.totalorder %s6928_s27, %s6928_s27 }
   0xd   :  { %p6935_p6 = por %p6934_p5, %p6933_p4 }
   0xf   :  { %p6936_p7 = pnand %p6935_p6, %p6929_p3 }
  0x11   :  { %6939 = shalt.err (!%p6936_p7)
}
  0x12   :  { %s7394_s28 = smov 256   ;;  %s7060_s29 = smov 16  }
  0x13   :  { %54 = dma.hbm_to_vmem [thread:$0]  %s7382_s4, 32768, %s49_s19, [#allocation5], %s7394_s28, %s7394_s28, %s7060_s29  }
  0x14   :  { %s7061_s17 = smov [#allocation7]   ;;  %s6940_s22 = scalar_lea.hbm %s7386_s8, 8192 }
  0x15   :  { %s76_s18 = sshll.u32 %s7061_s17, 4  ;;  %p6941_p8 = scmp.ne.s32.totalorder %s7386_s8, %s6940_s22  ;;  %s77_s18 = int_to_ptr.vmem [resolvable:$true] %s76_s18 }
  0x16   :  { %p6944_p9 = scmp.lt.u32.totalorder %s6940_s22, %s7386_s8 }
  0x18   :  { %p6946_p10 = pnand %p6944_p9, %p6941_p8 }
  0x1a   :  { %6949 = shalt.err (!%p6946_p10)
}
  0x1b   :  { %s6950_s27 = scalar_lea.vmem %s77_s18, 8192  ;;  %p6955_p12 = scmp.lt.s32.totalorder %s77_s18, %s77_s18 }
  0x1c   :  { %p6951_p11 = scmp.ne.s32.totalorder %s77_s18, %s6950_s27  ;;  %p6956_p13 = scmp.lt.s32.totalorder %s6950_s27, %s6950_s27 }
  0x1e   :  { %p6957_p0 = por %p6956_p13, %p6955_p12 }
  0x20   :  { %p6958_p1 = pnand %p6957_p0, %p6951_p11 }
  0x22   :  { %6961 = shalt.err (!%p6958_p1)
}
  0x23   :  { %s7396_s4 = smov 128   ;;  %s7397_s19 = smov 8  }
  0x24   :  { %82 = dma.hbm_to_vmem [thread:$0]  %s7386_s8, 8192, %s77_s18, [#allocation8], %s7396_s4, %s7396_s4, %s7397_s19  }
  0x25   :  { %s7064_s17 = smov [#allocation2]   ;;  %s6962_s23 = scalar_lea.hbm %s7380_s2, 16384 }
  0x26   :  { %s34_s20 = sshll.u32 %s7064_s17, 4  ;;  %p6963_p2 = scmp.ne.s32.totalorder %s7380_s2, %s6962_s23  ;;  %s35_s20 = int_to_ptr.vmem [resolvable:$true] %s34_s20 }
  0x27   :  { %p6966_p3 = scmp.lt.u32.totalorder %s6962_s23, %s7380_s2 }
  0x29   :  { %p6968_p4 = pnand %p6966_p3, %p6963_p2 }
  0x2b   :  { %6971 = shalt.err (!%p6968_p4)
}
  0x2c   :  { %s6972_s28 = scalar_lea.vmem %s35_s20, 16384  ;;  %p6977_p6 = scmp.lt.s32.totalorder %s35_s20, %s35_s20 }
  0x2d   :  { %p6973_p5 = scmp.ne.s32.totalorder %s35_s20, %s6972_s28  ;;  %p6978_p7 = scmp.lt.s32.totalorder %s6972_s28, %s6972_s28 }
  0x2f   :  { %p6979_p8 = por %p6978_p7, %p6977_p6 }
  0x31   :  { %p6980_p9 = pnand %p6979_p8, %p6973_p5 }
  0x33   :  { %6983 = shalt.err (!%p6980_p9)
}
  0x34   :  { %s7065_s8 = smov 512   ;;  %s7066_s18 = smov 32  }
  0x35   :  { %40 = dma.hbm_to_vmem [thread:$0]  %s7380_s2, 16384, %s35_s20, [#allocation3], %s7065_s8, %s7065_s8, %s7066_s18  }
  0x36   :  { %s7067_s17 = smov [#allocation6]   ;;  %s7068_s22 = smov [#allocation9]  }
  0x37   :  { %s62_s21 = sshll.u32 %s7067_s17, 4  ;;  %s90_s23 = sshll.u32 %s7068_s22, 4  ;;  %s63_s21 = int_to_ptr.vmem [resolvable:$true] %s62_s21  ;;  %s91_s23 = int_to_ptr.vmem [resolvable:$true] %s90_s23 }
  0x38   :  { %s6984_s26 = scalar_lea.hbm %s7384_s6, 16384 }
  0x39   :  { %p6985_p10 = scmp.ne.s32.totalorder %s7384_s6, %s6984_s26  ;;  %p6988_p11 = scmp.lt.u32.totalorder %s6984_s26, %s7384_s6 }
  0x3b   :  { %p6990_p12 = pnand %p6988_p11, %p6985_p10 }
  0x3d   :  { %6993 = shalt.err (!%p6990_p12)
}
  0x3e   :  { %s6994_s2 = scalar_lea.vmem %s63_s21, 16384  ;;  %p6999_p0 = scmp.lt.s32.totalorder %s63_s21, %s63_s21 }
  0x3f   :  { %p6995_p13 = scmp.ne.s32.totalorder %s63_s21, %s6994_s2  ;;  %p7000_p1 = scmp.lt.s32.totalorder %s6994_s2, %s6994_s2 }
  0x41   :  { %p7001_p2 = por %p7000_p1, %p6999_p0 }
  0x43   :  { %p7002_p3 = pnand %p7001_p2, %p6995_p13 }
  0x45   :  { %7005 = shalt.err (!%p7002_p3)
}
  0x46   :  { %s7398_s20 = smov 256   ;;  %s7006_s19 = scalar_lea.hbm %s7388_s10, 4096 }
  0x47   :  { %68 = dma.hbm_to_vmem [thread:$0]  %s7384_s6, 16384, %s63_s21, [#allocation5], %s7398_s20, %s7398_s20, %s7060_s29  }
  0x48   :  { %p7007_p4 = scmp.ne.s32.totalorder %s7388_s10, %s7006_s19  ;;  %p7010_p5 = scmp.lt.u32.totalorder %s7006_s19, %s7388_s10 }
  0x4a   :  { %p7012_p6 = pnand %p7010_p5, %p7007_p4 }
  0x4c   :  { %7015 = shalt.err (!%p7012_p6)
}
  0x4d   :  { %s7016_s25 = scalar_lea.vmem %s91_s23, 4096  ;;  %p7021_p8 = scmp.lt.s32.totalorder %s91_s23, %s91_s23 }
  0x4e   :  { %p7017_p7 = scmp.ne.s32.totalorder %s91_s23, %s7016_s25  ;;  %p7022_p9 = scmp.lt.s32.totalorder %s7016_s25, %s7016_s25 }
  0x50   :  { %p7023_p10 = por %p7022_p9, %p7021_p8 }
  0x52   :  { %p7024_p11 = pnand %p7023_p10, %p7017_p7 }
  0x54   :  { %7027 = shalt.err (!%p7024_p11)
}
  0x55   :  { %96 = dma.hbm_to_vmem [thread:$0]  %s7388_s10, 4096, %s91_s23, [#allocation8], %s7398_s20, %s7398_s20, %s7060_s29  }
  0x56   :  { %s7069_s26 = smov [#allocation10]   ;;  %s7028_s8 = scalar_lea.hbm %s7390_s12, 8192 }
  0x57   :  { %s104_s27 = sshll.u32 %s7069_s26, 4  ;;  %p7029_p12 = scmp.ne.s32.totalorder %s7390_s12, %s7028_s8  ;;  %s105_s27 = int_to_ptr.vmem [resolvable:$true] %s104_s27 }
  0x58   :  { %p7032_p13 = scmp.lt.u32.totalorder %s7028_s8, %s7390_s12 }
  0x5a   :  { %p7034_p0 = pnand %p7032_p13, %p7029_p12 }
  0x5c   :  { %7037 = shalt.err (!%p7034_p0)
}
  0x5d   :  { %s7038_s16 = scalar_lea.vmem %s105_s27, 8192  ;;  %p7043_p2 = scmp.lt.s32.totalorder %s105_s27, %s105_s27 }
  0x5e   :  { %p7039_p1 = scmp.ne.s32.totalorder %s105_s27, %s7038_s16  ;;  %p7044_p3 = scmp.lt.s32.totalorder %s7038_s16, %s7038_s16 }
  0x60   :  { %p7045_p4 = por %p7044_p3, %p7043_p2 }
  0x62   :  { %p7046_p5 = pnand %p7045_p4, %p7039_p1 }
  0x64   :  { %7049 = shalt.err (!%p7046_p5)
}
  0x65   :  { %s7399_s10 = smov 8   ;;  %s7400_s29 = smov 128  }
  0x66   :  { %110 = dma.hbm_to_vmem [thread:$0]  %s7390_s12, 8192, %s105_s27, [#allocation11], %s7400_s29, %s7400_s29, %s7399_s10  }
  0x67   :  { %7050 = dma.done.wait [#allocation3], 16384  }
  0x68   :  { %7051 = vsyncadd [#allocation3], 4294950912 }
  0x69   :  { %7052 = dma.done.wait [#allocation5], 49152  }
  0x6a   :  { %7053 = vsyncadd [#allocation5], 4294918144 }
  0x6b   :  { %7054 = dma.done.wait [#allocation8], 12288  }
  0x6c   :  { %7055 = vsyncadd [#allocation8], 4294955008 }
  0x6d   :  { %7056 = dma.done.wait [#allocation11], 8192  }
  0x6e   :  { %7057 = vsyncadd [#allocation11], 4294959104  ;;  %v133_v0 = vld [vmem:[#allocation2] sm:$0xff]  ;;  %v263_v9 = vlaneseq  ;;  %v7070_v10 = vmov 1966171168   ;;  %v134_v22 = vld [vmem:[#allocation2 + $0x8] sm:$0xff] }
  0x6f   :  { %v137_v1 = vld [vmem:[#allocation2 + $0x20] sm:$0xff]  ;;  %v313_v11 = vunpack.c.l.s4 %v7070_v10  ;;  %v138_v24 = vld [vmem:[#allocation2 + $0x28] sm:$0xff] }
  0x70   :  { %v141_v2 = vld [vmem:[#allocation2 + $0x40] sm:$0xff]  ;;  %v5353_v3 = vcombine.high %v133_v0, %v137_v1  ;;  %v5352_v4 = vcombine.low %v133_v0, %v137_v1  ;;  %v7239_v16 = vshrl.u32 %v263_v9, 7  ;;  %v142_v26 = vld [vmem:[#allocation2 + $0x48] sm:$0xff]  ;;  %v5355_v28 = vcombine.high %v134_v22, %v138_v24 }
  0x71   :  { %v145_v5 = vld [vmem:[#allocation2 + $0x60] sm:$0xff]  ;;  %v314_v17 = vunpack.c.0.s8 %v313_v11  ;;  %v5354_v29 = vcombine.low %v134_v22, %v138_v24  ;;  %v146_v31 = vld [vmem:[#allocation2 + $0x68] sm:$0xff] }
  0x72   :  { %v5361_v6 = vcombine.high %v141_v2, %v145_v5  ;;  %v149_v7 = vld [vmem:[#allocation2 + $0x80] sm:$0xff]  ;;  %968 = vmatprep.subr.bf16.mxu0 %v5353_v3  ;;  %v5360_v12 = vcombine.low %v141_v2, %v145_v5  ;;  %v5363_v33 = vcombine.high %v142_v26, %v146_v31  ;;  %v150_v34 = vld [vmem:[#allocation2 + $0x88] sm:$0xff]  ;;  %1009 = vmatprep.subr.bf16.mxu1 %v5355_v28 }
  0x73   :  { %v153_v8 = vld [vmem:[#allocation2 + $0xa0] sm:$0xff]  ;;  %969 = vmatpush1.bf16.msra.mxu0 %v5352_v4  ;;  %v7242_v23 = vsub.s32 %v314_v17, %v7239_v16  ;;  %v154_v35 = vld [vmem:[#allocation2 + $0xa8] sm:$0xff]  ;;  %1010 = vmatpush1.bf16.msra.mxu1 %v5354_v29  ;;  %v5362_v39 = vcombine.low %v142_v26, %v146_v31 }
  0x74   :  { %970 = vmatprep.subr.bf16.mxu0 %v5361_v6  ;;  %v5369_v13 = vcombine.high %v149_v7, %v153_v8  ;;  %v157_v14 = vld [vmem:[#allocation2 + $0xc0] sm:$0xff]  ;;  %v5368_v18 = vcombine.low %v149_v7, %v153_v8  ;;  %v5371_v41 = vcombine.high %v150_v34, %v154_v35  ;;  %1011 = vmatprep.subr.bf16.mxu1 %v5363_v33  ;;  %v158_v43 = vld [vmem:[#allocation2 + $0xc8] sm:$0xff] }
  0x75   :  { %v161_v15 = vld [vmem:[#allocation2 + $0xe0] sm:$0xff]  ;;  %v162_v44 = vld [vmem:[#allocation2 + $0xe8] sm:$0xff]  ;;  %v5370_v47 = vcombine.low %v150_v34, %v154_v35 }
  0x76   :  { %v5377_v19 = vcombine.high %v157_v14, %v161_v15  ;;  %v165_v20 = vld [vmem:[#allocation2 + $0x100] sm:$0xff]  ;;  %v5376_v27 = vcombine.low %v157_v14, %v161_v15  ;;  %v5379_v49 = vcombine.high %v158_v43, %v162_v44  ;;  %v166_v51 = vld [vmem:[#allocation2 + $0x108] sm:$0xff]  ;;  %v5378_v55 = vcombine.low %v158_v43, %v162_v44 }
  0x77   :  { %971 = vmatpush1.bf16.msra.mxu0 %v5360_v12  ;;  %v169_v21 = vld [vmem:[#allocation2 + $0x120] sm:$0xff]  ;;  %1012 = vmatpush1.bf16.msra.mxu1 %v5362_v39  ;;  %v170_v52 = vld [vmem:[#allocation2 + $0x128] sm:$0xff] }
  0x78   :  { %972 = vmatprep.subr.bf16.mxu0 %v5369_v13  ;;  %v7247_v25 = vld.sshfl [vmem:[%s7378_s0] sm:$0x11 pattern:$0x75316420]  ;;  %v5385_v32 = vcombine.high %v165_v20, %v169_v21  ;;  %v5384_v40 = vcombine.low %v165_v20, %v169_v21  ;;  %1013 = vmatprep.subr.bf16.mxu1 %v5371_v41  ;;  %v5387_v57 = vcombine.high %v166_v51, %v170_v52  ;;  %v174_v59 = vld [vmem:[#allocation2 + $0x148] sm:$0xff] }
  0x79   :  { %v311_v30 = vcombine.high %v7247_v25, %v7247_v25  ;;  %v173_v36 = vld [vmem:[#allocation2 + $0x140] sm:$0xff]  ;;  %v178_v60 = vld [vmem:[#allocation2 + $0x168] sm:$0xff]  ;;  %v5386_v63 = vcombine.low %v166_v51, %v170_v52 }
  0x7a   :  { %v177_v37 = vld [vmem:[#allocation2 + $0x160] sm:$0xff]  ;;  %v5395_v1 = vcombine.high %v174_v59, %v178_v60  ;;  %v182_v3 = vld [vmem:[#allocation2 + $0x188] sm:$0xff]  ;;  %v5394_v7 = vcombine.low %v174_v59, %v178_v60 }
  0x7b   :  { %973 = vmatpush1.bf16.msra.mxu0 %v5368_v18  ;;  %v7252_v38 = vrot.slane %v311_v30, %v7242_v23  ;;  %v5393_v42 = vcombine.high %v173_v36, %v177_v37  ;;  %v181_v45 = vld [vmem:[#allocation2 + $0x180] sm:$0xff]  ;;  %v5392_v48 = vcombine.low %v173_v36, %v177_v37  ;;  %1014 = vmatpush1.bf16.msra.mxu1 %v5370_v47  ;;  %v186_v4 = vld [vmem:[#allocation2 + $0x1a8] sm:$0xff] }
  0x7c   :  { %974 = vmatprep.subr.bf16.mxu0 %v5377_v19  ;;  %v185_v46 = vld [vmem:[#allocation2 + $0x1a0] sm:$0xff]  ;;  %1015 = vmatprep.subr.bf16.mxu1 %v5379_v49  ;;  %v5403_v9 = vcombine.high %v182_v3, %v186_v4  ;;  %v190_v11 = vld [vmem:[#allocation2 + $0x1c8] sm:$0xff]  ;;  %v5402_v15 = vcombine.low %v182_v3, %v186_v4 }
  0x7d   :  { %1000 = vmatprep.mubr.bf16.mxu0 %v7252_v38  ;;  %1041 = vmatprep.mubr.bf16.mxu1 %v7252_v38  ;;  %v5401_v50 = vcombine.high %v181_v45, %v185_v46  ;;  %v189_v53 = vld [vmem:[#allocation2 + $0x1c0] sm:$0xff]  ;;  %v5400_v56 = vcombine.low %v181_v45, %v185_v46  ;;  %v194_v12 = vld [vmem:[#allocation2 + $0x1e8] sm:$0xff] }
  0x7e   :  { %v193_v54 = vld [vmem:[#allocation2 + $0x1e0] sm:$0xff]  ;;  %v5411_v18 = vcombine.high %v190_v11, %v194_v12  ;;  %v198_v20 = vld [vmem:[#allocation2 + $0x208] sm:$0xff]  ;;  %v5410_v26 = vcombine.low %v190_v11, %v194_v12  ;;  %v7258_v11 = vrot.slane %v7247_v25, %v7242_v23 }
  0x7f   :  { %975 = vmatpush1.bf16.msra.mxu0 %v5376_v27  ;;  %v5409_v58 = vcombine.high %v189_v53, %v193_v54  ;;  %v197_v61 = vld [vmem:[#allocation2 + $0x200] sm:$0xff]  ;;  %1016 = vmatpush1.bf16.msra.mxu1 %v5378_v55  ;;  %v5408_v0 = vcombine.low %v189_v53, %v193_v54  ;;  %v202_v21 = vld [vmem:[#allocation2 + $0x228] sm:$0xff] }
  0x80   :  { %976 = vmatprep.subr.bf16.mxu0 %v5385_v32  ;;  %v201_v62 = vld [vmem:[#allocation2 + $0x220] sm:$0xff]  ;;  %1017 = vmatprep.subr.bf16.mxu1 %v5387_v57  ;;  %v5419_v28 = vcombine.high %v198_v20, %v202_v21  ;;  %v206_v30 = vld [vmem:[#allocation2 + $0x248] sm:$0xff]  ;;  %v5418_v34 = vcombine.low %v198_v20, %v202_v21  ;;  %v155_v20 = vld [vmem:[#allocation2 + $0xb0] sm:$0xff] }
  0x81   :  { %v5417_v2 = vcombine.high %v197_v61, %v201_v62  ;;  %v205_v5 = vld [vmem:[#allocation2 + $0x240] sm:$0xff]  ;;  %v5416_v8 = vcombine.low %v197_v61, %v201_v62  ;;  %v210_v31 = vld [vmem:[#allocation2 + $0x268] sm:$0xff] }
  0x82   :  { %v209_v6 = vld [vmem:[#allocation2 + $0x260] sm:$0xff]  ;;  %v5427_v36 = vcombine.high %v206_v30, %v210_v31  ;;  %v214_v39 = vld [vmem:[#allocation2 + $0x288] sm:$0xff]  ;;  %v5426_v43 = vcombine.low %v206_v30, %v210_v31 }
  0x83   :  { %977 = vmatpush1.bf16.msra.mxu0 %v5384_v40  ;;  %1018 = vmatpush1.bf16.msra.mxu1 %v5386_v63  ;;  %v5425_v10 = vcombine.high %v205_v5, %v209_v6  ;;  %v213_v13 = vld [vmem:[#allocation2 + $0x280] sm:$0xff]  ;;  %v5424_v17 = vcombine.low %v205_v5, %v209_v6  ;;  %v218_v40 = vld [vmem:[#allocation2 + $0x2a8] sm:$0xff] }
  0x84   :  { %978 = vmatprep.subr.bf16.mxu0 %v5393_v42  ;;  %1019 = vmatprep.subr.bf16.mxu1 %v5395_v1  ;;  %v217_v14 = vld [vmem:[#allocation2 + $0x2a0] sm:$0xff]  ;;  %v5435_v45 = vcombine.high %v214_v39, %v218_v40  ;;  %v222_v47 = vld [vmem:[#allocation2 + $0x2c8] sm:$0xff]  ;;  %v5434_v51 = vcombine.low %v214_v39, %v218_v40  ;;  %v135_v1 = vld [vmem:[#allocation2 + $0x10] sm:$0xff] }
  0x85   :  { %v5433_v19 = vcombine.high %v213_v13, %v217_v14  ;;  %v221_v22 = vld [vmem:[#allocation2 + $0x2c0] sm:$0xff]  ;;  %v5432_v27 = vcombine.low %v213_v13, %v217_v14  ;;  %v230_v55 = vld [vmem:[#allocation2 + $0x308] sm:$0xff] }
  0x86   :  { %v225_v24 = vld [vmem:[#allocation2 + $0x2e0] sm:$0xff]  ;;  %v238_v63 = vld [vmem:[#allocation2 + $0x348] sm:$0xff] }
  0x87   :  { %979 = vmatpush1.bf16.msra.mxu0 %v5392_v48  ;;  %1020 = vmatpush1.bf16.msra.mxu1 %v5394_v7  ;;  %v5441_v29 = vcombine.high %v221_v22, %v225_v24  ;;  %v229_v32 = vld [vmem:[#allocation2 + $0x300] sm:$0xff]  ;;  %v5440_v35 = vcombine.low %v221_v22, %v225_v24  ;;  %v226_v48 = vld [vmem:[#allocation2 + $0x2e8] sm:$0xff]  ;;  %v136_v24 = vld [vmem:[#allocation2 + $0x18] sm:$0xff] }
  0x88   :  { %980 = vmatprep.subr.bf16.mxu0 %v5401_v50  ;;  %1021 = vmatprep.subr.bf16.mxu1 %v5403_v9  ;;  %v233_v33 = vld [vmem:[#allocation2 + $0x320] sm:$0xff]  ;;  %v5443_v53 = vcombine.high %v222_v47, %v226_v48  ;;  %v5442_v59 = vcombine.low %v222_v47, %v226_v48  ;;  %v246_v6 = vld [vmem:[#allocation2 + $0x388] sm:$0xff]  ;;  %v143_v9 = vld [vmem:[#allocation2 + $0x50] sm:$0xff] }
  0x89   :  { %v5449_v37 = vcombine.high %v229_v32, %v233_v33  ;;  %v237_v41 = vld [vmem:[#allocation2 + $0x340] sm:$0xff]  ;;  %v5448_v44 = vcombine.low %v229_v32, %v233_v33  ;;  %v250_v7 = vld [vmem:[#allocation2 + $0x3a8] sm:$0xff]  ;;  %v144_v33 = vld [vmem:[#allocation2 + $0x58] sm:$0xff] }
  0x8a   :  { %v241_v42 = vld [vmem:[#allocation2 + $0x360] sm:$0xff]  ;;  %v5467_v13 = vcombine.high %v246_v6, %v250_v7  ;;  %v5466_v21 = vcombine.low %v246_v6, %v250_v7  ;;  %v183_v48 = vld [vmem:[#allocation2 + $0x190] sm:$0xff]  ;;  %v184_v6 = vld [vmem:[#allocation2 + $0x198] sm:$0xff] }
  0x8b   :  { %981 = vmatpush1.bf16.msra.mxu0 %v5400_v56  ;;  %1022 = vmatpush1.bf16.msra.mxu1 %v5402_v15  ;;  %v5457_v46 = vcombine.high %v237_v41, %v241_v42  ;;  %v245_v49 = vld [vmem:[#allocation2 + $0x380] sm:$0xff]  ;;  %v5456_v52 = vcombine.low %v237_v41, %v241_v42  ;;  %v234_v56 = vld [vmem:[#allocation2 + $0x328] sm:$0xff]  ;;  %v152_v42 = vld [vmem:[#allocation2 + $0x98] sm:$0xff] }
  0x8c   :  { %982 = vmatprep.subr.bf16.mxu0 %v5409_v58  ;;  %1023 = vmatprep.subr.bf16.mxu1 %v5411_v18  ;;  %v249_v50 = vld [vmem:[#allocation2 + $0x3a0] sm:$0xff]  ;;  %v5451_v61 = vcombine.high %v230_v55, %v234_v56  ;;  %v5450_v3 = vcombine.low %v230_v55, %v234_v56  ;;  %v254_v15 = vld [vmem:[#allocation2 + $0x3c8] sm:$0xff]  ;;  %v168_v55 = vld [vmem:[#allocation2 + $0x118] sm:$0xff] }
  0x8d   :  { %v5465_v54 = vcombine.high %v245_v49, %v249_v50  ;;  %v253_v57 = vld [vmem:[#allocation2 + $0x3c0] sm:$0xff]  ;;  %v5464_v60 = vcombine.low %v245_v49, %v249_v50  ;;  %v187_v49 = vld [vmem:[#allocation2 + $0x1b0] sm:$0xff]  ;;  %v172_v56 = vld [vmem:[#allocation2 + $0x138] sm:$0xff] }
  0x8e   :  { %v257_v58 = vld [vmem:[#allocation2 + $0x3e0] sm:$0xff]  ;;  %v188_v7 = vld [vmem:[#allocation2 + $0x1b8] sm:$0xff] }
  0x8f   :  { %983 = vmatpush1.bf16.msra.mxu0 %v5408_v0  ;;  %1024 = vmatpush1.bf16.msra.mxu1 %v5410_v26  ;;  %v5473_v62 = vcombine.high %v253_v57, %v257_v58  ;;  %v242_v0 = vld [vmem:[#allocation2 + $0x368] sm:$0xff]  ;;  %v5472_v4 = vcombine.low %v253_v57, %v257_v58  ;;  %v140_v26 = vld [vmem:[#allocation2 + $0x38] sm:$0xff]  ;;  %v191_v58 = vld [vmem:[#allocation2 + $0x1d0] sm:$0xff] }
  0x90   :  { %984 = vmatprep.subr.bf16.mxu0 %v5417_v2  ;;  %1025 = vmatprep.subr.bf16.mxu1 %v5419_v28  ;;  %v139_v2 = vld [vmem:[#allocation2 + $0x30] sm:$0xff]  ;;  %v5459_v5 = vcombine.high %v238_v63, %v242_v0  ;;  %v5458_v12 = vcombine.low %v238_v63, %v242_v0  ;;  %v5359_v31 = vcombine.high %v136_v24, %v140_v26  ;;  %v180_v63 = vld [vmem:[#allocation2 + $0x178] sm:$0xff] }
  0x91   :  { %v5356_v14 = vcombine.low %v135_v1, %v139_v2  ;;  %v163_v28 = vld [vmem:[#allocation2 + $0xf0] sm:$0xff]  ;;  %v5404_v0 = vcombine.low %v183_v48, %v187_v49 }
  0x93   :  { %985 = vmatpush1.bf16.msra.mxu0 %v5416_v8  ;;  %1026 = vmatpush1.bf16.msra.mxu1 %v5418_v34  ;;  %v5357_v8 = vcombine.high %v135_v1, %v139_v2  ;;  %v148_v34 = vld [vmem:[#allocation2 + $0x78] sm:$0xff]  ;;  %v199_v1 = vld [vmem:[#allocation2 + $0x210] sm:$0xff] }
  0x94   :  { %986 = vmatprep.subr.bf16.mxu0 %v5425_v10  ;;  %1027 = vmatprep.subr.bf16.mxu1 %v5427_v36  ;;  %v147_v10 = vld [vmem:[#allocation2 + $0x70] sm:$0xff]  ;;  %v5367_v40 = vcombine.high %v144_v33, %v148_v34 }
  0x95   :  { %v5365_v18 = vcombine.high %v143_v9, %v147_v10  ;;  %v5364_v23 = vcombine.low %v143_v9, %v147_v10  ;;  %v171_v36 = vld [vmem:[#allocation2 + $0x130] sm:$0xff] }
  0x96   :  { %v203_v2 = vld [vmem:[#allocation2 + $0x230] sm:$0xff] }
  0x97   :  { %987 = vmatpush1.bf16.msra.mxu0 %v5424_v17  ;;  %1028 = vmatpush1.bf16.msra.mxu1 %v5426_v43  ;;  %v258_v17 = vld [vmem:[#allocation2 + $0x3e8] sm:$0xff]  ;;  %v156_v43 = vld [vmem:[#allocation2 + $0xb8] sm:$0xff]  ;;  %v207_v9 = vld [vmem:[#allocation2 + $0x250] sm:$0xff] }
  0x98   :  { %988 = vmatprep.subr.bf16.mxu0 %v5433_v19  ;;  %1029 = vmatprep.subr.bf16.mxu1 %v5435_v45  ;;  %v151_v19 = vld [vmem:[#allocation2 + $0x90] sm:$0xff]  ;;  %v5475_v22 = vcombine.high %v254_v15, %v258_v17  ;;  %v5375_v50 = vcombine.high %v152_v42, %v156_v43 }
  0x99   :  { %v5373_v25 = vcombine.high %v151_v19, %v155_v20  ;;  %v5372_v30 = vcombine.low %v151_v19, %v155_v20  ;;  %v179_v45 = vld [vmem:[#allocation2 + $0x170] sm:$0xff] }
  0x9a   :  { %v211_v10 = vld [vmem:[#allocation2 + $0x270] sm:$0xff] }
  0x9b   :  { %989 = vmatpush1.bf16.msra.mxu0 %v5432_v27  ;;  %1030 = vmatpush1.bf16.msra.mxu1 %v5434_v51  ;;  %v159_v27 = vld [vmem:[#allocation2 + $0xd0] sm:$0xff]  ;;  %v160_v51 = vld [vmem:[#allocation2 + $0xd8] sm:$0xff] }
  0x9c   :  { %990 = vmatprep.subr.bf16.mxu0 %v5441_v29  ;;  %1031 = vmatprep.subr.bf16.mxu1 %v5443_v53  ;;  %v5474_v29 = vcombine.low %v254_v15, %v258_v17  ;;  %v5381_v32 = vcombine.high %v159_v27, %v163_v28  ;;  %v5380_v39 = vcombine.low %v159_v27, %v163_v28  ;;  %v192_v15 = vld [vmem:[#allocation2 + $0x1d8] sm:$0xff]  ;;  %v215_v19 = vld [vmem:[#allocation2 + $0x290] sm:$0xff] }
  0x9d   :  { %v196_v17 = vld [vmem:[#allocation2 + $0x1f8] sm:$0xff]  ;;  %v219_v20 = vld [vmem:[#allocation2 + $0x2b0] sm:$0xff] }
  0x9e   :  { %v223_v27 = vld [vmem:[#allocation2 + $0x2d0] sm:$0xff] }
  0x9f   :  { %991 = vmatpush1.bf16.msra.mxu0 %v5440_v35  ;;  %1032 = vmatpush1.bf16.msra.mxu1 %v5442_v59  ;;  %v167_v35 = vld [vmem:[#allocation2 + $0x110] sm:$0xff] }
  0xa0   :  { %992 = vmatprep.subr.bf16.mxu0 %v5449_v37  ;;  %1033 = vmatprep.subr.bf16.mxu1 %v5451_v61  ;;  %v5358_v37 = vcombine.low %v136_v24, %v140_v26  ;;  %v5389_v41 = vcombine.high %v167_v35, %v171_v36  ;;  %v5388_v47 = vcombine.low %v167_v35, %v171_v36  ;;  %v195_v59 = vld [vmem:[#allocation2 + $0x1f0] sm:$0xff]  ;;  %v204_v24 = vld [vmem:[#allocation2 + $0x238] sm:$0xff] }
  0xa1   :  { %v5428_v26 = vcombine.low %v207_v9, %v211_v10  ;;  %v227_v28 = vld [vmem:[#allocation2 + $0x2f0] sm:$0xff] }
  0xa2   :  { %v231_v35 = vld [vmem:[#allocation2 + $0x310] sm:$0xff] }
  0xa3   :  { %993 = vmatpush1.bf16.msra.mxu0 %v5448_v44  ;;  %1034 = vmatpush1.bf16.msra.mxu1 %v5450_v3  ;;  %v175_v44 = vld [vmem:[#allocation2 + $0x150] sm:$0xff]  ;;  %v5391_v3 = vcombine.high %v168_v55, %v172_v56 }
  0xa4   :  { %994 = vmatprep.subr.bf16.mxu0 %v5457_v46  ;;  %1035 = vmatprep.subr.bf16.mxu1 %v5459_v5  ;;  %v5366_v46 = vcombine.low %v144_v33, %v148_v34  ;;  %v5397_v53 = vcombine.high %v175_v44, %v179_v45  ;;  %v5396_v57 = vcombine.low %v175_v44, %v179_v45  ;;  %v212_v33 = vld [vmem:[#allocation2 + $0x278] sm:$0xff]  ;;  %v235_v36 = vld [vmem:[#allocation2 + $0x330] sm:$0xff] }
  0xa5   :  { %v5390_v5 = vcombine.low %v168_v55, %v172_v56  ;;  %v5436_v34 = vcombine.low %v215_v19, %v219_v20  ;;  %v239_v44 = vld [vmem:[#allocation2 + $0x350] sm:$0xff] }
  0xa6   :  { %v243_v45 = vld [vmem:[#allocation2 + $0x370] sm:$0xff] }
  0xa7   :  { %995 = vmatpush1.bf16.msra.mxu0 %v5456_v52  ;;  %1036 = vmatpush1.bf16.msra.mxu1 %v5458_v12  ;;  %v164_v52 = vld [vmem:[#allocation2 + $0xf8] sm:$0xff]  ;;  %v5461_v55 = vcombine.high %v239_v44, %v243_v45 }
  0xa8   :  { %996 = vmatprep.subr.bf16.mxu0 %v5465_v54  ;;  %1037 = vmatprep.subr.bf16.mxu1 %v5467_v13  ;;  %v5374_v54 = vcombine.low %v152_v42, %v156_v43  ;;  %v5382_v61 = vcombine.low %v160_v51, %v164_v52  ;;  %v5421_v13 = vcombine.high %v199_v1, %v203_v2  ;;  %v220_v42 = vld [vmem:[#allocation2 + $0x2b8] sm:$0xff] }
  0xa9   :  { %v5444_v43 = vcombine.low %v223_v27, %v227_v28 }
  0xab   :  { %997 = vmatpush1.bf16.msra.mxu0 %v5464_v60  ;;  %1038 = vmatpush1.bf16.msra.mxu1 %v5466_v21  ;;  %v5405_v60 = vcombine.high %v183_v48, %v187_v49  ;;  %v5407_v21 = vcombine.high %v184_v6, %v188_v7  ;;  %v224_v49 = vld [vmem:[#allocation2 + $0x2d8] sm:$0xff] }
  0xac   :  { %998 = vmatprep.subr.bf16.mxu0 %v5473_v62  ;;  %1039 = vmatprep.subr.bf16.mxu1 %v5475_v22  ;;  %v176_v62 = vld [vmem:[#allocation2 + $0x158] sm:$0xff]  ;;  %v5429_v22 = vcombine.high %v207_v9, %v211_v10 }
  0xad   :  { %v5399_v12 = vcombine.high %v176_v62, %v180_v63 }
  0xaf   :  { %999 = vmatpush1.bf16.msra.mxu0 %v5472_v4  ;;  %1040 = vmatpush1.bf16.msra.mxu1 %v5474_v29  ;;  %v5413_v4 = vcombine.high %v191_v58, %v195_v59  ;;  %v5415_v29 = vcombine.high %v192_v15, %v196_v17 }
  0xb0   :  { %1050 = vmatprep.subr.bf16.mxu0 %v5357_v8  ;;  %1091 = vmatprep.subr.bf16.mxu1 %v5359_v31  ;;  %v5412_v8 = vcombine.low %v191_v58, %v195_v59  ;;  %v5414_v31 = vcombine.low %v192_v15, %v196_v17  ;;  %v236_v58 = vld [vmem:[#allocation2 + $0x338] sm:$0xff]  ;;  %v5460_v59 = vcombine.low %v239_v44, %v243_v45  ;;  %v6100_v17 = vld [vmem:[#allocation4 + $0x24] ss:$16 sps:$4 sm:$0xff]   ;;  %v6134_v45 = vld [vmem:[#allocation4 + $0xe0] ss:$16 sps:$4 sm:$0xff]  }
  0xb1   :  { %v260_v15 = vld [vmem:[#allocation2 + $0x3f8] sm:$0xff] }
  0xb2   :  { %1001 = vmatmul.mubr.bf16.vlgmr.msra.gmra.mrb[0].mxu0 %v7258_v11  ;;  %1042 = vmatmul.mubr.bf16.vlgmr.msra.gmra.mrb[0].mxu1 %v7258_v11  ;;  %v6127_v44 = vld [vmem:[#allocation4 + $0xac] ss:$16 sps:$4 sm:$0xff]  }
  0xb3   :  { %1051 = vmatpush1.bf16.msra.mxu0 %v5356_v14  ;;  %1082 = vmatprep.mubr.bf16.mxu0 %v7252_v38  ;;  %v5398_v14 = vcombine.low %v176_v62, %v180_v63 }
  0xb4   :  { %1052 = vmatprep.subr.bf16.mxu0 %v5365_v18  ;;  %1092 = vmatpush1.bf16.msra.mxu1 %v5358_v37  ;;  %v5420_v18 = vcombine.low %v199_v1, %v203_v2  ;;  %v244_v1 = vld [vmem:[#allocation2 + $0x378] sm:$0xff] }
  0xb5   :  { %1123 = vmatprep.mubr.bf16.mxu1 %v7252_v38  ;;  %1093 = vmatprep.subr.bf16.mxu1 %v5367_v40  ;;  %v5383_v38 = vcombine.high %v160_v51, %v164_v52  ;;  %v5452_v51 = vcombine.low %v231_v35, %v235_v36  ;;  %v247_v52 = vld [vmem:[#allocation2 + $0x390] sm:$0xff] }
  0xb7   :  { %1053 = vmatpush1.bf16.msra.mxu0 %v5364_v23  ;;  %v5406_v23 = vcombine.low %v184_v6, %v188_v7  ;;  %v248_v6 = vld [vmem:[#allocation2 + $0x398] sm:$0xff] }
  0xb8   :  { %1054 = vmatprep.subr.bf16.mxu0 %v5373_v25  ;;  %1094 = vmatpush1.bf16.msra.mxu1 %v5366_v46  ;;  %v200_v25 = vld [vmem:[#allocation2 + $0x218] sm:$0xff] }
  0xb9   :  { %1095 = vmatprep.subr.bf16.mxu1 %v5375_v50  ;;  %v5423_v37 = vcombine.high %v200_v25, %v204_v24  ;;  %v5422_v40 = vcombine.low %v200_v25, %v204_v24  ;;  %v228_v50 = vld [vmem:[#allocation2 + $0x2f8] sm:$0xff]  ;;  %v6104_v25 = vld [vmem:[#allocation4 + $0x40] ss:$16 sps:$4 sm:$0xff]  }
  0xba   :  { %v5446_v63 = vcombine.low %v224_v49, %v228_v50  ;;  %v252_v7 = vld [vmem:[#allocation2 + $0x3b8] sm:$0xff] }
  0xbb   :  { %1055 = vmatpush1.bf16.msra.mxu0 %v5372_v30  ;;  %v5437_v30 = vcombine.high %v215_v19, %v219_v20  ;;  %v6098_v19 = vld [vmem:[#allocation4 + $0x20] ss:$16 sps:$4 sm:$0xff]   ;;  %v5470_v20 = vcombine.low %v248_v6, %v252_v7 }
  0xbc   :  { %1056 = vmatprep.subr.bf16.mxu0 %v5381_v32  ;;  %1096 = vmatpush1.bf16.msra.mxu1 %v5374_v54  ;;  %v208_v32 = vld [vmem:[#allocation2 + $0x258] sm:$0xff] }
  0xbd   :  { %1097 = vmatprep.subr.bf16.mxu1 %v5383_v38  ;;  %v5431_v46 = vcombine.high %v208_v32, %v212_v33  ;;  %v5430_v48 = vcombine.low %v208_v32, %v212_v33  ;;  %v255_v38 = vld [vmem:[#allocation2 + $0x3d0] sm:$0xff]  ;;  %v6109_v32 = vld [vmem:[#allocation4 + $0x4c] ss:$16 sps:$4 sm:$0xff]  }
  0xbe   :  { %v6116_v33 = vld [vmem:[#allocation4 + $0x80] ss:$16 sps:$4 sm:$0xff]  }
  0xbf   :  { %1057 = vmatpush1.bf16.msra.mxu0 %v5380_v39  ;;  %v5445_v39 = vcombine.high %v223_v27, %v227_v28  ;;  %v6095_v27 = vld [vmem:[#allocation4 + $0x8] ss:$16 sps:$4 sm:$0xff]   ;;  %v6103_v28 = vld [vmem:[#allocation4 + $0x2c] ss:$16 sps:$4 sm:$0xff]  }
  0xc0   :  { %1058 = vmatprep.subr.bf16.mxu0 %v5389_v41  ;;  %1098 = vmatpush1.bf16.msra.mxu1 %v5382_v61  ;;  %v216_v41 = vld [vmem:[#allocation2 + $0x298] sm:$0xff]  ;;  %v5447_v61 = vcombine.high %v224_v49, %v228_v50  ;;  %v6140_v49 = vld [vmem:[#allocation4 + $0x100] ss:$16 sps:$4 sm:$0xff]  }
  0xc1   :  { %1099 = vmatprep.subr.bf16.mxu1 %v5391_v3  ;;  %v5439_v54 = vcombine.high %v216_v41, %v220_v42  ;;  %v5438_v56 = vcombine.low %v216_v41, %v220_v42  ;;  %v6121_v41 = vld [vmem:[#allocation4 + $0x8c] ss:$16 sps:$4 sm:$0xff]   ;;  %v6128_v42 = vld [vmem:[#allocation4 + $0xc0] ss:$16 sps:$4 sm:$0xff]   ;;  %v6131_v50 = vld [vmem:[#allocation4 + $0xc8] ss:$16 sps:$4 sm:$0xff]  }
  0xc3   :  { %1059 = vmatpush1.bf16.msra.mxu0 %v5388_v47  ;;  %v5453_v47 = vcombine.high %v231_v35, %v235_v36  ;;  %v6107_v35 = vld [vmem:[#allocation4 + $0x48] ss:$16 sps:$4 sm:$0xff]   ;;  %v6115_v36 = vld [vmem:[#allocation4 + $0x6c] ss:$16 sps:$4 sm:$0xff]  }
  0xc4   :  { %1060 = vmatprep.subr.bf16.mxu0 %v5397_v53  ;;  %1100 = vmatpush1.bf16.msra.mxu1 %v5390_v5  ;;  %v251_v53 = vld [vmem:[#allocation2 + $0x3b0] sm:$0xff] }
  0xc5   :  { %1101 = vmatprep.subr.bf16.mxu1 %v5399_v12  ;;  %v5469_v62 = vcombine.high %v247_v52, %v251_v53  ;;  %v5468_v2 = vcombine.low %v247_v52, %v251_v53  ;;  %v6092_v12 = vld [vmem:[#allocation4] ss:$16 sps:$4 sm:$0xff]   ;;  %v6139_v52 = vld [vmem:[#allocation4 + $0xec] ss:$16 sps:$4 sm:$0xff]  }
  0xc6   :  { %v6146_v53 = vld [vmem:[#allocation4 + $0x120] ss:$16 sps:$4 sm:$0xff]  }
  0xc7   :  { %1061 = vmatpush1.bf16.msra.mxu0 %v5396_v57  ;;  %v232_v57 = vld [vmem:[#allocation2 + $0x318] sm:$0xff] }
  0xc8   :  { %1062 = vmatprep.subr.bf16.mxu0 %v5405_v60  ;;  %1102 = vmatpush1.bf16.msra.mxu1 %v5398_v14  ;;  %v259_v60 = vld [vmem:[#allocation2 + $0x3f0] sm:$0xff]  ;;  %v5455_v3 = vcombine.high %v232_v57, %v236_v58  ;;  %v5454_v5 = vcombine.low %v232_v57, %v236_v58  ;;  %v256_v14 = vld [vmem:[#allocation2 + $0x3d8] sm:$0xff] }
  0xc9   :  { %1103 = vmatprep.subr.bf16.mxu1 %v5407_v21  ;;  %v5476_v9 = vcombine.low %v255_v38, %v259_v60  ;;  %v6106_v21 = vld [vmem:[#allocation4 + $0x44] ss:$16 sps:$4 sm:$0xff]   ;;  %v5478_v24 = vcombine.low %v256_v14, %v260_v15  ;;  %v6152_v57 = vld [vmem:[#allocation4 + $0x140] ss:$16 sps:$4 sm:$0xff]   ;;  %v6143_v58 = vld [vmem:[#allocation4 + $0x108] ss:$16 sps:$4 sm:$0xff]  }
  0xcb   :  { %1063 = vmatpush1.bf16.msra.mxu0 %v5404_v0  ;;  %v240_v0 = vld [vmem:[#allocation2 + $0x358] sm:$0xff] }
  0xcc   :  { %1064 = vmatprep.subr.bf16.mxu0 %v5413_v4  ;;  %1104 = vmatpush1.bf16.msra.mxu1 %v5406_v23  ;;  %v5477_v4 = vcombine.high %v255_v38, %v259_v60  ;;  %v5463_v10 = vcombine.high %v240_v0, %v244_v1  ;;  %v6097_v23 = vld [vmem:[#allocation4 + $0xc] ss:$16 sps:$4 sm:$0xff]   ;;  %v6158_v60 = vld [vmem:[#allocation4 + $0x160] ss:$16 sps:$4 sm:$0xff]  }
  0xcd   :  { %1105 = vmatprep.subr.bf16.mxu1 %v5415_v29  ;;  %v6110_v29 = vld [vmem:[#allocation4 + $0x60] ss:$16 sps:$4 sm:$0xff]   ;;  %v6151_v38 = vld [vmem:[#allocation4 + $0x12c] ss:$16 sps:$4 sm:$0xff]  }
  0xcf   :  { %1065 = vmatpush1.bf16.msra.mxu0 %v5412_v8  ;;  %v6094_v8 = vld [vmem:[#allocation4 + $0x4] ss:$16 sps:$4 sm:$0xff]  }
  0xd0   :  { %1066 = vmatprep.subr.bf16.mxu0 %v5421_v13  ;;  %1106 = vmatpush1.bf16.msra.mxu1 %v5414_v31  ;;  %v5462_v13 = vcombine.low %v240_v0, %v244_v1  ;;  %v6101_v31 = vld [vmem:[#allocation4 + $0x28] ss:$16 sps:$4 sm:$0xff]   ;;  %v6164_v0 = vld [vmem:[#allocation4 + $0x180] ss:$16 sps:$4 sm:$0xff]  }
  0xd1   :  { %1107 = vmatprep.subr.bf16.mxu1 %v5423_v37  ;;  %v6122_v37 = vld [vmem:[#allocation4 + $0xa0] ss:$16 sps:$4 sm:$0xff]   ;;  %v6155_v1 = vld [vmem:[#allocation4 + $0x148] ss:$16 sps:$4 sm:$0xff]  }
  0xd3   :  { %1067 = vmatpush1.bf16.msra.mxu0 %v5420_v18  ;;  %v5471_v18 = vcombine.high %v248_v6, %v252_v7  ;;  %v6178_v6 = vld [vmem:[#allocation4 + $0x1c4] ss:$16 sps:$4 sm:$0xff]   ;;  %v6169_v7 = vld [vmem:[#allocation4 + $0x18c] ss:$16 sps:$4 sm:$0xff]  }
  0xd4   :  { %1068 = vmatprep.subr.bf16.mxu0 %v5429_v22  ;;  %1108 = vmatpush1.bf16.msra.mxu1 %v5422_v40  ;;  %v5479_v22 = vcombine.high %v256_v14, %v260_v15  ;;  %v6130_v40 = vld [vmem:[#allocation4 + $0xc4] ss:$16 sps:$4 sm:$0xff]   ;;  %v6173_v15 = vld [vmem:[#allocation4 + $0x1a8] ss:$16 sps:$4 sm:$0xff]  }
  0xd5   :  { %1109 = vmatprep.subr.bf16.mxu1 %v5431_v46  ;;  %v6125_v46 = vld [vmem:[#allocation4 + $0xa8] ss:$16 sps:$4 sm:$0xff]   ;;  %v6190_v14 = vld [vmem:[#allocation4 + $0x204] ss:$16 sps:$4 sm:$0xff]  }
  0xd7   :  { %1069 = vmatpush1.bf16.msra.mxu0 %v5428_v26  ;;  %v6112_v26 = vld [vmem:[#allocation4 + $0x64] ss:$16 sps:$4 sm:$0xff]  }
  0xd8   :  { %1070 = vmatprep.subr.bf16.mxu0 %v5437_v30  ;;  %1110 = vmatpush1.bf16.msra.mxu1 %v5430_v48  ;;  %v6118_v30 = vld [vmem:[#allocation4 + $0x84] ss:$16 sps:$4 sm:$0xff]   ;;  %v6133_v48 = vld [vmem:[#allocation4 + $0xcc] ss:$16 sps:$4 sm:$0xff]  }
  0xd9   :  { %1111 = vmatprep.subr.bf16.mxu1 %v5439_v54  ;;  %v6137_v54 = vld [vmem:[#allocation4 + $0xe8] ss:$16 sps:$4 sm:$0xff]  }
  0xdb   :  { %1071 = vmatpush1.bf16.msra.mxu0 %v5436_v34  ;;  %v6124_v34 = vld [vmem:[#allocation4 + $0xa4] ss:$16 sps:$4 sm:$0xff]  }
  0xdc   :  { %1072 = vmatprep.subr.bf16.mxu0 %v5445_v39  ;;  %1112 = vmatpush1.bf16.msra.mxu1 %v5438_v56  ;;  %v6113_v39 = vld [vmem:[#allocation4 + $0x68] ss:$16 sps:$4 sm:$0xff]   ;;  %v6145_v56 = vld [vmem:[#allocation4 + $0x10c] ss:$16 sps:$4 sm:$0xff]  }
  0xdd   :  { %1113 = vmatprep.subr.bf16.mxu1 %v5447_v61  ;;  %v6149_v61 = vld [vmem:[#allocation4 + $0x128] ss:$16 sps:$4 sm:$0xff]  }
  0xdf   :  { %1073 = vmatpush1.bf16.msra.mxu0 %v5444_v43  ;;  %v6136_v43 = vld [vmem:[#allocation4 + $0xe4] ss:$16 sps:$4 sm:$0xff]  }
  0xe0   :  { %1074 = vmatprep.subr.bf16.mxu0 %v5453_v47  ;;  %1114 = vmatpush1.bf16.msra.mxu1 %v5446_v63  ;;  %v6142_v47 = vld [vmem:[#allocation4 + $0x104] ss:$16 sps:$4 sm:$0xff]   ;;  %v6157_v63 = vld [vmem:[#allocation4 + $0x14c] ss:$16 sps:$4 sm:$0xff]  }
  0xe1   :  { %1115 = vmatprep.subr.bf16.mxu1 %v5455_v3  ;;  %v6163_v3 = vld [vmem:[#allocation4 + $0x16c] ss:$16 sps:$4 sm:$0xff]  }
  0xe3   :  { %1075 = vmatpush1.bf16.msra.mxu0 %v5452_v51  ;;  %v6148_v51 = vld [vmem:[#allocation4 + $0x124] ss:$16 sps:$4 sm:$0xff]  }
  0xe4   :  { %1076 = vmatprep.subr.bf16.mxu0 %v5461_v55  ;;  %1116 = vmatpush1.bf16.msra.mxu1 %v5454_v5  ;;  %v6154_v55 = vld [vmem:[#allocation4 + $0x144] ss:$16 sps:$4 sm:$0xff]   ;;  %v6161_v5 = vld [vmem:[#allocation4 + $0x168] ss:$16 sps:$4 sm:$0xff]  }
  0xe5   :  { %1117 = vmatprep.subr.bf16.mxu1 %v5463_v10  ;;  %v6184_v10 = vld [vmem:[#allocation4 + $0x1e4] ss:$16 sps:$4 sm:$0xff]  }
  0xe7   :  { %1077 = vmatpush1.bf16.msra.mxu0 %v5460_v59  ;;  %v6160_v59 = vld [vmem:[#allocation4 + $0x164] ss:$16 sps:$4 sm:$0xff]  }
  0xe8   :  { %1078 = vmatprep.subr.bf16.mxu0 %v5469_v62  ;;  %1118 = vmatpush1.bf16.msra.mxu1 %v5462_v13  ;;  %v6166_v62 = vld [vmem:[#allocation4 + $0x184] ss:$16 sps:$4 sm:$0xff]   ;;  %v6182_v13 = vld [vmem:[#allocation4 + $0x1e0] ss:$16 sps:$4 sm:$0xff]  }
  0xe9   :  { %1119 = vmatprep.subr.bf16.mxu1 %v5471_v18  ;;  %v6179_v18 = vld [vmem:[#allocation4 + $0x1c8] ss:$16 sps:$4 sm:$0xff]  }
  0xeb   :  { %1079 = vmatpush1.bf16.msra.mxu0 %v5468_v2  ;;  %v6172_v2 = vld [vmem:[#allocation4 + $0x1a4] ss:$16 sps:$4 sm:$0xff]  }
  0xec   :  { %1080 = vmatprep.subr.bf16.mxu0 %v5477_v4  ;;  %1120 = vmatpush1.bf16.msra.mxu1 %v5470_v20  ;;  %v6170_v4 = vld [vmem:[#allocation4 + $0x1a0] ss:$16 sps:$4 sm:$0xff]   ;;  %v6185_v20 = vld [vmem:[#allocation4 + $0x1e8] ss:$16 sps:$4 sm:$0xff]  }
  0xed   :  { %1121 = vmatprep.subr.bf16.mxu1 %v5479_v22  ;;  %v7269_v22 = vld [vmem:[%s7381_s3] sm:$0xff] }
  0xef   :  { %1081 = vmatpush1.bf16.msra.mxu0 %v5476_v9  ;;  %v6167_v9 = vld [vmem:[#allocation4 + $0x188] ss:$16 sps:$4 sm:$0xff]  }
  0xf0   :  { %2722 = vmatprep.subr.bf16.mxu0 %v6094_v8  ;;  %1122 = vmatpush1.bf16.msra.mxu1 %v5478_v24  ;;  %v6176_v8 = vld [vmem:[#allocation4 + $0x1c0] ss:$16 sps:$4 sm:$0xff]  }
  0xf1   :  { %2886 = vmatprep.subr.bf16.mxu1 %v6097_v23  ;;  %v7272_v23 = vsub.s32 0, %v7239_v16 }
  0xf2   :  { %1083 = vmatmul.mubr.bf16.vlgmr.msra.gmra.mrb[4].mxu0 %v7258_v11 }
  0xf3   :  { %2723 = vmatpush1.bf16.msra.mxu0 %v6092_v12  ;;  %1124 = vmatmul.mubr.bf16.vlgmr.msra.gmra.mrb[4].mxu1 %v7258_v11  ;;  %v6119_v11 = vld [vmem:[#allocation4 + $0x88] ss:$16 sps:$4 sm:$0xff]   ;;  %v6175_v12 = vld [vmem:[#allocation4 + $0x1ac] ss:$16 sps:$4 sm:$0xff]   ;;  %v266_v24 = vrot.slane %v7269_v22, %v7272_v23 }
  0xf4   :  { %2724 = vmatprep.subr.bf16.mxu0 %v6100_v17  ;;  %2887 = vmatpush1.bf16.msra.mxu1 %v6095_v27  ;;  %v6181_v17 = vld [vmem:[#allocation4 + $0x1cc] ss:$16 sps:$4 sm:$0xff]  }
  0xf5   :  { %2888 = vmatprep.subr.bf16.mxu1 %v6103_v28 }
  0xf7   :  { %2725 = vmatpush1.bf16.msra.mxu0 %v6098_v19  ;;  %v6187_v19 = vld [vmem:[#allocation4 + $0x1ec] ss:$16 sps:$4 sm:$0xff]  }
  0xf8   :  { %2726 = vmatprep.subr.bf16.mxu0 %v6106_v21  ;;  %2889 = vmatpush1.bf16.msra.mxu1 %v6101_v31  ;;  %v6193_v21 = vld [vmem:[#allocation4 + $0x20c] ss:$16 sps:$4 sm:$0xff]  }
  0xf9   :  { %2890 = vmatprep.subr.bf16.mxu1 %v6109_v32 }
  0xfb   :  { %2727 = vmatpush1.bf16.msra.mxu0 %v6104_v25  ;;  %v7275_v25 = vsub.s32 1, %v7239_v16 }
  0xfc   :  { %2728 = vmatprep.subr.bf16.mxu0 %v6112_v26  ;;  %2891 = vmatpush1.bf16.msra.mxu1 %v6107_v35 }
  0xfd   :  { %2892 = vmatprep.subr.bf16.mxu1 %v6115_v36  ;;  %v270_v26 = vrot.slane %v7269_v22, %v7275_v25  ;;  %v6188_v36 = vld [vmem:[#allocation4 + $0x200] ss:$16 sps:$4 sm:$0xff]  }
  0xff   :  { %2729 = vmatpush1.bf16.msra.mxu0 %v6110_v29 }
 0x100   :  { %2730 = vmatprep.subr.bf16.mxu0 %v6118_v30  ;;  %2893 = vmatpush1.bf16.msra.mxu1 %v6113_v39  ;;  %v7282_v39 = vsub.s32 3, %v7239_v16 }
 0x101   :  { %2894 = vmatprep.subr.bf16.mxu1 %v6121_v41 }
 0x103   :  { %2731 = vmatpush1.bf16.msra.mxu0 %v6116_v33 }
 0x104   :  { %2732 = vmatprep.subr.bf16.mxu0 %v6124_v34  ;;  %2895 = vmatpush1.bf16.msra.mxu1 %v6119_v11  ;;  %v6196_v11 = vld [vmem:[#allocation4 + $0x224] ss:$16 sps:$4 sm:$0xff]  }
 0x105   :  { %2896 = vmatprep.subr.bf16.mxu1 %v6127_v44  ;;  %v278_v44 = vrot.slane %v7269_v22, %v7282_v39 }
 0x107   :  { %2733 = vmatpush1.bf16.msra.mxu0 %v6122_v37  ;;  %v6191_v37 = vld [vmem:[#allocation4 + $0x208] ss:$16 sps:$4 sm:$0xff]  }
 0x108   :  { %2734 = vmatprep.subr.bf16.mxu0 %v6130_v40  ;;  %2897 = vmatpush1.bf16.msra.mxu1 %v6125_v46  ;;  %v6197_v46 = vld [vmem:[#allocation4 + $0x228] ss:$16 sps:$4 sm:$0xff]  }
 0x109   :  { %2898 = vmatprep.subr.bf16.mxu1 %v6133_v48  ;;  %v6202_v48 = vld [vmem:[#allocation4 + $0x244] ss:$16 sps:$4 sm:$0xff]  }
 0x10b   :  { %2735 = vmatpush1.bf16.msra.mxu0 %v6128_v42 }
 0x10c   :  { %2736 = vmatprep.subr.bf16.mxu0 %v6136_v43  ;;  %2899 = vmatpush1.bf16.msra.mxu1 %v6131_v50  ;;  %v6199_v43 = vld [vmem:[#allocation4 + $0x22c] ss:$16 sps:$4 sm:$0xff]  }
 0x10d   :  { %2900 = vmatprep.subr.bf16.mxu1 %v6139_v52 }
 0x10f   :  { %2737 = vmatpush1.bf16.msra.mxu0 %v6134_v45  ;;  %v6194_v45 = vld [vmem:[#allocation4 + $0x220] ss:$16 sps:$4 sm:$0xff]  }
 0x110   :  { %2738 = vmatprep.subr.bf16.mxu0 %v6142_v47  ;;  %2901 = vmatpush1.bf16.msra.mxu1 %v6137_v54 }
 0x111   :  { %2902 = vmatprep.subr.bf16.mxu1 %v6145_v56 }
 0x113   :  { %2739 = vmatpush1.bf16.msra.mxu0 %v6140_v49  ;;  %v6205_v49 = vld [vmem:[#allocation4 + $0x24c] ss:$16 sps:$4 sm:$0xff]  }
 0x114   :  { %2740 = vmatprep.subr.bf16.mxu0 %v6148_v51  ;;  %2903 = vmatpush1.bf16.msra.mxu1 %v6143_v58  ;;  %v6211_v58 = vld [vmem:[#allocation4 + $0x26c] ss:$16 sps:$4 sm:$0xff]  }
 0x115   :  { %2904 = vmatprep.subr.bf16.mxu1 %v6151_v38 }
 0x117   :  { %2741 = vmatpush1.bf16.msra.mxu0 %v6146_v53  ;;  %v6200_v53 = vld [vmem:[#allocation4 + $0x240] ss:$16 sps:$4 sm:$0xff]  }
 0x118   :  { %2742 = vmatprep.subr.bf16.mxu0 %v6154_v55  ;;  %2905 = vmatpush1.bf16.msra.mxu1 %v6149_v61  ;;  %v6203_v55 = vld [vmem:[#allocation4 + $0x248] ss:$16 sps:$4 sm:$0xff]  }
 0x119   :  { %2906 = vmatprep.subr.bf16.mxu1 %v6157_v63  ;;  %v6209_v61 = vld [vmem:[#allocation4 + $0x268] ss:$16 sps:$4 sm:$0xff]   ;;  %v6217_v63 = vld [vmem:[#allocation4 + $0x28c] ss:$16 sps:$4 sm:$0xff]  }
 0x11b   :  { %2743 = vmatpush1.bf16.msra.mxu0 %v6152_v57  ;;  %v6208_v57 = vld [vmem:[#allocation4 + $0x264] ss:$16 sps:$4 sm:$0xff]  }
 0x11c   :  { %2744 = vmatprep.subr.bf16.mxu0 %v6160_v59  ;;  %2907 = vmatpush1.bf16.msra.mxu1 %v6155_v1  ;;  %v6215_v1 = vld [vmem:[#allocation4 + $0x288] ss:$16 sps:$4 sm:$0xff]  }
 0x11d   :  { %2908 = vmatprep.subr.bf16.mxu1 %v6163_v3  ;;  %v6223_v3 = vld [vmem:[#allocation4 + $0x2ac] ss:$16 sps:$4 sm:$0xff]  }
 0x11f   :  { %2745 = vmatpush1.bf16.msra.mxu0 %v6158_v60  ;;  %v6206_v60 = vld [vmem:[#allocation4 + $0x260] ss:$16 sps:$4 sm:$0xff]  }
 0x120   :  { %2746 = vmatprep.subr.bf16.mxu0 %v6166_v62  ;;  %2909 = vmatpush1.bf16.msra.mxu1 %v6161_v5  ;;  %v6214_v62 = vld [vmem:[#allocation4 + $0x284] ss:$16 sps:$4 sm:$0xff]   ;;  %v6221_v5 = vld [vmem:[#allocation4 + $0x2a8] ss:$16 sps:$4 sm:$0xff]  }
 0x121   :  { %2910 = vmatprep.subr.bf16.mxu1 %v6169_v7  ;;  %v6229_v7 = vld [vmem:[#allocation4 + $0x2cc] ss:$16 sps:$4 sm:$0xff]  }
 0x123   :  { %2747 = vmatpush1.bf16.msra.mxu0 %v6164_v0  ;;  %v6212_v0 = vld [vmem:[#allocation4 + $0x280] ss:$16 sps:$4 sm:$0xff]  }
 0x124   :  { %2748 = vmatprep.subr.bf16.mxu0 %v6172_v2  ;;  %2911 = vmatpush1.bf16.msra.mxu1 %v6167_v9  ;;  %v6220_v2 = vld [vmem:[#allocation4 + $0x2a4] ss:$16 sps:$4 sm:$0xff]   ;;  %v6227_v9 = vld [vmem:[#allocation4 + $0x2c8] ss:$16 sps:$4 sm:$0xff]  }
 0x125   :  { %2912 = vmatprep.subr.bf16.mxu1 %v6175_v12  ;;  %v6235_v12 = vld [vmem:[#allocation4 + $0x2ec] ss:$16 sps:$4 sm:$0xff]  }
 0x127   :  { %2749 = vmatpush1.bf16.msra.mxu0 %v6170_v4  ;;  %v6218_v4 = vld [vmem:[#allocation4 + $0x2a0] ss:$16 sps:$4 sm:$0xff]  }
 0x128   :  { %2750 = vmatprep.subr.bf16.mxu0 %v6178_v6  ;;  %2913 = vmatpush1.bf16.msra.mxu1 %v6173_v15  ;;  %v6226_v6 = vld [vmem:[#allocation4 + $0x2c4] ss:$16 sps:$4 sm:$0xff]  }
 0x129   :  { %2914 = vmatprep.subr.bf16.mxu1 %v6181_v17  ;;  %v6238_v15 = vld [vmem:[#allocation4 + $0x304] ss:$16 sps:$4 sm:$0xff]   ;;  %v6241_v17 = vld [vmem:[#allocation4 + $0x30c] ss:$16 sps:$4 sm:$0xff]  }
 0x12b   :  { %2751 = vmatpush1.bf16.msra.mxu0 %v6176_v8  ;;  %v6224_v8 = vld [vmem:[#allocation4 + $0x2c0] ss:$16 sps:$4 sm:$0xff]  }
 0x12c   :  { %2752 = vmatprep.subr.bf16.mxu0 %v6184_v10  ;;  %2915 = vmatpush1.bf16.msra.mxu1 %v6179_v18  ;;  %v6232_v10 = vld [vmem:[#allocation4 + $0x2e4] ss:$16 sps:$4 sm:$0xff]   ;;  %v6236_v18 = vld [vmem:[#allocation4 + $0x300] ss:$16 sps:$4 sm:$0xff]  }
 0x12d   :  { %2916 = vmatprep.subr.bf16.mxu1 %v6187_v19  ;;  %v6239_v19 = vld [vmem:[#allocation4 + $0x308] ss:$16 sps:$4 sm:$0xff]  }
 0x12f   :  { %2753 = vmatpush1.bf16.msra.mxu0 %v6182_v13  ;;  %v6230_v13 = vld [vmem:[#allocation4 + $0x2e0] ss:$16 sps:$4 sm:$0xff]  }
 0x130   :  { %2763 = vmatprep.subr.bf16.mxu0 %v6190_v14  ;;  %2917 = vmatpush1.bf16.msra.mxu1 %v6185_v20  ;;  %v6233_v14 = vld [vmem:[#allocation4 + $0x2e8] ss:$16 sps:$4 sm:$0xff]   ;;  %v6244_v20 = vld [vmem:[#allocation4 + $0x324] ss:$16 sps:$4 sm:$0xff]  }
 0x131   :  { %2927 = vmatprep.subr.bf16.mxu1 %v6193_v21  ;;  %v6247_v21 = vld [vmem:[#allocation4 + $0x32c] ss:$16 sps:$4 sm:$0xff]  }
 0x185   :  { %v1002_v27 = vpop.f32.mrb[0].mxu0  ;;  %v7286_v47 = vpop.f32.mrb[0].mxu1 }
 0x186   :  { %v1003_v28 = vadd.f32 %v1002_v27, %v266_v24  ;;  %v1004_v29 = vpop.f32.mrb[1].mxu0  ;;  %v1045_v50 = vpop.f32.mrb[1].mxu1  ;;  %v6242_v24 = vld [vmem:[#allocation4 + $0x320] ss:$16 sps:$4 sm:$0xff]   ;;  %v6250_v27 = vld [vmem:[#allocation4 + $0x344] ss:$16 sps:$4 sm:$0xff]  }
 0x187   :  { %v1005_v30 = vadd.f32 %v1004_v29, %v270_v26  ;;  %v1006_v31 = vpop.f32.mrb[2].mxu0  ;;  %v1046_v51 = vadd.f32 %v1045_v50, %v278_v44  ;;  %v1047_v52 = vpop.f32.mrb[2].mxu1  ;;  %v6245_v26 = vld [vmem:[#allocation4 + $0x328] ss:$16 sps:$4 sm:$0xff]   ;;  %v6248_v29 = vld [vmem:[#allocation4 + $0x340] ss:$16 sps:$4 sm:$0xff]  }
 0x188   :  { %vm1132_vm0 = vcmp.gt.f32.partialorder %v1003_v28, 0.0  ;;  %v1140_v32 = vmul.f32 0.2, %v1003_v28  ;;  %v1007_v33 = vpop.f32.mrb[3].mxu0  ;;  %v1048_v54 = vpop.f32.mrb[3].mxu1  ;;  %v285_v44 = vsub.s32 5, %v7239_v16 }
 0x189   :  { %vm1133_vm1 = vcmp.gt.f32.partialorder %v1005_v30, 0.0  ;;  %v1141_v34 = vmul.f32 0.2, %v1005_v30  ;;  %vm1135_vm2 = vcmp.gt.f32.partialorder %v1046_v51, 0.0  ;;  %v1143_v56 = vmul.f32 0.2, %v1046_v51 }
 0x18a   :  { %v1148_v35 = vsel %vm1132_vm0, %v1003_v28, %v1140_v32  ;;  %v6253_v28 = vld [vmem:[#allocation4 + $0x34c] ss:$16 sps:$4 sm:$0xff]   ;;  %v6256_v31 = vld [vmem:[#allocation4 + $0x364] ss:$16 sps:$4 sm:$0xff]   ;;  %v6254_v33 = vld [vmem:[#allocation4 + $0x360] ss:$16 sps:$4 sm:$0xff]  }
 0x18b   :  { %v1149_v40 = vsel %vm1133_vm1, %v1005_v30, %v1141_v34  ;;  %v1156_v42 = vpack.c.bf16 %v1148_v35, %v1148_v35  ;;  %v1151_v59 = vsel %vm1135_vm2, %v1046_v51, %v1143_v56  ;;  %v6251_v30 = vld [vmem:[#allocation4 + $0x348] ss:$16 sps:$4 sm:$0xff]   ;;  %v6259_v32 = vld [vmem:[#allocation4 + $0x36c] ss:$16 sps:$4 sm:$0xff]   ;;  %v6262_v35 = vld [vmem:[#allocation4 + $0x384] ss:$16 sps:$4 sm:$0xff]   ;;  %v286_v51 = vrot.slane %v7269_v22, %v285_v44 }
 0x18c   :  { %v1157_v41 = vpack.c.bf16 %v1149_v40, %v1149_v40  ;;  %v1159_v38 = vpack.c.bf16 %v1151_v59, %v1151_v59  ;;  %v6257_v34 = vld [vmem:[#allocation4 + $0x368] ss:$16 sps:$4 sm:$0xff]   ;;  %v6260_v40 = vld [vmem:[#allocation4 + $0x380] ss:$16 sps:$4 sm:$0xff]   ;;  %v6280_v54 = vld [vmem:[#allocation4 + $0x3e4] ss:$16 sps:$4 sm:$0xff]  }
 0x18d   :  { %v6272_v52 = vld [vmem:[#allocation4 + $0x3c0] ss:$16 sps:$4 sm:$0xff]  }
 0x18e   :  { %2754 = vmatprep.mubr.bf16.mxu0 %v1157_v41  ;;  %2918 = vmatprep.mubr.bf16.mxu1 %v1157_v41  ;;  %v6263_v41 = vld [vmem:[#allocation4 + $0x388] ss:$16 sps:$4 sm:$0xff]   ;;  %v6278_v59 = vld [vmem:[#allocation4 + $0x3e0] ss:$16 sps:$4 sm:$0xff]  }
 0x18f   :  { %2755 = vmatmul.mubr.bf16.vlgmr.msra.gmra.mrb[8].mxu0 %v1156_v42  ;;  %2919 = vmatmul.mubr.bf16.vlgmr.msra.gmra.mrb[8].mxu1 %v1156_v42  ;;  %v6268_v42 = vld [vmem:[#allocation4 + $0x3a4] ss:$16 sps:$4 sm:$0xff]   ;;  %v6326_v44 = vld [vmem:[#allocation4 + $0x4e0] ss:$16 sps:$4 sm:$0xff]  }
 0x190   :  { %2764 = vmatpush1.bf16.msra.mxu0 %v6188_v36  ;;  %2928 = vmatpush1.bf16.msra.mxu1 %v6191_v37  ;;  %v6265_v36 = vld [vmem:[#allocation4 + $0x38c] ss:$16 sps:$4 sm:$0xff]   ;;  %v7289_v37 = vsub.s32 2, %v7239_v16 }
 0x191   :  { %2765 = vmatprep.subr.bf16.mxu0 %v6196_v11  ;;  %2929 = vmatprep.subr.bf16.mxu1 %v6199_v43  ;;  %v6271_v11 = vld [vmem:[#allocation4 + $0x3ac] ss:$16 sps:$4 sm:$0xff]  }
 0x192   :  { %2795 = vmatprep.mubr.bf16.mxu0 %v1159_v38  ;;  %2959 = vmatprep.mubr.bf16.mxu1 %v1159_v38  ;;  %v274_v43 = vrot.slane %v7269_v22, %v7289_v37 }
 0x194   :  { %2766 = vmatpush1.bf16.msra.mxu0 %v6194_v45  ;;  %2930 = vmatpush1.bf16.msra.mxu1 %v6197_v46  ;;  %v6266_v45 = vld [vmem:[#allocation4 + $0x3a0] ss:$16 sps:$4 sm:$0xff]   ;;  %v6269_v46 = vld [vmem:[#allocation4 + $0x3a8] ss:$16 sps:$4 sm:$0xff]   ;;  %v1044_v50 = vadd.f32 %v7286_v47, %v274_v43  ;;  %v6331_v43 = vld [vmem:[#allocation4 + $0x4ec] ss:$16 sps:$4 sm:$0xff]  }
 0x195   :  { %2767 = vmatprep.subr.bf16.mxu0 %v6202_v48  ;;  %2931 = vmatprep.subr.bf16.mxu1 %v6205_v49  ;;  %v6274_v48 = vld [vmem:[#allocation4 + $0x3c4] ss:$16 sps:$4 sm:$0xff]   ;;  %v6277_v49 = vld [vmem:[#allocation4 + $0x3cc] ss:$16 sps:$4 sm:$0xff]   ;;  %v6281_v47 = vld [vmem:[#allocation4 + $0x3e8] ss:$16 sps:$4 sm:$0xff]  }
 0x196   :  { %vm1134_vm3 = vcmp.gt.f32.partialorder %v1044_v50, 0.0 }
 0x198   :  { %2768 = vmatpush1.bf16.msra.mxu0 %v6200_v53  ;;  %2932 = vmatpush1.bf16.msra.mxu1 %v6203_v55  ;;  %v6275_v53 = vld [vmem:[#allocation4 + $0x3c8] ss:$16 sps:$4 sm:$0xff]   ;;  %v6283_v55 = vld [vmem:[#allocation4 + $0x3ec] ss:$16 sps:$4 sm:$0xff]  }
 0x199   :  { %2769 = vmatprep.subr.bf16.mxu0 %v6208_v57  ;;  %2933 = vmatprep.subr.bf16.mxu1 %v6211_v58  ;;  %v1142_v57 = vmul.f32 0.2, %v1044_v50 }
 0x19c   :  { %2770 = vmatpush1.bf16.msra.mxu0 %v6206_v60  ;;  %2934 = vmatpush1.bf16.msra.mxu1 %v6209_v61  ;;  %v6286_v61 = vld [vmem:[#allocation4 + $0x404] ss:$16 sps:$4 sm:$0xff]  }
 0x19d   :  { %2771 = vmatprep.subr.bf16.mxu0 %v6214_v62  ;;  %2935 = vmatprep.subr.bf16.mxu1 %v6217_v63  ;;  %v6289_v63 = vld [vmem:[#allocation4 + $0x40c] ss:$16 sps:$4 sm:$0xff]  }
 0x1a0   :  { %2772 = vmatpush1.bf16.msra.mxu0 %v6212_v0  ;;  %2936 = vmatpush1.bf16.msra.mxu1 %v6215_v1  ;;  %v1150_v1 = vsel %vm1134_vm3, %v1044_v50, %v1142_v57  ;;  %v6335_v50 = vld [vmem:[#allocation4 + $0x508] ss:$16 sps:$4 sm:$0xff]   ;;  %v6349_v57 = vld [vmem:[#allocation4 + $0x54c] ss:$16 sps:$4 sm:$0xff]  }
 0x1a1   :  { %2773 = vmatprep.subr.bf16.mxu0 %v6220_v2  ;;  %2937 = vmatprep.subr.bf16.mxu1 %v6223_v3  ;;  %v6284_v3 = vld [vmem:[#allocation4 + $0x400] ss:$16 sps:$4 sm:$0xff]  }
 0x1a4   :  { %2774 = vmatpush1.bf16.msra.mxu0 %v6218_v4  ;;  %2938 = vmatpush1.bf16.msra.mxu1 %v6221_v5  ;;  %v6287_v4 = vld [vmem:[#allocation4 + $0x408] ss:$16 sps:$4 sm:$0xff]   ;;  %v1158_v5 = vpack.c.bf16 %v1150_v1, %v1150_v1  ;;  %v293_v1 = vsub.s32 7, %v7239_v16 }
 0x1a5   :  { %2775 = vmatprep.subr.bf16.mxu0 %v6226_v6  ;;  %2939 = vmatprep.subr.bf16.mxu1 %v6229_v7  ;;  %v6292_v6 = vld [vmem:[#allocation4 + $0x424] ss:$16 sps:$4 sm:$0xff]   ;;  %v6295_v7 = vld [vmem:[#allocation4 + $0x42c] ss:$16 sps:$4 sm:$0xff]  }
 0x1a8   :  { %2776 = vmatpush1.bf16.msra.mxu0 %v6224_v8  ;;  %2940 = vmatpush1.bf16.msra.mxu1 %v6227_v9  ;;  %v6290_v9 = vld [vmem:[#allocation4 + $0x420] ss:$16 sps:$4 sm:$0xff]  }
 0x1a9   :  { %2777 = vmatprep.subr.bf16.mxu0 %v6232_v10  ;;  %2941 = vmatprep.subr.bf16.mxu1 %v6235_v12  ;;  %v6293_v10 = vld [vmem:[#allocation4 + $0x428] ss:$16 sps:$4 sm:$0xff]  }
 0x1ac   :  { %2778 = vmatpush1.bf16.msra.mxu0 %v6230_v13  ;;  %2942 = vmatpush1.bf16.msra.mxu1 %v6233_v14  ;;  %v6298_v13 = vld [vmem:[#allocation4 + $0x444] ss:$16 sps:$4 sm:$0xff]   ;;  %v6301_v14 = vld [vmem:[#allocation4 + $0x44c] ss:$16 sps:$4 sm:$0xff]  }
 0x1ad   :  { %2779 = vmatprep.subr.bf16.mxu0 %v6238_v15  ;;  %2943 = vmatprep.subr.bf16.mxu1 %v6241_v17 }
 0x1b0   :  { %2780 = vmatpush1.bf16.msra.mxu0 %v6236_v18  ;;  %2944 = vmatpush1.bf16.msra.mxu1 %v6239_v19  ;;  %v6296_v19 = vld [vmem:[#allocation4 + $0x440] ss:$16 sps:$4 sm:$0xff]  }
 0x1b1   :  { %2781 = vmatprep.subr.bf16.mxu0 %v6244_v20  ;;  %2945 = vmatprep.subr.bf16.mxu1 %v6247_v21  ;;  %v6299_v20 = vld [vmem:[#allocation4 + $0x448] ss:$16 sps:$4 sm:$0xff]   ;;  %v6304_v21 = vld [vmem:[#allocation4 + $0x464] ss:$16 sps:$4 sm:$0xff]  }
 0x1b4   :  { %2782 = vmatpush1.bf16.msra.mxu0 %v6242_v24  ;;  %2946 = vmatpush1.bf16.msra.mxu1 %v6245_v26  ;;  %v6307_v24 = vld [vmem:[#allocation4 + $0x46c] ss:$16 sps:$4 sm:$0xff]   ;;  %v6302_v26 = vld [vmem:[#allocation4 + $0x460] ss:$16 sps:$4 sm:$0xff]  }
 0x1b5   :  { %2783 = vmatprep.subr.bf16.mxu0 %v6250_v27  ;;  %2947 = vmatprep.subr.bf16.mxu1 %v6253_v28  ;;  %v6305_v27 = vld [vmem:[#allocation4 + $0x468] ss:$16 sps:$4 sm:$0xff]   ;;  %v6310_v28 = vld [vmem:[#allocation4 + $0x484] ss:$16 sps:$4 sm:$0xff]  }
 0x1b8   :  { %2784 = vmatpush1.bf16.msra.mxu0 %v6248_v29  ;;  %2948 = vmatpush1.bf16.msra.mxu1 %v6251_v30  ;;  %v6313_v29 = vld [vmem:[#allocation4 + $0x48c] ss:$16 sps:$4 sm:$0xff]   ;;  %v6308_v30 = vld [vmem:[#allocation4 + $0x480] ss:$16 sps:$4 sm:$0xff]  }
 0x1b9   :  { %2785 = vmatprep.subr.bf16.mxu0 %v6256_v31  ;;  %2949 = vmatprep.subr.bf16.mxu1 %v6259_v32  ;;  %v6311_v31 = vld [vmem:[#allocation4 + $0x488] ss:$16 sps:$4 sm:$0xff]   ;;  %v6316_v32 = vld [vmem:[#allocation4 + $0x4a4] ss:$16 sps:$4 sm:$0xff]  }
 0x1bc   :  { %2786 = vmatpush1.bf16.msra.mxu0 %v6254_v33  ;;  %2950 = vmatpush1.bf16.msra.mxu1 %v6257_v34  ;;  %v6319_v33 = vld [vmem:[#allocation4 + $0x4ac] ss:$16 sps:$4 sm:$0xff]   ;;  %v6314_v34 = vld [vmem:[#allocation4 + $0x4a0] ss:$16 sps:$4 sm:$0xff]  }
 0x1bd   :  { %2787 = vmatprep.subr.bf16.mxu0 %v6262_v35  ;;  %2951 = vmatprep.subr.bf16.mxu1 %v6265_v36  ;;  %v6317_v35 = vld [vmem:[#allocation4 + $0x4a8] ss:$16 sps:$4 sm:$0xff]   ;;  %v6322_v36 = vld [vmem:[#allocation4 + $0x4c4] ss:$16 sps:$4 sm:$0xff]  }
 0x1c0   :  { %2788 = vmatpush1.bf16.msra.mxu0 %v6260_v40  ;;  %2952 = vmatpush1.bf16.msra.mxu1 %v6263_v41  ;;  %v6325_v40 = vld [vmem:[#allocation4 + $0x4cc] ss:$16 sps:$4 sm:$0xff]   ;;  %v6320_v41 = vld [vmem:[#allocation4 + $0x4c0] ss:$16 sps:$4 sm:$0xff]  }
 0x1c1   :  { %2789 = vmatprep.subr.bf16.mxu0 %v6268_v42  ;;  %2953 = vmatprep.subr.bf16.mxu1 %v6271_v11  ;;  %v6323_v42 = vld [vmem:[#allocation4 + $0x4c8] ss:$16 sps:$4 sm:$0xff]   ;;  %v6328_v11 = vld [vmem:[#allocation4 + $0x4e4] ss:$16 sps:$4 sm:$0xff]  }
 0x1c4   :  { %2790 = vmatpush1.bf16.msra.mxu0 %v6266_v45  ;;  %2954 = vmatpush1.bf16.msra.mxu1 %v6269_v46  ;;  %v6329_v45 = vld [vmem:[#allocation4 + $0x4e8] ss:$16 sps:$4 sm:$0xff]   ;;  %v6334_v46 = vld [vmem:[#allocation4 + $0x504] ss:$16 sps:$4 sm:$0xff]  }
 0x1c5   :  { %2791 = vmatprep.subr.bf16.mxu0 %v6274_v48  ;;  %2955 = vmatprep.subr.bf16.mxu1 %v6277_v49  ;;  %v7296_v56 = vpop.f32.mrb[4].mxu0  ;;  %v6337_v48 = vld [vmem:[#allocation4 + $0x50c] ss:$16 sps:$4 sm:$0xff]   ;;  %v6332_v49 = vld [vmem:[#allocation4 + $0x500] ss:$16 sps:$4 sm:$0xff]  }
 0x1c6   :  { %v1086_v58 = vpop.f32.mrb[5].mxu0  ;;  %v7298_v12 = vpop.f32.mrb[4].mxu1 }
 0x1c7   :  { %v1087_v38 = vadd.f32 %v1086_v58, %v286_v51  ;;  %v1088_v60 = vpop.f32.mrb[6].mxu0  ;;  %v7300_v15 = vpop.f32.mrb[5].mxu1  ;;  %v6340_v51 = vld [vmem:[#allocation4 + $0x524] ss:$16 sps:$4 sm:$0xff]   ;;  %v6344_v58 = vld [vmem:[#allocation4 + $0x540] ss:$16 sps:$4 sm:$0xff]  }
 0x1c8   :  { %2792 = vmatpush1.bf16.msra.mxu0 %v6272_v52  ;;  %2956 = vmatpush1.bf16.msra.mxu1 %v6275_v53  ;;  %v1089_v62 = vpop.f32.mrb[7].mxu0  ;;  %v1129_v17 = vpop.f32.mrb[6].mxu1  ;;  %v6343_v52 = vld [vmem:[#allocation4 + $0x52c] ss:$16 sps:$4 sm:$0xff]   ;;  %v6338_v53 = vld [vmem:[#allocation4 + $0x520] ss:$16 sps:$4 sm:$0xff]  }
 0x1c9   :  { %2793 = vmatprep.subr.bf16.mxu0 %v6280_v54  ;;  %2957 = vmatprep.subr.bf16.mxu1 %v6283_v55  ;;  %vm1137_vm4 = vcmp.gt.f32.partialorder %v1087_v38, 0.0  ;;  %v1145_v0 = vmul.f32 0.2, %v1087_v38  ;;  %v1130_v18 = vpop.f32.mrb[7].mxu1  ;;  %v6341_v54 = vld [vmem:[#allocation4 + $0x528] ss:$16 sps:$4 sm:$0xff]  }
 0x1ca   :  { %v6346_v55 = vld [vmem:[#allocation4 + $0x544] ss:$16 sps:$4 sm:$0xff]   ;;  %v6355_v60 = vld [vmem:[#allocation4 + $0x56c] ss:$16 sps:$4 sm:$0xff]   ;;  %v6368_v18 = vld [vmem:[#allocation4 + $0x5c0] ss:$16 sps:$4 sm:$0xff]  }
 0x1cb   :  { %v1153_v2 = vsel %vm1137_vm4, %v1087_v38, %v1145_v0  ;;  %v6352_v38 = vld [vmem:[#allocation4 + $0x564] ss:$16 sps:$4 sm:$0xff]   ;;  %v281_v0 = vsub.s32 4, %v7239_v16 }
 0x1cc   :  { %2794 = vmatpush1.bf16.msra.mxu0 %v6278_v59  ;;  %2958 = vmatpush1.bf16.msra.mxu1 %v6281_v47  ;;  %v1161_v8 = vpack.c.bf16 %v1153_v2, %v1153_v2  ;;  %v6347_v59 = vld [vmem:[#allocation4 + $0x548] ss:$16 sps:$4 sm:$0xff]   ;;  %v6350_v47 = vld [vmem:[#allocation4 + $0x560] ss:$16 sps:$4 sm:$0xff]   ;;  %v6358_v62 = vld [vmem:[#allocation4 + $0x584] ss:$16 sps:$4 sm:$0xff]  }
 0x1cd   :  { %2804 = vmatprep.subr.bf16.mxu0 %v6286_v61  ;;  %2968 = vmatprep.subr.bf16.mxu1 %v6289_v63  ;;  %v6353_v61 = vld [vmem:[#allocation4 + $0x568] ss:$16 sps:$4 sm:$0xff]   ;;  %v6361_v63 = vld [vmem:[#allocation4 + $0x58c] ss:$16 sps:$4 sm:$0xff]   ;;  %v6356_v2 = vld [vmem:[#allocation4 + $0x580] ss:$16 sps:$4 sm:$0xff]  }
 0x1cf   :  { %2796 = vmatmul.mubr.bf16.vlgmr.msra.gmra.mrb[8].mxu0 %v1158_v5  ;;  %2960 = vmatmul.mubr.bf16.vlgmr.msra.gmra.mrb[8].mxu1 %v1158_v5  ;;  %v6367_v5 = vld [vmem:[#allocation4 + $0x5ac] ss:$16 sps:$4 sm:$0xff]  }
 0x1d0   :  { %2805 = vmatpush1.bf16.msra.mxu0 %v6284_v3  ;;  %2969 = vmatpush1.bf16.msra.mxu1 %v6287_v4  ;;  %v6359_v3 = vld [vmem:[#allocation4 + $0x588] ss:$16 sps:$4 sm:$0xff]   ;;  %v6364_v4 = vld [vmem:[#allocation4 + $0x5a4] ss:$16 sps:$4 sm:$0xff]  }
 0x1d1   :  { %2806 = vmatprep.subr.bf16.mxu0 %v6292_v6  ;;  %2970 = vmatprep.subr.bf16.mxu1 %v6295_v7  ;;  %v282_v6 = vrot.slane %v7269_v22, %v281_v0  ;;  %v294_v7 = vrot.slane %v7269_v22, %v293_v1  ;;  %v6425_v0 = vld [vmem:[#allocation4 + $0x6e8] ss:$16 sps:$4 sm:$0xff]   ;;  %v6430_v1 = vld [vmem:[#allocation4 + $0x704] ss:$16 sps:$4 sm:$0xff]  }
 0x1d2   :  { %2836 = vmatprep.mubr.bf16.mxu0 %v1161_v8  ;;  %3000 = vmatprep.mubr.bf16.mxu1 %v1161_v8  ;;  %v6362_v8 = vld [vmem:[#allocation4 + $0x5a0] ss:$16 sps:$4 sm:$0xff]  }
 0x1d3   :  { %v1128_v17 = vadd.f32 %v7300_v15, %v294_v7  ;;  %v6385_v15 = vld [vmem:[#allocation4 + $0x60c] ss:$16 sps:$4 sm:$0xff]   ;;  %v6434_v7 = vld [vmem:[#allocation4 + $0x720] ss:$16 sps:$4 sm:$0xff]  }
 0x1d4   :  { %2807 = vmatpush1.bf16.msra.mxu0 %v6290_v9  ;;  %2971 = vmatpush1.bf16.msra.mxu1 %v6293_v10  ;;  %v6365_v9 = vld [vmem:[#allocation4 + $0x5a8] ss:$16 sps:$4 sm:$0xff]   ;;  %v6370_v10 = vld [vmem:[#allocation4 + $0x5c4] ss:$16 sps:$4 sm:$0xff]  }
 0x1d5   :  { %2808 = vmatprep.subr.bf16.mxu0 %v6298_v13  ;;  %2972 = vmatprep.subr.bf16.mxu1 %v6301_v14  ;;  %v6373_v13 = vld [vmem:[#allocation4 + $0x5cc] ss:$16 sps:$4 sm:$0xff]   ;;  %v1085_v14 = vadd.f32 %v7296_v56, %v282_v6  ;;  %vm1139_vm6 = vcmp.gt.f32.partialorder %v1128_v17, 0.0  ;;  %v6382_v56 = vld [vmem:[#allocation4 + $0x604] ss:$16 sps:$4 sm:$0xff]  }
 0x1d6   :  { %v6439_v6 = vld [vmem:[#allocation4 + $0x72c] ss:$16 sps:$4 sm:$0xff]  }
 0x1d7   :  { %vm1136_vm5 = vcmp.gt.f32.partialorder %v1085_v14, 0.0 }
 0x1d8   :  { %2809 = vmatpush1.bf16.msra.mxu0 %v6296_v19  ;;  %2973 = vmatpush1.bf16.msra.mxu1 %v6299_v20  ;;  %v6371_v19 = vld [vmem:[#allocation4 + $0x5c8] ss:$16 sps:$4 sm:$0xff]   ;;  %v6376_v20 = vld [vmem:[#allocation4 + $0x5e4] ss:$16 sps:$4 sm:$0xff]  }
 0x1d9   :  { %2810 = vmatprep.subr.bf16.mxu0 %v6304_v21  ;;  %2974 = vmatprep.subr.bf16.mxu1 %v6307_v24  ;;  %v6379_v21 = vld [vmem:[#allocation4 + $0x5ec] ss:$16 sps:$4 sm:$0xff]   ;;  %v1144_v24 = vmul.f32 0.2, %v1085_v14 }
 0x1dc   :  { %2811 = vmatpush1.bf16.msra.mxu0 %v6302_v26  ;;  %2975 = vmatpush1.bf16.msra.mxu1 %v6305_v27  ;;  %v1147_v26 = vmul.f32 0.2, %v1128_v17  ;;  %v6374_v27 = vld [vmem:[#allocation4 + $0x5e0] ss:$16 sps:$4 sm:$0xff]  }
 0x1dd   :  { %2812 = vmatprep.subr.bf16.mxu0 %v6310_v28  ;;  %2976 = vmatprep.subr.bf16.mxu1 %v6313_v29  ;;  %v6377_v28 = vld [vmem:[#allocation4 + $0x5e8] ss:$16 sps:$4 sm:$0xff]   ;;  %v1152_v29 = vsel %vm1136_vm5, %v1085_v14, %v1144_v24  ;;  %v6457_v24 = vld [vmem:[#allocation4 + $0x78c] ss:$16 sps:$4 sm:$0xff]  }
 0x1de   :  { %v6443_v14 = vld [vmem:[#allocation4 + $0x748] ss:$16 sps:$4 sm:$0xff]  }
 0x1e0   :  { %2813 = vmatpush1.bf16.msra.mxu0 %v6308_v30  ;;  %2977 = vmatpush1.bf16.msra.mxu1 %v6311_v31  ;;  %v1155_v30 = vsel %vm1139_vm6, %v1128_v17, %v1147_v26  ;;  %v6380_v31 = vld [vmem:[#allocation4 + $0x600] ss:$16 sps:$4 sm:$0xff]   ;;  %v6448_v17 = vld [vmem:[#allocation4 + $0x764] ss:$16 sps:$4 sm:$0xff]   ;;  %v289_v26 = vsub.s32 6, %v7239_v16 }
 0x1e1   :  { %2814 = vmatprep.subr.bf16.mxu0 %v6316_v32  ;;  %2978 = vmatprep.subr.bf16.mxu1 %v6319_v33  ;;  %v6383_v32 = vld [vmem:[#allocation4 + $0x608] ss:$16 sps:$4 sm:$0xff]   ;;  %v1160_v33 = vpack.c.bf16 %v1152_v29, %v1152_v29 }
 0x1e2   :  { %v290_v29 = vrot.slane %v7269_v22, %v289_v26  ;;  %v6470_v22 = vld [vmem:[#allocation4 + $0x7e0] ss:$16 sps:$4 sm:$0xff]   ;;  %v6538_v26 = vld [vmem:[#allocation6 + $0x144] ss:$16 sps:$4 sm:$0xff]  }
 0x1e4   :  { %2815 = vmatpush1.bf16.msra.mxu0 %v6314_v34  ;;  %2979 = vmatpush1.bf16.msra.mxu1 %v6317_v35  ;;  %v6388_v34 = vld [vmem:[#allocation4 + $0x624] ss:$16 sps:$4 sm:$0xff]   ;;  %v6391_v35 = vld [vmem:[#allocation4 + $0x62c] ss:$16 sps:$4 sm:$0xff]   ;;  %v1126_v16 = vadd.f32 %v7298_v12, %v290_v29  ;;  %v6476_v12 = vld [vmem:[#allocation6] ss:$16 sps:$4 sm:$0xff]  }
 0x1e5   :  { %2816 = vmatprep.subr.bf16.mxu0 %v6322_v36  ;;  %2980 = vmatprep.subr.bf16.mxu1 %v6325_v40  ;;  %v1163_v36 = vpack.c.bf16 %v1155_v30, %v1155_v30  ;;  %v6386_v40 = vld [vmem:[#allocation4 + $0x620] ss:$16 sps:$4 sm:$0xff]   ;;  %v6547_v29 = vld [vmem:[#allocation6 + $0x16c] ss:$16 sps:$4 sm:$0xff]  }
 0x1e6   :  { %v6458_v30 = vld [vmem:[#allocation4 + $0x7a0] ss:$16 sps:$4 sm:$0xff]   ;;  %vm1138_vm7 = vcmp.gt.f32.partialorder %v1126_v16, 0.0 }
 0x1e8   :  { %2817 = vmatpush1.bf16.msra.mxu0 %v6320_v41  ;;  %2981 = vmatpush1.bf16.msra.mxu1 %v6323_v42  ;;  %v6389_v41 = vld [vmem:[#allocation4 + $0x628] ss:$16 sps:$4 sm:$0xff]   ;;  %v6394_v42 = vld [vmem:[#allocation4 + $0x644] ss:$16 sps:$4 sm:$0xff]  }
 0x1e9   :  { %2818 = vmatprep.subr.bf16.mxu0 %v6328_v11  ;;  %2982 = vmatprep.subr.bf16.mxu1 %v6331_v43  ;;  %v6397_v11 = vld [vmem:[#allocation4 + $0x64c] ss:$16 sps:$4 sm:$0xff]   ;;  %v6392_v43 = vld [vmem:[#allocation4 + $0x640] ss:$16 sps:$4 sm:$0xff]  }
 0x1ec   :  { %2819 = vmatpush1.bf16.msra.mxu0 %v6326_v44  ;;  %2983 = vmatpush1.bf16.msra.mxu1 %v6329_v45  ;;  %v6395_v44 = vld [vmem:[#allocation4 + $0x648] ss:$16 sps:$4 sm:$0xff]   ;;  %v6400_v45 = vld [vmem:[#allocation4 + $0x664] ss:$16 sps:$4 sm:$0xff]  }
 0x1ed   :  { %2820 = vmatprep.subr.bf16.mxu0 %v6334_v46  ;;  %2984 = vmatprep.subr.bf16.mxu1 %v6337_v48  ;;  %v6403_v46 = vld [vmem:[#allocation4 + $0x66c] ss:$16 sps:$4 sm:$0xff]   ;;  %v6398_v48 = vld [vmem:[#allocation4 + $0x660] ss:$16 sps:$4 sm:$0xff]  }
 0x1f0   :  { %2821 = vmatpush1.bf16.msra.mxu0 %v6332_v49  ;;  %2985 = vmatpush1.bf16.msra.mxu1 %v6335_v50  ;;  %v6401_v49 = vld [vmem:[#allocation4 + $0x668] ss:$16 sps:$4 sm:$0xff]   ;;  %v6406_v50 = vld [vmem:[#allocation4 + $0x684] ss:$16 sps:$4 sm:$0xff]  }
 0x1f1   :  { %2822 = vmatprep.subr.bf16.mxu0 %v6340_v51  ;;  %2986 = vmatprep.subr.bf16.mxu1 %v6343_v52  ;;  %v6409_v51 = vld [vmem:[#allocation4 + $0x68c] ss:$16 sps:$4 sm:$0xff]   ;;  %v6404_v52 = vld [vmem:[#allocation4 + $0x680] ss:$16 sps:$4 sm:$0xff]  }
 0x1f4   :  { %2823 = vmatpush1.bf16.msra.mxu0 %v6338_v53  ;;  %2987 = vmatpush1.bf16.msra.mxu1 %v6341_v54  ;;  %v6407_v53 = vld [vmem:[#allocation4 + $0x688] ss:$16 sps:$4 sm:$0xff]   ;;  %v6412_v54 = vld [vmem:[#allocation4 + $0x6a4] ss:$16 sps:$4 sm:$0xff]  }
 0x1f5   :  { %2824 = vmatprep.subr.bf16.mxu0 %v6346_v55  ;;  %2988 = vmatprep.subr.bf16.mxu1 %v6349_v57  ;;  %v6415_v55 = vld [vmem:[#allocation4 + $0x6ac] ss:$16 sps:$4 sm:$0xff]   ;;  %v6410_v57 = vld [vmem:[#allocation4 + $0x6a0] ss:$16 sps:$4 sm:$0xff]  }
 0x1f8   :  { %2825 = vmatpush1.bf16.msra.mxu0 %v6344_v58  ;;  %2989 = vmatpush1.bf16.msra.mxu1 %v6347_v59  ;;  %v6413_v58 = vld [vmem:[#allocation4 + $0x6a8] ss:$16 sps:$4 sm:$0xff]   ;;  %v6418_v59 = vld [vmem:[#allocation4 + $0x6c4] ss:$16 sps:$4 sm:$0xff]  }
 0x1f9   :  { %2826 = vmatprep.subr.bf16.mxu0 %v6352_v38  ;;  %2990 = vmatprep.subr.bf16.mxu1 %v6355_v60  ;;  %v6421_v38 = vld [vmem:[#allocation4 + $0x6cc] ss:$16 sps:$4 sm:$0xff]   ;;  %v6416_v60 = vld [vmem:[#allocation4 + $0x6c0] ss:$16 sps:$4 sm:$0xff]  }
 0x1fc   :  { %2827 = vmatpush1.bf16.msra.mxu0 %v6350_v47  ;;  %2991 = vmatpush1.bf16.msra.mxu1 %v6353_v61  ;;  %v6419_v47 = vld [vmem:[#allocation4 + $0x6c8] ss:$16 sps:$4 sm:$0xff]   ;;  %v6424_v61 = vld [vmem:[#allocation4 + $0x6e4] ss:$16 sps:$4 sm:$0xff]  }
 0x1fd   :  { %2828 = vmatprep.subr.bf16.mxu0 %v6358_v62  ;;  %2992 = vmatprep.subr.bf16.mxu1 %v6361_v63  ;;  %v6427_v62 = vld [vmem:[#allocation4 + $0x6ec] ss:$16 sps:$4 sm:$0xff]   ;;  %v6422_v63 = vld [vmem:[#allocation4 + $0x6e0] ss:$16 sps:$4 sm:$0xff]  }
 0x200   :  { %2829 = vmatpush1.bf16.msra.mxu0 %v6356_v2  ;;  %2993 = vmatpush1.bf16.msra.mxu1 %v6359_v3  ;;  %v6433_v2 = vld [vmem:[#allocation4 + $0x70c] ss:$16 sps:$4 sm:$0xff]   ;;  %v6428_v3 = vld [vmem:[#allocation4 + $0x700] ss:$16 sps:$4 sm:$0xff]  }
 0x201   :  { %2830 = vmatprep.subr.bf16.mxu0 %v6364_v4  ;;  %2994 = vmatprep.subr.bf16.mxu1 %v6367_v5  ;;  %v6431_v4 = vld [vmem:[#allocation4 + $0x708] ss:$16 sps:$4 sm:$0xff]   ;;  %v6436_v5 = vld [vmem:[#allocation4 + $0x724] ss:$16 sps:$4 sm:$0xff]  }
 0x204   :  { %2831 = vmatpush1.bf16.msra.mxu0 %v6362_v8  ;;  %2995 = vmatpush1.bf16.msra.mxu1 %v6365_v9  ;;  %v6437_v8 = vld [vmem:[#allocation4 + $0x728] ss:$16 sps:$4 sm:$0xff]   ;;  %v6442_v9 = vld [vmem:[#allocation4 + $0x744] ss:$16 sps:$4 sm:$0xff]  }
 0x205   :  { %2832 = vmatprep.subr.bf16.mxu0 %v6370_v10  ;;  %2996 = vmatprep.subr.bf16.mxu1 %v6373_v13  ;;  %v6445_v10 = vld [vmem:[#allocation4 + $0x74c] ss:$16 sps:$4 sm:$0xff]   ;;  %v6440_v13 = vld [vmem:[#allocation4 + $0x740] ss:$16 sps:$4 sm:$0xff]  }
 0x208   :  { %2833 = vmatpush1.bf16.msra.mxu0 %v6368_v18  ;;  %2997 = vmatpush1.bf16.msra.mxu1 %v6371_v19  ;;  %v6451_v18 = vld [vmem:[#allocation4 + $0x76c] ss:$16 sps:$4 sm:$0xff]   ;;  %v6446_v19 = vld [vmem:[#allocation4 + $0x760] ss:$16 sps:$4 sm:$0xff]  }
 0x209   :  { %2834 = vmatprep.subr.bf16.mxu0 %v6376_v20  ;;  %2998 = vmatprep.subr.bf16.mxu1 %v6379_v21  ;;  %v6449_v20 = vld [vmem:[#allocation4 + $0x768] ss:$16 sps:$4 sm:$0xff]   ;;  %v6454_v21 = vld [vmem:[#allocation4 + $0x784] ss:$16 sps:$4 sm:$0xff]  }
 0x20c   :  { %2835 = vmatpush1.bf16.msra.mxu0 %v6374_v27  ;;  %2999 = vmatpush1.bf16.msra.mxu1 %v6377_v28  ;;  %v6452_v27 = vld [vmem:[#allocation4 + $0x780] ss:$16 sps:$4 sm:$0xff]   ;;  %v6455_v28 = vld [vmem:[#allocation4 + $0x788] ss:$16 sps:$4 sm:$0xff]  }
 0x20d   :  { %2845 = vmatprep.subr.bf16.mxu0 %v6382_v56  ;;  %3009 = vmatprep.subr.bf16.mxu1 %v6385_v15  ;;  %v6460_v56 = vld [vmem:[#allocation4 + $0x7a4] ss:$16 sps:$4 sm:$0xff]   ;;  %v6463_v15 = vld [vmem:[#allocation4 + $0x7ac] ss:$16 sps:$4 sm:$0xff]  }
 0x20f   :  { %2837 = vmatmul.mubr.bf16.vlgmr.msra.gmra.mrb[8].mxu0 %v1160_v33  ;;  %3001 = vmatmul.mubr.bf16.vlgmr.msra.gmra.mrb[8].mxu1 %v1160_v33  ;;  %v6469_v33 = vld [vmem:[#allocation4 + $0x7cc] ss:$16 sps:$4 sm:$0xff]  }
 0x210   :  { %2846 = vmatpush1.bf16.msra.mxu0 %v6380_v31  ;;  %3010 = vmatpush1.bf16.msra.mxu1 %v6383_v32  ;;  %v6461_v31 = vld [vmem:[#allocation4 + $0x7a8] ss:$16 sps:$4 sm:$0xff]   ;;  %v6466_v32 = vld [vmem:[#allocation4 + $0x7c4] ss:$16 sps:$4 sm:$0xff]  }
 0x211   :  { %2847 = vmatprep.subr.bf16.mxu0 %v6388_v34  ;;  %3011 = vmatprep.subr.bf16.mxu1 %v6391_v35  ;;  %v6464_v34 = vld [vmem:[#allocation4 + $0x7c0] ss:$16 sps:$4 sm:$0xff]   ;;  %v6467_v35 = vld [vmem:[#allocation4 + $0x7c8] ss:$16 sps:$4 sm:$0xff]  }
 0x212   :  { %2877 = vmatprep.mubr.bf16.mxu0 %v1163_v36  ;;  %3041 = vmatprep.mubr.bf16.mxu1 %v1163_v36  ;;  %v6472_v36 = vld [vmem:[#allocation4 + $0x7e4] ss:$16 sps:$4 sm:$0xff]  }
 0x214   :  { %2848 = vmatpush1.bf16.msra.mxu0 %v6386_v40  ;;  %3012 = vmatpush1.bf16.msra.mxu1 %v6389_v41  ;;  %v6475_v40 = vld [vmem:[#allocation4 + $0x7ec] ss:$16 sps:$4 sm:$0xff]   ;;  %v1146_v41 = vmul.f32 0.2, %v1126_v16 }
 0x215   :  { %2849 = vmatprep.subr.bf16.mxu0 %v6394_v42  ;;  %3013 = vmatprep.subr.bf16.mxu1 %v6397_v11  ;;  %v6473_v42 = vld [vmem:[#allocation4 + $0x7e8] ss:$16 sps:$4 sm:$0xff]   ;;  %v6478_v11 = vld [vmem:[#allocation6 + $0x4] ss:$16 sps:$4 sm:$0xff]  }
 0x218   :  { %2850 = vmatpush1.bf16.msra.mxu0 %v6392_v43  ;;  %3014 = vmatpush1.bf16.msra.mxu1 %v6395_v44  ;;  %v6481_v43 = vld [vmem:[#allocation6 + $0xc] ss:$16 sps:$4 sm:$0xff]   ;;  %v1154_v44 = vsel %vm1138_vm7, %v1126_v16, %v1146_v41  ;;  %v6548_v16 = vld [vmem:[#allocation6 + $0x180] ss:$16 sps:$4 sm:$0xff]   ;;  %v6557_v41 = vld [vmem:[#allocation6 + $0x1a8] ss:$16 sps:$4 sm:$0xff]  }
 0x219   :  { %2851 = vmatprep.subr.bf16.mxu0 %v6400_v45  ;;  %3015 = vmatprep.subr.bf16.mxu1 %v6403_v46  ;;  %v6479_v45 = vld [vmem:[#allocation6 + $0x8] ss:$16 sps:$4 sm:$0xff]   ;;  %v1162_v46 = vpack.c.bf16 %v1154_v44, %v1154_v44  ;;  %v6568_v44 = vld [vmem:[#allocation6 + $0x1e4] ss:$16 sps:$4 sm:$0xff]  }
 0x21c   :  { %2852 = vmatpush1.bf16.msra.mxu0 %v6398_v48  ;;  %3016 = vmatpush1.bf16.msra.mxu1 %v6401_v49  ;;  %v6484_v48 = vld [vmem:[#allocation6 + $0x24] ss:$16 sps:$4 sm:$0xff]   ;;  %v6487_v49 = vld [vmem:[#allocation6 + $0x2c] ss:$16 sps:$4 sm:$0xff]  }
 0x21d   :  { %2853 = vmatprep.subr.bf16.mxu0 %v6406_v50  ;;  %3017 = vmatprep.subr.bf16.mxu1 %v6409_v51  ;;  %v6482_v50 = vld [vmem:[#allocation6 + $0x20] ss:$16 sps:$4 sm:$0xff]   ;;  %v6485_v51 = vld [vmem:[#allocation6 + $0x28] ss:$16 sps:$4 sm:$0xff]  }
 0x220   :  { %2854 = vmatpush1.bf16.msra.mxu0 %v6404_v52  ;;  %3018 = vmatpush1.bf16.msra.mxu1 %v6407_v53  ;;  %v6490_v52 = vld [vmem:[#allocation6 + $0x44] ss:$16 sps:$4 sm:$0xff]   ;;  %v6493_v53 = vld [vmem:[#allocation6 + $0x4c] ss:$16 sps:$4 sm:$0xff]  }
 0x221   :  { %2855 = vmatprep.subr.bf16.mxu0 %v6412_v54  ;;  %3019 = vmatprep.subr.bf16.mxu1 %v6415_v55  ;;  %v6488_v54 = vld [vmem:[#allocation6 + $0x40] ss:$16 sps:$4 sm:$0xff]   ;;  %v6491_v55 = vld [vmem:[#allocation6 + $0x48] ss:$16 sps:$4 sm:$0xff]  }
 0x224   :  { %2856 = vmatpush1.bf16.msra.mxu0 %v6410_v57  ;;  %3020 = vmatpush1.bf16.msra.mxu1 %v6413_v58  ;;  %v6496_v57 = vld [vmem:[#allocation6 + $0x64] ss:$16 sps:$4 sm:$0xff]   ;;  %v6499_v58 = vld [vmem:[#allocation6 + $0x6c] ss:$16 sps:$4 sm:$0xff]  }
 0x225   :  { %2857 = vmatprep.subr.bf16.mxu0 %v6418_v59  ;;  %3021 = vmatprep.subr.bf16.mxu1 %v6421_v38  ;;  %v6494_v59 = vld [vmem:[#allocation6 + $0x60] ss:$16 sps:$4 sm:$0xff]   ;;  %v6497_v38 = vld [vmem:[#allocation6 + $0x68] ss:$16 sps:$4 sm:$0xff]  }
 0x228   :  { %2858 = vmatpush1.bf16.msra.mxu0 %v6416_v60  ;;  %3022 = vmatpush1.bf16.msra.mxu1 %v6419_v47  ;;  %v6502_v60 = vld [vmem:[#allocation6 + $0x84] ss:$16 sps:$4 sm:$0xff]   ;;  %v6505_v47 = vld [vmem:[#allocation6 + $0x8c] ss:$16 sps:$4 sm:$0xff]  }
 0x229   :  { %2859 = vmatprep.subr.bf16.mxu0 %v6424_v61  ;;  %3023 = vmatprep.subr.bf16.mxu1 %v6427_v62  ;;  %v6500_v61 = vld [vmem:[#allocation6 + $0x80] ss:$16 sps:$4 sm:$0xff]   ;;  %v6503_v62 = vld [vmem:[#allocation6 + $0x88] ss:$16 sps:$4 sm:$0xff]  }
 0x22c   :  { %2860 = vmatpush1.bf16.msra.mxu0 %v6422_v63  ;;  %3024 = vmatpush1.bf16.msra.mxu1 %v6425_v0  ;;  %v6508_v63 = vld [vmem:[#allocation6 + $0xa4] ss:$16 sps:$4 sm:$0xff]   ;;  %v6511_v0 = vld [vmem:[#allocation6 + $0xac] ss:$16 sps:$4 sm:$0xff]  }
 0x22d   :  { %2861 = vmatprep.subr.bf16.mxu0 %v6430_v1  ;;  %3025 = vmatprep.subr.bf16.mxu1 %v6433_v2  ;;  %v6506_v1 = vld [vmem:[#allocation6 + $0xa0] ss:$16 sps:$4 sm:$0xff]   ;;  %v6509_v2 = vld [vmem:[#allocation6 + $0xa8] ss:$16 sps:$4 sm:$0xff]  }
 0x230   :  { %2862 = vmatpush1.bf16.msra.mxu0 %v6428_v3  ;;  %3026 = vmatpush1.bf16.msra.mxu1 %v6431_v4  ;;  %v6514_v3 = vld [vmem:[#allocation6 + $0xc4] ss:$16 sps:$4 sm:$0xff]   ;;  %v6517_v4 = vld [vmem:[#allocation6 + $0xcc] ss:$16 sps:$4 sm:$0xff]  }
 0x231   :  { %2863 = vmatprep.subr.bf16.mxu0 %v6436_v5  ;;  %3027 = vmatprep.subr.bf16.mxu1 %v6439_v6  ;;  %v6512_v5 = vld [vmem:[#allocation6 + $0xc0] ss:$16 sps:$4 sm:$0xff]   ;;  %v6515_v6 = vld [vmem:[#allocation6 + $0xc8] ss:$16 sps:$4 sm:$0xff]  }
 0x234   :  { %2864 = vmatpush1.bf16.msra.mxu0 %v6434_v7  ;;  %3028 = vmatpush1.bf16.msra.mxu1 %v6437_v8  ;;  %v6520_v7 = vld [vmem:[#allocation6 + $0xe4] ss:$16 sps:$4 sm:$0xff]   ;;  %v6523_v8 = vld [vmem:[#allocation6 + $0xec] ss:$16 sps:$4 sm:$0xff]  }
 0x235   :  { %2865 = vmatprep.subr.bf16.mxu0 %v6442_v9  ;;  %3029 = vmatprep.subr.bf16.mxu1 %v6445_v10  ;;  %v6518_v9 = vld [vmem:[#allocation6 + $0xe0] ss:$16 sps:$4 sm:$0xff]   ;;  %v6521_v10 = vld [vmem:[#allocation6 + $0xe8] ss:$16 sps:$4 sm:$0xff]  }
 0x238   :  { %2866 = vmatpush1.bf16.msra.mxu0 %v6440_v13  ;;  %3030 = vmatpush1.bf16.msra.mxu1 %v6443_v14  ;;  %v6526_v13 = vld [vmem:[#allocation6 + $0x104] ss:$16 sps:$4 sm:$0xff]   ;;  %v6529_v14 = vld [vmem:[#allocation6 + $0x10c] ss:$16 sps:$4 sm:$0xff]  }
 0x239   :  { %2867 = vmatprep.subr.bf16.mxu0 %v6448_v17  ;;  %3031 = vmatprep.subr.bf16.mxu1 %v6451_v18  ;;  %v6524_v17 = vld [vmem:[#allocation6 + $0x100] ss:$16 sps:$4 sm:$0xff]   ;;  %v6527_v18 = vld [vmem:[#allocation6 + $0x108] ss:$16 sps:$4 sm:$0xff]  }
 0x23c   :  { %2868 = vmatpush1.bf16.msra.mxu0 %v6446_v19  ;;  %3032 = vmatpush1.bf16.msra.mxu1 %v6449_v20  ;;  %v6532_v19 = vld [vmem:[#allocation6 + $0x124] ss:$16 sps:$4 sm:$0xff]   ;;  %v6535_v20 = vld [vmem:[#allocation6 + $0x12c] ss:$16 sps:$4 sm:$0xff]  }
 0x23d   :  { %2869 = vmatprep.subr.bf16.mxu0 %v6454_v21  ;;  %3033 = vmatprep.subr.bf16.mxu1 %v6457_v24  ;;  %v6530_v21 = vld [vmem:[#allocation6 + $0x120] ss:$16 sps:$4 sm:$0xff]   ;;  %v6533_v24 = vld [vmem:[#allocation6 + $0x128] ss:$16 sps:$4 sm:$0xff]  }
 0x240   :  { %2870 = vmatpush1.bf16.msra.mxu0 %v6452_v27  ;;  %3034 = vmatpush1.bf16.msra.mxu1 %v6455_v28  ;;  %v6541_v27 = vld [vmem:[#allocation6 + $0x14c] ss:$16 sps:$4 sm:$0xff]   ;;  %v6536_v28 = vld [vmem:[#allocation6 + $0x140] ss:$16 sps:$4 sm:$0xff]  }
 0x241   :  { %2871 = vmatprep.subr.bf16.mxu0 %v6460_v56  ;;  %3035 = vmatprep.subr.bf16.mxu1 %v6463_v15  ;;  %v6539_v56 = vld [vmem:[#allocation6 + $0x148] ss:$16 sps:$4 sm:$0xff]   ;;  %v6544_v15 = vld [vmem:[#allocation6 + $0x164] ss:$16 sps:$4 sm:$0xff]  }
 0x244   :  { %2872 = vmatpush1.bf16.msra.mxu0 %v6458_v30  ;;  %3036 = vmatpush1.bf16.msra.mxu1 %v6461_v31  ;;  %v6542_v30 = vld [vmem:[#allocation6 + $0x160] ss:$16 sps:$4 sm:$0xff]   ;;  %v6545_v31 = vld [vmem:[#allocation6 + $0x168] ss:$16 sps:$4 sm:$0xff]  }
 0x245   :  { %2873 = vmatprep.subr.bf16.mxu0 %v6466_v32  ;;  %3037 = vmatprep.subr.bf16.mxu1 %v6469_v33  ;;  %v6550_v32 = vld [vmem:[#allocation6 + $0x184] ss:$16 sps:$4 sm:$0xff]   ;;  %v6553_v33 = vld [vmem:[#allocation6 + $0x18c] ss:$16 sps:$4 sm:$0xff]  }
 0x248   :  { %2874 = vmatpush1.bf16.msra.mxu0 %v6464_v34  ;;  %3038 = vmatpush1.bf16.msra.mxu1 %v6467_v35  ;;  %v6551_v34 = vld [vmem:[#allocation6 + $0x188] ss:$16 sps:$4 sm:$0xff]   ;;  %v6556_v35 = vld [vmem:[#allocation6 + $0x1a4] ss:$16 sps:$4 sm:$0xff]  }
 0x249   :  { %2875 = vmatprep.subr.bf16.mxu0 %v6472_v36  ;;  %3039 = vmatprep.subr.bf16.mxu1 %v6475_v40  ;;  %v6559_v36 = vld [vmem:[#allocation6 + $0x1ac] ss:$16 sps:$4 sm:$0xff]   ;;  %v6554_v40 = vld [vmem:[#allocation6 + $0x1a0] ss:$16 sps:$4 sm:$0xff]  }
 0x24c   :  { %2876 = vmatpush1.bf16.msra.mxu0 %v6470_v22  ;;  %3040 = vmatpush1.bf16.msra.mxu1 %v6473_v42  ;;  %v6562_v22 = vld [vmem:[#allocation6 + $0x1c4] ss:$16 sps:$4 sm:$0xff]   ;;  %v6565_v42 = vld [vmem:[#allocation6 + $0x1cc] ss:$16 sps:$4 sm:$0xff]  }
 0x24d   :  { %3856 = vmatprep.subr.bf16.mxu0 %v6478_v11  ;;  %3938 = vmatprep.subr.bf16.mxu1 %v6481_v43  ;;  %v6560_v11 = vld [vmem:[#allocation6 + $0x1c0] ss:$16 sps:$4 sm:$0xff]   ;;  %v6563_v43 = vld [vmem:[#allocation6 + $0x1c8] ss:$16 sps:$4 sm:$0xff]  }
 0x24f   :  { %2878 = vmatmul.mubr.bf16.vlgmr.msra.gmra.mrb[8].mxu0 %v1162_v46  ;;  %3042 = vmatmul.mubr.bf16.vlgmr.msra.gmra.mrb[8].mxu1 %v1162_v46  ;;  %v6569_v46 = vld [vmem:[#allocation6 + $0x1e8] ss:$16 sps:$4 sm:$0xff]  }
 0x250   :  { %3857 = vmatpush1.bf16.msra.mxu0 %v6476_v12  ;;  %3939 = vmatpush1.bf16.msra.mxu1 %v6479_v45  ;;  %v6571_v12 = vld [vmem:[#allocation6 + $0x1ec] ss:$16 sps:$4 sm:$0xff]   ;;  %v6566_v45 = vld [vmem:[#allocation6 + $0x1e0] ss:$16 sps:$4 sm:$0xff]  }
 0x251   :  { %3858 = vmatprep.subr.bf16.mxu0 %v6484_v48  ;;  %3940 = vmatprep.subr.bf16.mxu1 %v6487_v49  ;;  %v6574_v48 = vld [vmem:[#allocation6 + $0x204] ss:$16 sps:$4 sm:$0xff]   ;;  %v6577_v49 = vld [vmem:[#allocation6 + $0x20c] ss:$16 sps:$4 sm:$0xff]  }
 0x254   :  { %3859 = vmatpush1.bf16.msra.mxu0 %v6482_v50  ;;  %3941 = vmatpush1.bf16.msra.mxu1 %v6485_v51  ;;  %v7314_v50 = vld [vmem:[%s7383_s5] sm:$0xf] }
 0x255   :  { %3860 = vmatprep.subr.bf16.mxu0 %v6490_v52  ;;  %3942 = vmatprep.subr.bf16.mxu1 %v6493_v53  ;;  %v1425_v51 = vrot.slane %v7314_v50, %v7272_v23  ;;  %v1429_v52 = vrot.slane %v7314_v50, %v7275_v25  ;;  %v1437_v53 = vrot.slane %v7314_v50, %v7282_v39 }
 0x258   :  { %3861 = vmatpush1.bf16.msra.mxu0 %v6488_v54  ;;  %3943 = vmatpush1.bf16.msra.mxu1 %v6491_v55 }
 0x259   :  { %3862 = vmatprep.subr.bf16.mxu0 %v6496_v57  ;;  %3944 = vmatprep.subr.bf16.mxu1 %v6499_v58 }
 0x25c   :  { %3863 = vmatpush1.bf16.msra.mxu0 %v6494_v59  ;;  %3945 = vmatpush1.bf16.msra.mxu1 %v6497_v38 }
 0x25d   :  { %3864 = vmatprep.subr.bf16.mxu0 %v6502_v60  ;;  %3946 = vmatprep.subr.bf16.mxu1 %v6505_v47 }
 0x260   :  { %3865 = vmatpush1.bf16.msra.mxu0 %v6500_v61  ;;  %3947 = vmatpush1.bf16.msra.mxu1 %v6503_v62 }
 0x261   :  { %3866 = vmatprep.subr.bf16.mxu0 %v6508_v63  ;;  %3948 = vmatprep.subr.bf16.mxu1 %v6511_v0 }
 0x264   :  { %3867 = vmatpush1.bf16.msra.mxu0 %v6506_v1  ;;  %3949 = vmatpush1.bf16.msra.mxu1 %v6509_v2 }
 0x265   :  { %3868 = vmatprep.subr.bf16.mxu0 %v6514_v3  ;;  %3950 = vmatprep.subr.bf16.mxu1 %v6517_v4 }
 0x268   :  { %3869 = vmatpush1.bf16.msra.mxu0 %v6512_v5  ;;  %3951 = vmatpush1.bf16.msra.mxu1 %v6515_v6  ;;  %v6572_v6 = vld [vmem:[#allocation6 + $0x200] ss:$16 sps:$4 sm:$0xff]  }
 0x269   :  { %3870 = vmatprep.subr.bf16.mxu0 %v6520_v7  ;;  %3952 = vmatprep.subr.bf16.mxu1 %v6523_v8  ;;  %v6575_v7 = vld [vmem:[#allocation6 + $0x208] ss:$16 sps:$4 sm:$0xff]  }
 0x26c   :  { %3871 = vmatpush1.bf16.msra.mxu0 %v6518_v9  ;;  %3953 = vmatpush1.bf16.msra.mxu1 %v6521_v10  ;;  %v6580_v10 = vld [vmem:[#allocation6 + $0x224] ss:$16 sps:$4 sm:$0xff]  }
 0x26d   :  { %3872 = vmatprep.subr.bf16.mxu0 %v6526_v13  ;;  %3954 = vmatprep.subr.bf16.mxu1 %v6529_v14  ;;  %v6583_v13 = vld [vmem:[#allocation6 + $0x22c] ss:$16 sps:$4 sm:$0xff]  }
 0x270   :  { %3873 = vmatpush1.bf16.msra.mxu0 %v6524_v17  ;;  %3955 = vmatpush1.bf16.msra.mxu1 %v6527_v18  ;;  %v6578_v17 = vld [vmem:[#allocation6 + $0x220] ss:$16 sps:$4 sm:$0xff]   ;;  %v6581_v18 = vld [vmem:[#allocation6 + $0x228] ss:$16 sps:$4 sm:$0xff]  }
 0x271   :  { %3874 = vmatprep.subr.bf16.mxu0 %v6532_v19  ;;  %3956 = vmatprep.subr.bf16.mxu1 %v6535_v20  ;;  %v6586_v19 = vld [vmem:[#allocation6 + $0x244] ss:$16 sps:$4 sm:$0xff]   ;;  %v6589_v20 = vld [vmem:[#allocation6 + $0x24c] ss:$16 sps:$4 sm:$0xff]  }
 0x274   :  { %3875 = vmatpush1.bf16.msra.mxu0 %v6530_v21  ;;  %3957 = vmatpush1.bf16.msra.mxu1 %v6533_v24  ;;  %v6584_v21 = vld [vmem:[#allocation6 + $0x240] ss:$16 sps:$4 sm:$0xff]   ;;  %v6587_v24 = vld [vmem:[#allocation6 + $0x248] ss:$16 sps:$4 sm:$0xff]  }
 0x275   :  { %3876 = vmatprep.subr.bf16.mxu0 %v6538_v26  ;;  %3958 = vmatprep.subr.bf16.mxu1 %v6541_v27  ;;  %v6592_v26 = vld [vmem:[#allocation6 + $0x264] ss:$16 sps:$4 sm:$0xff]   ;;  %v6595_v27 = vld [vmem:[#allocation6 + $0x26c] ss:$16 sps:$4 sm:$0xff]  }
 0x278   :  { %3877 = vmatpush1.bf16.msra.mxu0 %v6536_v28  ;;  %3959 = vmatpush1.bf16.msra.mxu1 %v6539_v56  ;;  %v6590_v28 = vld [vmem:[#allocation6 + $0x260] ss:$16 sps:$4 sm:$0xff]   ;;  %v6593_v56 = vld [vmem:[#allocation6 + $0x268] ss:$16 sps:$4 sm:$0xff]  }
 0x279   :  { %3878 = vmatprep.subr.bf16.mxu0 %v6544_v15  ;;  %3960 = vmatprep.subr.bf16.mxu1 %v6547_v29  ;;  %v6598_v15 = vld [vmem:[#allocation6 + $0x284] ss:$16 sps:$4 sm:$0xff]   ;;  %v6601_v29 = vld [vmem:[#allocation6 + $0x28c] ss:$16 sps:$4 sm:$0xff]  }
 0x27c   :  { %3879 = vmatpush1.bf16.msra.mxu0 %v6542_v30  ;;  %3961 = vmatpush1.bf16.msra.mxu1 %v6545_v31  ;;  %v6596_v30 = vld [vmem:[#allocation6 + $0x280] ss:$16 sps:$4 sm:$0xff]   ;;  %v6599_v31 = vld [vmem:[#allocation6 + $0x288] ss:$16 sps:$4 sm:$0xff]  }
 0x27d   :  { %3880 = vmatprep.subr.bf16.mxu0 %v6550_v32  ;;  %3962 = vmatprep.subr.bf16.mxu1 %v6553_v33  ;;  %v6604_v32 = vld [vmem:[#allocation6 + $0x2a4] ss:$16 sps:$4 sm:$0xff]   ;;  %v6607_v33 = vld [vmem:[#allocation6 + $0x2ac] ss:$16 sps:$4 sm:$0xff]  }
 0x280   :  { %3881 = vmatpush1.bf16.msra.mxu0 %v6548_v16  ;;  %3963 = vmatpush1.bf16.msra.mxu1 %v6551_v34  ;;  %v6602_v16 = vld [vmem:[#allocation6 + $0x2a0] ss:$16 sps:$4 sm:$0xff]   ;;  %v6605_v34 = vld [vmem:[#allocation6 + $0x2a8] ss:$16 sps:$4 sm:$0xff]  }
 0x281   :  { %3882 = vmatprep.subr.bf16.mxu0 %v6556_v35  ;;  %3964 = vmatprep.subr.bf16.mxu1 %v6559_v36  ;;  %v6610_v35 = vld [vmem:[#allocation6 + $0x2c4] ss:$16 sps:$4 sm:$0xff]   ;;  %v6613_v36 = vld [vmem:[#allocation6 + $0x2cc] ss:$16 sps:$4 sm:$0xff]  }
 0x284   :  { %3883 = vmatpush1.bf16.msra.mxu0 %v6554_v40  ;;  %3965 = vmatpush1.bf16.msra.mxu1 %v6557_v41  ;;  %v6608_v40 = vld [vmem:[#allocation6 + $0x2c0] ss:$16 sps:$4 sm:$0xff]   ;;  %v6611_v41 = vld [vmem:[#allocation6 + $0x2c8] ss:$16 sps:$4 sm:$0xff]  }
 0x285   :  { %3884 = vmatprep.subr.bf16.mxu0 %v6562_v22  ;;  %3966 = vmatprep.subr.bf16.mxu1 %v6565_v42  ;;  %v6616_v22 = vld [vmem:[#allocation6 + $0x2e4] ss:$16 sps:$4 sm:$0xff]   ;;  %v6619_v42 = vld [vmem:[#allocation6 + $0x2ec] ss:$16 sps:$4 sm:$0xff]  }
 0x288   :  { %3885 = vmatpush1.bf16.msra.mxu0 %v6560_v11  ;;  %3967 = vmatpush1.bf16.msra.mxu1 %v6563_v43  ;;  %v6614_v11 = vld [vmem:[#allocation6 + $0x2e0] ss:$16 sps:$4 sm:$0xff]   ;;  %v6617_v43 = vld [vmem:[#allocation6 + $0x2e8] ss:$16 sps:$4 sm:$0xff]  }
 0x289   :  { %3886 = vmatprep.subr.bf16.mxu0 %v6568_v44  ;;  %3968 = vmatprep.subr.bf16.mxu1 %v6571_v12  ;;  %v6622_v44 = vld [vmem:[#allocation6 + $0x304] ss:$16 sps:$4 sm:$0xff]   ;;  %v6625_v12 = vld [vmem:[#allocation6 + $0x30c] ss:$16 sps:$4 sm:$0xff]  }
 0x28c   :  { %3887 = vmatpush1.bf16.msra.mxu0 %v6566_v45  ;;  %3969 = vmatpush1.bf16.msra.mxu1 %v6569_v46  ;;  %v6620_v45 = vld [vmem:[#allocation6 + $0x300] ss:$16 sps:$4 sm:$0xff]   ;;  %v6623_v46 = vld [vmem:[#allocation6 + $0x308] ss:$16 sps:$4 sm:$0xff]  }
 0x28d   :  { %3897 = vmatprep.subr.bf16.mxu0 %v6574_v48  ;;  %3979 = vmatprep.subr.bf16.mxu1 %v6577_v49  ;;  %v6628_v48 = vld [vmem:[#allocation6 + $0x324] ss:$16 sps:$4 sm:$0xff]   ;;  %v6631_v49 = vld [vmem:[#allocation6 + $0x32c] ss:$16 sps:$4 sm:$0xff]  }
 0x322   :  { %v2879_v54 = vpop.f32.mrb[8].mxu0  ;;  %v7322_v55 = vpop.f32.mrb[8].mxu1 }
 0x323   :  { %v6026_v57 = vadd.f32 %v2879_v54, %v1425_v51  ;;  %v2881_v58 = vpop.f32.mrb[9].mxu0  ;;  %v3045_v59 = vpop.f32.mrb[9].mxu1  ;;  %v6626_v51 = vld [vmem:[#allocation6 + $0x320] ss:$16 sps:$4 sm:$0xff]   ;;  %v6637_v54 = vld [vmem:[#allocation6 + $0x34c] ss:$16 sps:$4 sm:$0xff]  }
 0x324   :  { %v6027_v38 = vadd.f32 %v2881_v58, %v1429_v52  ;;  %v6029_v60 = vadd.f32 %v3045_v59, %v1437_v53  ;;  %v2883_v47 = vpop.f32.mrb[10].mxu0  ;;  %v3047_v61 = vpop.f32.mrb[10].mxu1  ;;  %v6629_v52 = vld [vmem:[#allocation6 + $0x328] ss:$16 sps:$4 sm:$0xff]   ;;  %v6634_v53 = vld [vmem:[#allocation6 + $0x344] ss:$16 sps:$4 sm:$0xff]  }
 0x325   :  { %vm3050_vm8 = vcmp.gt.f32.partialorder %v6026_v57, 0.0  ;;  %v3054_v62 = vmul.f32 0.2, %v6026_v57  ;;  %v2884_v2 = vpop.f32.mrb[11].mxu0  ;;  %v3048_v3 = vpop.f32.mrb[11].mxu1 }
 0x326   :  { %vm3051_vm9 = vcmp.gt.f32.partialorder %v6027_v38, 0.0  ;;  %v3055_v63 = vmul.f32 0.2, %v6027_v38  ;;  %vm3053_vm10 = vcmp.gt.f32.partialorder %v6029_v60, 0.0  ;;  %v3057_v0 = vmul.f32 0.2, %v6029_v60 }
 0x327   :  { %v3058_v1 = vsel %vm3050_vm8, %v6026_v57, %v3054_v62  ;;  %v6632_v57 = vld [vmem:[#allocation6 + $0x340] ss:$16 sps:$4 sm:$0xff]   ;;  %v6635_v58 = vld [vmem:[#allocation6 + $0x348] ss:$16 sps:$4 sm:$0xff]   ;;  %v6640_v59 = vld [vmem:[#allocation6 + $0x364] ss:$16 sps:$4 sm:$0xff]   ;;  %v1433_v3 = vrot.slane %v7314_v50, %v7289_v37 }
 0x328   :  { %v3059_v4 = vsel %vm3051_vm9, %v6027_v38, %v3055_v63  ;;  %v3061_v8 = vsel %vm3053_vm10, %v6029_v60, %v3057_v0  ;;  %v3062_v9 = vpack.c.bf16 %v3058_v1, %v3058_v1  ;;  %v6643_v38 = vld [vmem:[#allocation6 + $0x36c] ss:$16 sps:$4 sm:$0xff]   ;;  %v6638_v60 = vld [vmem:[#allocation6 + $0x360] ss:$16 sps:$4 sm:$0xff]   ;;  %v6641_v47 = vld [vmem:[#allocation6 + $0x368] ss:$16 sps:$4 sm:$0xff]  }
 0x329   :  { %v3063_v5 = vpack.c.bf16 %v3059_v4, %v3059_v4  ;;  %v3065_v14 = vpack.c.bf16 %v3061_v8, %v3061_v8  ;;  %v6646_v61 = vld [vmem:[#allocation6 + $0x384] ss:$16 sps:$4 sm:$0xff]   ;;  %v6649_v62 = vld [vmem:[#allocation6 + $0x38c] ss:$16 sps:$4 sm:$0xff]   ;;  %v6644_v63 = vld [vmem:[#allocation6 + $0x380] ss:$16 sps:$4 sm:$0xff]   ;;  %v6028_v8 = vadd.f32 %v7322_v55, %v1433_v3 }
 0x32a   :  { %v6647_v0 = vld [vmem:[#allocation6 + $0x388] ss:$16 sps:$4 sm:$0xff]   ;;  %v6652_v1 = vld [vmem:[#allocation6 + $0x3a4] ss:$16 sps:$4 sm:$0xff]   ;;  %v6655_v2 = vld [vmem:[#allocation6 + $0x3ac] ss:$16 sps:$4 sm:$0xff]  }
 0x32b   :  { %3888 = vmatprep.mubr.bf16.mxu0 %v3063_v5  ;;  %3970 = vmatprep.mubr.bf16.mxu1 %v3063_v5  ;;  %v6650_v4 = vld [vmem:[#allocation6 + $0x3a0] ss:$16 sps:$4 sm:$0xff]   ;;  %v6653_v5 = vld [vmem:[#allocation6 + $0x3a8] ss:$16 sps:$4 sm:$0xff]   ;;  %vm3052_vm11 = vcmp.gt.f32.partialorder %v6028_v8, 0.0 }
 0x32c   :  { %3889 = vmatmul.mubr.bf16.vlgmr.msra.gmra.mrb[12].mxu0 %v3062_v9  ;;  %3971 = vmatmul.mubr.bf16.vlgmr.msra.gmra.mrb[12].mxu1 %v3062_v9  ;;  %v6656_v9 = vld [vmem:[#allocation6 + $0x3c0] ss:$16 sps:$4 sm:$0xff]  }
 0x32d   :  { %3898 = vmatpush1.bf16.msra.mxu0 %v6572_v6  ;;  %3980 = vmatpush1.bf16.msra.mxu1 %v6575_v7  ;;  %v6658_v6 = vld [vmem:[#allocation6 + $0x3c4] ss:$16 sps:$4 sm:$0xff]   ;;  %v6661_v7 = vld [vmem:[#allocation6 + $0x3cc] ss:$16 sps:$4 sm:$0xff]   ;;  %v6662_v50 = vld [vmem:[#allocation6 + $0x3e0] ss:$16 sps:$4 sm:$0xff]  }
 0x32e   :  { %3929 = vmatprep.mubr.bf16.mxu0 %v3065_v14  ;;  %4011 = vmatprep.mubr.bf16.mxu1 %v3065_v14  ;;  %v6667_v14 = vld [vmem:[#allocation6 + $0x3ec] ss:$16 sps:$4 sm:$0xff]   ;;  %v6668_v55 = vld [vmem:[#allocation7] ss:$8 sps:$4 sm:$0xff]  }
 0x32f   :  { %3899 = vmatprep.subr.bf16.mxu0 %v6580_v10  ;;  %3981 = vmatprep.subr.bf16.mxu1 %v6583_v13  ;;  %v6659_v10 = vld [vmem:[#allocation6 + $0x3c8] ss:$16 sps:$4 sm:$0xff]   ;;  %v6664_v13 = vld [vmem:[#allocation6 + $0x3e4] ss:$16 sps:$4 sm:$0xff]  }
 0x331   :  { %3900 = vmatpush1.bf16.msra.mxu0 %v6578_v17  ;;  %3982 = vmatpush1.bf16.msra.mxu1 %v6581_v18  ;;  %v3056_v17 = vmul.f32 0.2, %v6028_v8  ;;  %v6665_v18 = vld [vmem:[#allocation6 + $0x3e8] ss:$16 sps:$4 sm:$0xff]  }
 0x332   :  { %3901 = vmatprep.subr.bf16.mxu0 %v6586_v19  ;;  %3983 = vmatprep.subr.bf16.mxu1 %v6589_v20  ;;  %v6670_v19 = vld [vmem:[#allocation7 + $0x4] ss:$8 sps:$4 sm:$0xff]  }
 0x333   :  { %v3060_v20 = vsel %vm3052_vm11, %v6028_v8, %v3056_v17 }
 0x335   :  { %3902 = vmatpush1.bf16.msra.mxu0 %v6584_v21  ;;  %3984 = vmatpush1.bf16.msra.mxu1 %v6587_v24  ;;  %v3064_v21 = vpack.c.bf16 %v3060_v20, %v3060_v20  ;;  %v6673_v24 = vld [vmem:[#allocation7 + $0x14] ss:$8 sps:$4 sm:$0xff]   ;;  %v6716_v20 = vld [vmem:[#allocation7 + $0x100] ss:$8 sps:$4 sm:$0xff]  }
 0x336   :  { %3903 = vmatprep.subr.bf16.mxu0 %v6592_v26  ;;  %3985 = vmatprep.subr.bf16.mxu1 %v6595_v27  ;;  %v6671_v26 = vld [vmem:[#allocation7 + $0x10] ss:$8 sps:$4 sm:$0xff]   ;;  %v6676_v27 = vld [vmem:[#allocation7 + $0x24] ss:$8 sps:$4 sm:$0xff]  }
 0x339   :  { %3904 = vmatpush1.bf16.msra.mxu0 %v6590_v28  ;;  %3986 = vmatpush1.bf16.msra.mxu1 %v6593_v56  ;;  %v6674_v28 = vld [vmem:[#allocation7 + $0x20] ss:$8 sps:$4 sm:$0xff]   ;;  %v6679_v56 = vld [vmem:[#allocation7 + $0x34] ss:$8 sps:$4 sm:$0xff]  }
 0x33a   :  { %3905 = vmatprep.subr.bf16.mxu0 %v6598_v15  ;;  %3987 = vmatprep.subr.bf16.mxu1 %v6601_v29  ;;  %v6677_v15 = vld [vmem:[#allocation7 + $0x30] ss:$8 sps:$4 sm:$0xff]   ;;  %v6682_v29 = vld [vmem:[#allocation7 + $0x44] ss:$8 sps:$4 sm:$0xff]  }
 0x33d   :  { %3906 = vmatpush1.bf16.msra.mxu0 %v6596_v30  ;;  %3988 = vmatpush1.bf16.msra.mxu1 %v6599_v31  ;;  %v6680_v30 = vld [vmem:[#allocation7 + $0x40] ss:$8 sps:$4 sm:$0xff]   ;;  %v6685_v31 = vld [vmem:[#allocation7 + $0x54] ss:$8 sps:$4 sm:$0xff]  }
 0x33e   :  { %3907 = vmatprep.subr.bf16.mxu0 %v6604_v32  ;;  %3989 = vmatprep.subr.bf16.mxu1 %v6607_v33  ;;  %v6683_v32 = vld [vmem:[#allocation7 + $0x50] ss:$8 sps:$4 sm:$0xff]   ;;  %v6688_v33 = vld [vmem:[#allocation7 + $0x64] ss:$8 sps:$4 sm:$0xff]  }
 0x341   :  { %3908 = vmatpush1.bf16.msra.mxu0 %v6602_v16  ;;  %3990 = vmatpush1.bf16.msra.mxu1 %v6605_v34  ;;  %v6686_v16 = vld [vmem:[#allocation7 + $0x60] ss:$8 sps:$4 sm:$0xff]   ;;  %v6691_v34 = vld [vmem:[#allocation7 + $0x74] ss:$8 sps:$4 sm:$0xff]  }
 0x342   :  { %3909 = vmatprep.subr.bf16.mxu0 %v6610_v35  ;;  %3991 = vmatprep.subr.bf16.mxu1 %v6613_v36  ;;  %v6689_v35 = vld [vmem:[#allocation7 + $0x70] ss:$8 sps:$4 sm:$0xff]   ;;  %v6694_v36 = vld [vmem:[#allocation7 + $0x84] ss:$8 sps:$4 sm:$0xff]  }
 0x345   :  { %3910 = vmatpush1.bf16.msra.mxu0 %v6608_v40  ;;  %3992 = vmatpush1.bf16.msra.mxu1 %v6611_v41  ;;  %v6692_v40 = vld [vmem:[#allocation7 + $0x80] ss:$8 sps:$4 sm:$0xff]   ;;  %v6697_v41 = vld [vmem:[#allocation7 + $0x94] ss:$8 sps:$4 sm:$0xff]  }
 0x346   :  { %3911 = vmatprep.subr.bf16.mxu0 %v6616_v22  ;;  %3993 = vmatprep.subr.bf16.mxu1 %v6619_v42  ;;  %v6695_v22 = vld [vmem:[#allocation7 + $0x90] ss:$8 sps:$4 sm:$0xff]   ;;  %v6700_v42 = vld [vmem:[#allocation7 + $0xa4] ss:$8 sps:$4 sm:$0xff]  }
 0x349   :  { %3912 = vmatpush1.bf16.msra.mxu0 %v6614_v11  ;;  %3994 = vmatpush1.bf16.msra.mxu1 %v6617_v43  ;;  %v6698_v11 = vld [vmem:[#allocation7 + $0xa0] ss:$8 sps:$4 sm:$0xff]   ;;  %v6703_v43 = vld [vmem:[#allocation7 + $0xb4] ss:$8 sps:$4 sm:$0xff]  }
 0x34a   :  { %3913 = vmatprep.subr.bf16.mxu0 %v6622_v44  ;;  %3995 = vmatprep.subr.bf16.mxu1 %v6625_v12  ;;  %v6701_v44 = vld [vmem:[#allocation7 + $0xb0] ss:$8 sps:$4 sm:$0xff]   ;;  %v6706_v12 = vld [vmem:[#allocation7 + $0xc4] ss:$8 sps:$4 sm:$0xff]  }
 0x34d   :  { %3914 = vmatpush1.bf16.msra.mxu0 %v6620_v45  ;;  %3996 = vmatpush1.bf16.msra.mxu1 %v6623_v46  ;;  %v6704_v45 = vld [vmem:[#allocation7 + $0xc0] ss:$8 sps:$4 sm:$0xff]   ;;  %v6709_v46 = vld [vmem:[#allocation7 + $0xd4] ss:$8 sps:$4 sm:$0xff]  }
 0x34e   :  { %3915 = vmatprep.subr.bf16.mxu0 %v6628_v48  ;;  %3997 = vmatprep.subr.bf16.mxu1 %v6631_v49  ;;  %v6707_v48 = vld [vmem:[#allocation7 + $0xd0] ss:$8 sps:$4 sm:$0xff]   ;;  %v6712_v49 = vld [vmem:[#allocation7 + $0xe4] ss:$8 sps:$4 sm:$0xff]  }
 0x351   :  { %3916 = vmatpush1.bf16.msra.mxu0 %v6626_v51  ;;  %3998 = vmatpush1.bf16.msra.mxu1 %v6629_v52  ;;  %v6710_v51 = vld [vmem:[#allocation7 + $0xe0] ss:$8 sps:$4 sm:$0xff]   ;;  %v6715_v52 = vld [vmem:[#allocation7 + $0xf4] ss:$8 sps:$4 sm:$0xff]  }
 0x352   :  { %3917 = vmatprep.subr.bf16.mxu0 %v6634_v53  ;;  %3999 = vmatprep.subr.bf16.mxu1 %v6637_v54  ;;  %v6713_v53 = vld [vmem:[#allocation7 + $0xf0] ss:$8 sps:$4 sm:$0xff]   ;;  %v6718_v54 = vld [vmem:[#allocation7 + $0x104] ss:$8 sps:$4 sm:$0xff]  }
 0x355   :  { %3918 = vmatpush1.bf16.msra.mxu0 %v6632_v57  ;;  %4000 = vmatpush1.bf16.msra.mxu1 %v6635_v58  ;;  %v6767_v57 = vld [vmem:[#allocation9 + $0x8] ss:$16 sps:$4 sm:$0xff]   ;;  %v6769_v58 = vld [vmem:[#allocation9 + $0xc] ss:$16 sps:$4 sm:$0xff]  }
 0x356   :  { %3919 = vmatprep.subr.bf16.mxu0 %v6640_v59  ;;  %4001 = vmatprep.subr.bf16.mxu1 %v6643_v38  ;;  %v6775_v59 = vld [vmem:[#allocation9 + $0x2c] ss:$16 sps:$4 sm:$0xff]   ;;  %v6773_v38 = vld [vmem:[#allocation9 + $0x28] ss:$16 sps:$4 sm:$0xff]  }
 0x359   :  { %3920 = vmatpush1.bf16.msra.mxu0 %v6638_v60  ;;  %4002 = vmatpush1.bf16.msra.mxu1 %v6641_v47  ;;  %v7330_v60 = vld [vmem:[%s7385_s7] sm:$0xf] }
 0x35a   :  { %3921 = vmatprep.subr.bf16.mxu0 %v6646_v61  ;;  %4003 = vmatprep.subr.bf16.mxu1 %v6649_v62  ;;  %v3199_v47 = vrot.slane %v7330_v60, %v7272_v23  ;;  %v3203_v61 = vrot.slane %v7330_v60, %v7275_v25  ;;  %v3211_v62 = vrot.slane %v7330_v60, %v7282_v39 }
 0x35d   :  { %3922 = vmatpush1.bf16.msra.mxu0 %v6644_v63  ;;  %4004 = vmatpush1.bf16.msra.mxu1 %v6647_v0 }
 0x35e   :  { %3923 = vmatprep.subr.bf16.mxu0 %v6652_v1  ;;  %4005 = vmatprep.subr.bf16.mxu1 %v6655_v2 }
 0x361   :  { %3924 = vmatpush1.bf16.msra.mxu0 %v6650_v4  ;;  %4006 = vmatpush1.bf16.msra.mxu1 %v6653_v5 }
 0x362   :  { %3925 = vmatprep.subr.bf16.mxu0 %v6658_v6  ;;  %4007 = vmatprep.subr.bf16.mxu1 %v6661_v7 }
 0x365   :  { %3926 = vmatpush1.bf16.msra.mxu0 %v6656_v9  ;;  %4008 = vmatpush1.bf16.msra.mxu1 %v6659_v10 }
 0x366   :  { %3927 = vmatprep.subr.bf16.mxu0 %v6664_v13  ;;  %4009 = vmatprep.subr.bf16.mxu1 %v6667_v14 }
 0x369   :  { %3928 = vmatpush1.bf16.msra.mxu0 %v6662_v50  ;;  %4010 = vmatpush1.bf16.msra.mxu1 %v6665_v18 }
 0x36a   :  { %4432 = vmatprep.subr.bf16.mxu0 %v6670_v19  ;;  %4788 = vmatprep.subr.bf16.mxu1 %v6769_v58  ;;  %v6761_v58 = vld [vmem:[#allocation7 + $0x1f0] ss:$8 sps:$4 sm:$0xff]  }
 0x36c   :  { %3930 = vmatmul.mubr.bf16.vlgmr.msra.gmra.mrb[12].mxu0 %v3064_v21  ;;  %4012 = vmatmul.mubr.bf16.vlgmr.msra.gmra.mrb[12].mxu1 %v3064_v21  ;;  %v6721_v21 = vld [vmem:[#allocation7 + $0x114] ss:$8 sps:$4 sm:$0xff]  }
 0x36d   :  { %4433 = vmatpush1.bf16.msra.mxu0 %v6668_v55  ;;  %4789 = vmatpush1.bf16.msra.mxu1 %v6767_v57 }
 0x36e   :  { %4434 = vmatprep.subr.bf16.mxu0 %v6673_v24  ;;  %4790 = vmatprep.subr.bf16.mxu1 %v6775_v59  ;;  %v6766_v59 = vld [vmem:[#allocation9 + $0x4] ss:$16 sps:$4 sm:$0xff]  }
 0x371   :  { %4435 = vmatpush1.bf16.msra.mxu0 %v6671_v26  ;;  %4791 = vmatpush1.bf16.msra.mxu1 %v6773_v38  ;;  %v6719_v26 = vld [vmem:[#allocation7 + $0x110] ss:$8 sps:$4 sm:$0xff]  }
 0x372   :  { %4436 = vmatprep.subr.bf16.mxu0 %v6676_v27  ;;  %v6724_v27 = vld [vmem:[#allocation7 + $0x124] ss:$8 sps:$4 sm:$0xff]  }
 0x375   :  { %4437 = vmatpush1.bf16.msra.mxu0 %v6674_v28  ;;  %v6722_v28 = vld [vmem:[#allocation7 + $0x120] ss:$8 sps:$4 sm:$0xff]  }
 0x376   :  { %4438 = vmatprep.subr.bf16.mxu0 %v6679_v56  ;;  %v6727_v56 = vld [vmem:[#allocation7 + $0x134] ss:$8 sps:$4 sm:$0xff]  }
 0x379   :  { %4439 = vmatpush1.bf16.msra.mxu0 %v6677_v15  ;;  %v6725_v15 = vld [vmem:[#allocation7 + $0x130] ss:$8 sps:$4 sm:$0xff]  }
 0x37a   :  { %4440 = vmatprep.subr.bf16.mxu0 %v6682_v29  ;;  %v6730_v29 = vld [vmem:[#allocation7 + $0x144] ss:$8 sps:$4 sm:$0xff]  }
 0x37d   :  { %4441 = vmatpush1.bf16.msra.mxu0 %v6680_v30  ;;  %v6728_v30 = vld [vmem:[#allocation7 + $0x140] ss:$8 sps:$4 sm:$0xff]  }
 0x37e   :  { %4442 = vmatprep.subr.bf16.mxu0 %v6685_v31  ;;  %v6733_v31 = vld [vmem:[#allocation7 + $0x154] ss:$8 sps:$4 sm:$0xff]  }
 0x381   :  { %4443 = vmatpush1.bf16.msra.mxu0 %v6683_v32  ;;  %v6731_v32 = vld [vmem:[#allocation7 + $0x150] ss:$8 sps:$4 sm:$0xff]  }
 0x382   :  { %4444 = vmatprep.subr.bf16.mxu0 %v6688_v33  ;;  %v6736_v33 = vld [vmem:[#allocation7 + $0x164] ss:$8 sps:$4 sm:$0xff]  }
 0x385   :  { %4445 = vmatpush1.bf16.msra.mxu0 %v6686_v16  ;;  %v6734_v16 = vld [vmem:[#allocation7 + $0x160] ss:$8 sps:$4 sm:$0xff]  }
 0x386   :  { %4446 = vmatprep.subr.bf16.mxu0 %v6691_v34  ;;  %v6739_v34 = vld [vmem:[#allocation7 + $0x174] ss:$8 sps:$4 sm:$0xff]  }
 0x389   :  { %4447 = vmatpush1.bf16.msra.mxu0 %v6689_v35  ;;  %v6737_v35 = vld [vmem:[#allocation7 + $0x170] ss:$8 sps:$4 sm:$0xff]  }
 0x38a   :  { %4448 = vmatprep.subr.bf16.mxu0 %v6694_v36  ;;  %v6742_v36 = vld [vmem:[#allocation7 + $0x184] ss:$8 sps:$4 sm:$0xff]  }
 0x38d   :  { %4449 = vmatpush1.bf16.msra.mxu0 %v6692_v40  ;;  %v6740_v40 = vld [vmem:[#allocation7 + $0x180] ss:$8 sps:$4 sm:$0xff]  }
 0x38e   :  { %4450 = vmatprep.subr.bf16.mxu0 %v6697_v41  ;;  %v6745_v41 = vld [vmem:[#allocation7 + $0x194] ss:$8 sps:$4 sm:$0xff]  }
 0x391   :  { %4451 = vmatpush1.bf16.msra.mxu0 %v6695_v22  ;;  %v6743_v22 = vld [vmem:[#allocation7 + $0x190] ss:$8 sps:$4 sm:$0xff]  }
 0x392   :  { %4452 = vmatprep.subr.bf16.mxu0 %v6700_v42  ;;  %v6748_v42 = vld [vmem:[#allocation7 + $0x1a4] ss:$8 sps:$4 sm:$0xff]  }
 0x395   :  { %4453 = vmatpush1.bf16.msra.mxu0 %v6698_v11  ;;  %v6746_v11 = vld [vmem:[#allocation7 + $0x1a0] ss:$8 sps:$4 sm:$0xff]  }
 0x396   :  { %4454 = vmatprep.subr.bf16.mxu0 %v6703_v43  ;;  %v6751_v43 = vld [vmem:[#allocation7 + $0x1b4] ss:$8 sps:$4 sm:$0xff]  }
 0x399   :  { %4455 = vmatpush1.bf16.msra.mxu0 %v6701_v44  ;;  %v6749_v44 = vld [vmem:[#allocation7 + $0x1b0] ss:$8 sps:$4 sm:$0xff]  }
 0x39a   :  { %4456 = vmatprep.subr.bf16.mxu0 %v6706_v12  ;;  %v6754_v12 = vld [vmem:[#allocation7 + $0x1c4] ss:$8 sps:$4 sm:$0xff]  }
 0x39d   :  { %4457 = vmatpush1.bf16.msra.mxu0 %v6704_v45  ;;  %v6752_v45 = vld [vmem:[#allocation7 + $0x1c0] ss:$8 sps:$4 sm:$0xff]  }
 0x39e   :  { %4458 = vmatprep.subr.bf16.mxu0 %v6709_v46  ;;  %v6757_v46 = vld [vmem:[#allocation7 + $0x1d4] ss:$8 sps:$4 sm:$0xff]  }
 0x3a1   :  { %4459 = vmatpush1.bf16.msra.mxu0 %v6707_v48  ;;  %v3207_v48 = vrot.slane %v7330_v60, %v7289_v37 }
 0x3a2   :  { %4460 = vmatprep.subr.bf16.mxu0 %v6712_v49  ;;  %v6755_v49 = vld [vmem:[#allocation7 + $0x1d0] ss:$8 sps:$4 sm:$0xff]  }
 0x3a5   :  { %4461 = vmatpush1.bf16.msra.mxu0 %v6710_v51  ;;  %v6760_v51 = vld [vmem:[#allocation7 + $0x1e4] ss:$8 sps:$4 sm:$0xff]  }
 0x3a6   :  { %4462 = vmatprep.subr.bf16.mxu0 %v6715_v52 }
 0x3a9   :  { %4463 = vmatpush1.bf16.msra.mxu0 %v6713_v53  ;;  %v6758_v53 = vld [vmem:[#allocation7 + $0x1e0] ss:$8 sps:$4 sm:$0xff]  }
 0x3aa   :  { %4473 = vmatprep.subr.bf16.mxu0 %v6718_v54  ;;  %v6763_v54 = vld [vmem:[#allocation7 + $0x1f4] ss:$8 sps:$4 sm:$0xff]  }
 0x43f   :  { %v3931_v63 = vpop.f32.mrb[12].mxu0  ;;  %v7338_v0 = vpop.f32.mrb[12].mxu1 }
 0x440   :  { %v6030_v1 = vadd.f32 %v3931_v63, %v3199_v47  ;;  %v3933_v2 = vpop.f32.mrb[13].mxu0  ;;  %v4015_v3 = vpop.f32.mrb[13].mxu1  ;;  %v6032_v52 = vadd.f32 %v7338_v0, %v3207_v48  ;;  %v6764_v47 = vld [vmem:[#allocation9] ss:$16 sps:$4 sm:$0xff]   ;;  %v6778_v63 = vld [vmem:[#allocation9 + $0x44] ss:$16 sps:$4 sm:$0xff]  }
 0x441   :  { %v6031_v4 = vadd.f32 %v3933_v2, %v3203_v61  ;;  %v6033_v5 = vadd.f32 %v4015_v3, %v3211_v62  ;;  %v3935_v6 = vpop.f32.mrb[14].mxu0  ;;  %v4017_v7 = vpop.f32.mrb[14].mxu1  ;;  %v6772_v61 = vld [vmem:[#allocation9 + $0x24] ss:$16 sps:$4 sm:$0xff]   ;;  %v6770_v62 = vld [vmem:[#allocation9 + $0x20] ss:$16 sps:$4 sm:$0xff]  }
 0x442   :  { %vm4020_vm12 = vcmp.gt.f32.partialorder %v6030_v1, 0.0  ;;  %v4024_v8 = vmul.f32 0.2, %v6030_v1  ;;  %v3936_v14 = vpop.f32.mrb[15].mxu0  ;;  %v4018_v17 = vpop.f32.mrb[15].mxu1  ;;  %vm4022_vm15 = vcmp.gt.f32.partialorder %v6032_v52, 0.0 }
 0x443   :  { %vm4021_vm13 = vcmp.gt.f32.partialorder %v6031_v4, 0.0  ;;  %v4025_v9 = vmul.f32 0.2, %v6031_v4  ;;  %vm4023_vm14 = vcmp.gt.f32.partialorder %v6033_v5, 0.0  ;;  %v4027_v10 = vmul.f32 0.2, %v6033_v5 }
 0x444   :  { %v4028_v13 = vsel %vm4020_vm12, %v6030_v1, %v4024_v8  ;;  %v4026_v57 = vmul.f32 0.2, %v6032_v52  ;;  %v6781_v0 = vld [vmem:[#allocation9 + $0x4c] ss:$16 sps:$4 sm:$0xff]   ;;  %v6776_v1 = vld [vmem:[#allocation9 + $0x40] ss:$16 sps:$4 sm:$0xff]  }
 0x445   :  { %v4029_v50 = vsel %vm4021_vm13, %v6031_v4, %v4025_v9  ;;  %v4031_v18 = vsel %vm4023_vm14, %v6033_v5, %v4027_v10  ;;  %v4032_v55 = vpack.c.bf16 %v4028_v13, %v4028_v13  ;;  %v6779_v2 = vld [vmem:[#allocation9 + $0x48] ss:$16 sps:$4 sm:$0xff]   ;;  %4792 = vmatprep.subr.bf16.mxu1 %v6781_v0  ;;  %v6784_v3 = vld [vmem:[#allocation9 + $0x64] ss:$16 sps:$4 sm:$0xff]   ;;  %v6787_v4 = vld [vmem:[#allocation9 + $0x6c] ss:$16 sps:$4 sm:$0xff]  }
 0x446   :  { %v4033_v19 = vpack.c.bf16 %v4029_v50, %v4029_v50  ;;  %v4035_v24 = vpack.c.bf16 %v4031_v18, %v4031_v18  ;;  %v4030_v38 = vsel %vm4022_vm15, %v6032_v52, %v4026_v57  ;;  %4793 = vmatpush1.bf16.msra.mxu1 %v6779_v2  ;;  %v6782_v5 = vld [vmem:[#allocation9 + $0x60] ss:$16 sps:$4 sm:$0xff]   ;;  %v6785_v6 = vld [vmem:[#allocation9 + $0x68] ss:$16 sps:$4 sm:$0xff]   ;;  %v6790_v8 = vld [vmem:[#allocation9 + $0x84] ss:$16 sps:$4 sm:$0xff]  }
 0x447   :  { %v4034_v60 = vpack.c.bf16 %v4030_v38, %v4030_v38  ;;  %4794 = vmatprep.subr.bf16.mxu1 %v6787_v4  ;;  %v6788_v7 = vld [vmem:[#allocation9 + $0x80] ss:$16 sps:$4 sm:$0xff]   ;;  %v6791_v9 = vld [vmem:[#allocation9 + $0x88] ss:$16 sps:$4 sm:$0xff]   ;;  %v6793_v10 = vld [vmem:[#allocation9 + $0x8c] ss:$16 sps:$4 sm:$0xff]  }
 0x448   :  { %4464 = vmatprep.mubr.bf16.mxu0 %v4033_v19  ;;  %v6796_v13 = vld [vmem:[#allocation9 + $0xa4] ss:$16 sps:$4 sm:$0xff]   ;;  %v6799_v14 = vld [vmem:[#allocation9 + $0xac] ss:$16 sps:$4 sm:$0xff]   ;;  %v6794_v17 = vld [vmem:[#allocation9 + $0xa0] ss:$16 sps:$4 sm:$0xff]  }
 0x449   :  { %4465 = vmatmul.mubr.bf16.vlgmr.msra.gmra.mrb[16].mxu0 %v4032_v55  ;;  %v6797_v50 = vld [vmem:[#allocation9 + $0xa8] ss:$16 sps:$4 sm:$0xff]   ;;  %v6802_v18 = vld [vmem:[#allocation9 + $0xc4] ss:$16 sps:$4 sm:$0xff]   ;;  %v6805_v19 = vld [vmem:[#allocation9 + $0xcc] ss:$16 sps:$4 sm:$0xff]  }
 0x44a   :  { %4474 = vmatpush1.bf16.msra.mxu0 %v6716_v20  ;;  %4505 = vmatprep.mubr.bf16.mxu0 %v4035_v24  ;;  %v7071_v20 = vmov 0   ;;  %v6800_v55 = vld [vmem:[#allocation9 + $0xc0] ss:$16 sps:$4 sm:$0xff]   ;;  %v6808_v24 = vld [vmem:[#allocation9 + $0xe4] ss:$16 sps:$4 sm:$0xff]  }
 0x44b   :  { %4475 = vmatprep.subr.bf16.mxu0 %v6721_v21  ;;  %4795 = vmatpush1.bf16.msra.mxu1 %v6785_v6  ;;  %v6803_v21 = vld [vmem:[#allocation9 + $0xc8] ss:$16 sps:$4 sm:$0xff]   ;;  %v6820_v48 = vld [vmem:[#allocation10 + $0x24] ss:$8 sps:$4 sm:$0xff]   ;;  %v6829_v57 = vld [vmem:[#allocation10 + $0x54] ss:$8 sps:$4 sm:$0xff]  }
 0x44c   :  { %4796 = vmatprep.subr.bf16.mxu1 %v6793_v10  ;;  %4820 = vmatprep.mubr.bf16.mxu1 %v7071_v20  ;;  %v6821_v52 = vld [vmem:[#allocation10 + $0x30] ss:$8 sps:$4 sm:$0xff]   ;;  %v6830_v38 = vld [vmem:[#allocation10 + $0x60] ss:$8 sps:$4 sm:$0xff]  }
 0x44d   :  { %v6839_v0 = vld [vmem:[#allocation10 + $0x90] ss:$8 sps:$4 sm:$0xff]   ;;  %v6842_v2 = vld [vmem:[#allocation10 + $0xa0] ss:$8 sps:$4 sm:$0xff]  }
 0x44e   :  { %4476 = vmatpush1.bf16.msra.mxu0 %v6719_v26  ;;  %v6811_v26 = vld [vmem:[#allocation9 + $0xec] ss:$16 sps:$4 sm:$0xff]   ;;  %v6845_v4 = vld [vmem:[#allocation10 + $0xb0] ss:$8 sps:$4 sm:$0xff]   ;;  %v6848_v6 = vld [vmem:[#allocation10 + $0xc0] ss:$8 sps:$4 sm:$0xff]  }
 0x44f   :  { %4477 = vmatprep.subr.bf16.mxu0 %v6724_v27  ;;  %4797 = vmatpush1.bf16.msra.mxu1 %v6791_v9  ;;  %v6806_v27 = vld [vmem:[#allocation9 + $0xe0] ss:$16 sps:$4 sm:$0xff]   ;;  %v6856_v9 = vld [vmem:[#allocation10 + $0xe4] ss:$8 sps:$4 sm:$0xff]  }
 0x450   :  { %4798 = vmatprep.subr.bf16.mxu1 %v6799_v14  ;;  %v6854_v10 = vld [vmem:[#allocation10 + $0xe0] ss:$8 sps:$4 sm:$0xff]   ;;  %v6857_v14 = vld [vmem:[#allocation10 + $0xf0] ss:$8 sps:$4 sm:$0xff]  }
 0x452   :  { %4478 = vmatpush1.bf16.msra.mxu0 %v6722_v28  ;;  %v6809_v28 = vld [vmem:[#allocation9 + $0xe8] ss:$16 sps:$4 sm:$0xff]  }
 0x453   :  { %4479 = vmatprep.subr.bf16.mxu0 %v6727_v56  ;;  %4799 = vmatpush1.bf16.msra.mxu1 %v6797_v50  ;;  %v6814_v56 = vld [vmem:[#allocation10 + $0x4] ss:$8 sps:$4 sm:$0xff]   ;;  %v7357_v50 = vld [vmem:[%s7389_s11] sm:$0xf] }
 0x454   :  { %4800 = vmatprep.subr.bf16.mxu1 %v6805_v19  ;;  %v4574_v19 = vrot.slane %v7357_v50, %v7275_v25 }
 0x456   :  { %4480 = vmatpush1.bf16.msra.mxu0 %v6725_v15  ;;  %v4100_v15 = vld [vmem:[%s7387_s9] sm:$0x3] }
 0x457   :  { %4481 = vmatprep.subr.bf16.mxu0 %v6730_v29  ;;  %4801 = vmatpush1.bf16.msra.mxu1 %v6803_v21  ;;  %v4105_v29 = vrot.slane %v4100_v15, %v7272_v23 }
 0x458   :  { %4802 = vmatprep.subr.bf16.mxu1 %v6811_v26 }
 0x45a   :  { %4482 = vmatpush1.bf16.msra.mxu0 %v6728_v30  ;;  %v4109_v30 = vrot.slane %v4100_v15, %v7275_v25 }
 0x45b   :  { %4483 = vmatprep.subr.bf16.mxu0 %v6733_v31  ;;  %4803 = vmatpush1.bf16.msra.mxu1 %v6809_v28 }
 0x45c   :  { %5233 = vmatprep.subr.bf16.mxu1 %v6814_v56 }
 0x45e   :  { %4484 = vmatpush1.bf16.msra.mxu0 %v6731_v32 }
 0x45f   :  { %4485 = vmatprep.subr.bf16.mxu0 %v6736_v33 }
 0x462   :  { %4486 = vmatpush1.bf16.msra.mxu0 %v6734_v16 }
 0x463   :  { %4487 = vmatprep.subr.bf16.mxu0 %v6739_v34 }
 0x466   :  { %4488 = vmatpush1.bf16.msra.mxu0 %v6737_v35 }
 0x467   :  { %4489 = vmatprep.subr.bf16.mxu0 %v6742_v36 }
 0x46a   :  { %4490 = vmatpush1.bf16.msra.mxu0 %v6740_v40 }
 0x46b   :  { %4491 = vmatprep.subr.bf16.mxu0 %v6745_v41 }
 0x46e   :  { %4492 = vmatpush1.bf16.msra.mxu0 %v6743_v22  ;;  %v4526_v22 = vld [vmem:[%s7379_s1] sm:$0x3] }
 0x46f   :  { %4493 = vmatprep.subr.bf16.mxu0 %v6748_v42 }
 0x472   :  { %4494 = vmatpush1.bf16.msra.mxu0 %v6746_v11 }
 0x473   :  { %4495 = vmatprep.subr.bf16.mxu0 %v6751_v43 }
 0x476   :  { %4496 = vmatpush1.bf16.msra.mxu0 %v6749_v44  ;;  %v6812_v44 = vld [vmem:[#allocation10] ss:$8 sps:$4 sm:$0xff]  }
 0x477   :  { %4497 = vmatprep.subr.bf16.mxu0 %v6754_v12 }
 0x47a   :  { %4498 = vmatpush1.bf16.msra.mxu0 %v6752_v45  ;;  %v6817_v45 = vld [vmem:[#allocation10 + $0x14] ss:$8 sps:$4 sm:$0xff]  }
 0x47b   :  { %4499 = vmatprep.subr.bf16.mxu0 %v6757_v46  ;;  %v6815_v46 = vld [vmem:[#allocation10 + $0x10] ss:$8 sps:$4 sm:$0xff]  }
 0x47e   :  { %4500 = vmatpush1.bf16.msra.mxu0 %v6755_v49  ;;  %v6818_v49 = vld [vmem:[#allocation10 + $0x20] ss:$8 sps:$4 sm:$0xff]  }
 0x47f   :  { %4501 = vmatprep.subr.bf16.mxu0 %v6760_v51  ;;  %v6823_v51 = vld [vmem:[#allocation10 + $0x34] ss:$8 sps:$4 sm:$0xff]  }
 0x482   :  { %4502 = vmatpush1.bf16.msra.mxu0 %v6758_v53  ;;  %v6826_v53 = vld [vmem:[#allocation10 + $0x44] ss:$8 sps:$4 sm:$0xff]  }
 0x483   :  { %4503 = vmatprep.subr.bf16.mxu0 %v6763_v54  ;;  %v6824_v54 = vld [vmem:[#allocation10 + $0x40] ss:$8 sps:$4 sm:$0xff]  }
 0x486   :  { %4504 = vmatpush1.bf16.msra.mxu0 %v6761_v58  ;;  %v6827_v58 = vld [vmem:[#allocation10 + $0x50] ss:$8 sps:$4 sm:$0xff]  }
 0x487   :  { %4747 = vmatprep.subr.bf16.mxu0 %v6766_v59  ;;  %v6832_v59 = vld [vmem:[#allocation10 + $0x64] ss:$8 sps:$4 sm:$0xff]  }
 0x489   :  { %4506 = vmatmul.mubr.bf16.vlgmr.msra.gmra.mrb[16].mxu0 %v4034_v60  ;;  %v6833_v60 = vld [vmem:[#allocation10 + $0x70] ss:$8 sps:$4 sm:$0xff]  }
 0x48a   :  { %4748 = vmatpush1.bf16.msra.mxu0 %v6764_v47  ;;  %4779 = vmatprep.mubr.bf16.mxu0 %v7071_v20  ;;  %v6835_v47 = vld [vmem:[#allocation10 + $0x74] ss:$8 sps:$4 sm:$0xff]   ;;  %v4582_v20 = vrot.slane %v7357_v50, %v7282_v39 }
 0x48b   :  { %4749 = vmatprep.subr.bf16.mxu0 %v6772_v61  ;;  %v6838_v61 = vld [vmem:[#allocation10 + $0x84] ss:$8 sps:$4 sm:$0xff]  }
 0x48e   :  { %4750 = vmatpush1.bf16.msra.mxu0 %v6770_v62  ;;  %v6836_v62 = vld [vmem:[#allocation10 + $0x80] ss:$8 sps:$4 sm:$0xff]  }
 0x48f   :  { %4751 = vmatprep.subr.bf16.mxu0 %v6778_v63  ;;  %v6841_v63 = vld [vmem:[#allocation10 + $0x94] ss:$8 sps:$4 sm:$0xff]  }
 0x492   :  { %4752 = vmatpush1.bf16.msra.mxu0 %v6776_v1  ;;  %v6844_v1 = vld [vmem:[#allocation10 + $0xa4] ss:$8 sps:$4 sm:$0xff]  }
 0x493   :  { %4753 = vmatprep.subr.bf16.mxu0 %v6784_v3  ;;  %v6847_v3 = vld [vmem:[#allocation10 + $0xb4] ss:$8 sps:$4 sm:$0xff]  }
 0x496   :  { %4754 = vmatpush1.bf16.msra.mxu0 %v6782_v5  ;;  %v6850_v5 = vld [vmem:[#allocation10 + $0xc4] ss:$8 sps:$4 sm:$0xff]  }
 0x497   :  { %4755 = vmatprep.subr.bf16.mxu0 %v6790_v8  ;;  %v6851_v8 = vld [vmem:[#allocation10 + $0xd0] ss:$8 sps:$4 sm:$0xff]  }
 0x49a   :  { %4756 = vmatpush1.bf16.msra.mxu0 %v6788_v7  ;;  %v6853_v7 = vld [vmem:[#allocation10 + $0xd4] ss:$8 sps:$4 sm:$0xff]  }
 0x49b   :  { %4757 = vmatprep.subr.bf16.mxu0 %v6796_v13  ;;  %v6859_v13 = vld [vmem:[#allocation10 + $0xf4] ss:$8 sps:$4 sm:$0xff]  }
 0x49e   :  { %4758 = vmatpush1.bf16.msra.mxu0 %v6794_v17  ;;  %v6862_v17 = vld [vmem:[#allocation10 + $0x104] ss:$8 sps:$4 sm:$0xff]  }
 0x49f   :  { %4759 = vmatprep.subr.bf16.mxu0 %v6802_v18  ;;  %v4570_v18 = vrot.slane %v7357_v50, %v7272_v23 }
 0x4a2   :  { %4760 = vmatpush1.bf16.msra.mxu0 %v6800_v55 }
 0x4a3   :  { %4761 = vmatprep.subr.bf16.mxu0 %v6808_v24 }
 0x4a6   :  { %4762 = vmatpush1.bf16.msra.mxu0 %v6806_v27 }
 0x55c   :  { %v4507_v31 = vpop.f32.mrb[16].mxu0 }
 0x55d   :  { %v6034_v32 = vadd.f32 %v4507_v31, %v4105_v29  ;;  %v4509_v33 = vpop.f32.mrb[17].mxu0 }
 0x55e   :  { %v6035_v16 = vadd.f32 %v4509_v33, %v4109_v30  ;;  %v4511_v34 = vpop.f32.mrb[18].mxu0 }
 0x55f   :  { %v4512_v35 = vpop.f32.mrb[19].mxu0 }
 0x560   :  { %v4516_v36 = vcombine.low %v6034_v32, %v6035_v16  ;;  %v4527_v40 = vmul.f32 0.5, %v6035_v16  ;;  %v6860_v35 = vld [vmem:[#allocation10 + $0x100] ss:$8 sps:$4 sm:$0xff]  }
 0x562   :  { %5928 = vst.sshfl [vmem:[%s7392_s14] sm:$0x33 pattern:$0x76325410] %v4516_v36  ;;  %v4528_v41 = vmul.f32 1.442695, %v4527_v40 }
 0x563   :  { %v6865_v40 = vld [vmem:[#allocation10 + $0x114] ss:$8 sps:$4 sm:$0xff]  }
 0x564   :  { %6908 = vpow2.f32 %v4528_v41  ;;  %v6863_v41 = vld [vmem:[#allocation10 + $0x110] ss:$8 sps:$4 sm:$0xff]  }
 0x56e   :  { %v6909_v42 = vpop.eup %6908 }
 0x56f   :  { %v4530_v11 = vmul.f32 %v6909_v42, %v4526_v22  ;;  %v6868_v22 = vld [vmem:[#allocation10 + $0x124] ss:$8 sps:$4 sm:$0xff]   ;;  %v6866_v42 = vld [vmem:[#allocation10 + $0x120] ss:$8 sps:$4 sm:$0xff]  }
 0x571   :  { %v4531_v43 = vadd.f32 %v6034_v32, %v4530_v11  ;;  %v6871_v11 = vld [vmem:[#allocation10 + $0x134] ss:$8 sps:$4 sm:$0xff]  }
 0x573   :  { %v4532_v12 = vpack.c.bf16 %v4531_v43, %v4531_v43  ;;  %v6869_v43 = vld [vmem:[#allocation10 + $0x130] ss:$8 sps:$4 sm:$0xff]  }
 0x575   :  { %4780 = vmatmul.mubr.bf16.vlgmr.msra.gmra.mrb[20].mxu0 %v4532_v12  ;;  %4821 = vmatmul.mubr.bf16.vlgmr.msra.gmra.mrb[16].mxu1 %v4532_v12  ;;  %v6872_v12 = vld [vmem:[#allocation10 + $0x140] ss:$8 sps:$4 sm:$0xff]  }
 0x576   :  { %5234 = vmatpush1.bf16.msra.mxu1 %v6812_v44  ;;  %v6874_v44 = vld [vmem:[#allocation10 + $0x144] ss:$8 sps:$4 sm:$0xff]  }
 0x577   :  { %5235 = vmatprep.subr.bf16.mxu1 %v6817_v45  ;;  %v6877_v45 = vld [vmem:[#allocation10 + $0x154] ss:$8 sps:$4 sm:$0xff]  }
 0x57a   :  { %5236 = vmatpush1.bf16.msra.mxu1 %v6815_v46  ;;  %v6875_v46 = vld [vmem:[#allocation10 + $0x150] ss:$8 sps:$4 sm:$0xff]  }
 0x57b   :  { %5237 = vmatprep.subr.bf16.mxu1 %v6820_v48  ;;  %v6880_v48 = vld [vmem:[#allocation10 + $0x164] ss:$8 sps:$4 sm:$0xff]  }
 0x57e   :  { %5238 = vmatpush1.bf16.msra.mxu1 %v6818_v49  ;;  %v6878_v49 = vld [vmem:[#allocation10 + $0x160] ss:$8 sps:$4 sm:$0xff]  }
 0x57f   :  { %5239 = vmatprep.subr.bf16.mxu1 %v6823_v51  ;;  %v6883_v51 = vld [vmem:[#allocation10 + $0x174] ss:$8 sps:$4 sm:$0xff]  }
 0x582   :  { %5240 = vmatpush1.bf16.msra.mxu1 %v6821_v52  ;;  %v6881_v52 = vld [vmem:[#allocation10 + $0x170] ss:$8 sps:$4 sm:$0xff]  }
 0x583   :  { %5241 = vmatprep.subr.bf16.mxu1 %v6826_v53  ;;  %v6886_v53 = vld [vmem:[#allocation10 + $0x184] ss:$8 sps:$4 sm:$0xff]  }
 0x586   :  { %5242 = vmatpush1.bf16.msra.mxu1 %v6824_v54  ;;  %v6884_v54 = vld [vmem:[#allocation10 + $0x180] ss:$8 sps:$4 sm:$0xff]  }
 0x587   :  { %5243 = vmatprep.subr.bf16.mxu1 %v6829_v57  ;;  %v6889_v57 = vld [vmem:[#allocation10 + $0x194] ss:$8 sps:$4 sm:$0xff]  }
 0x58a   :  { %5244 = vmatpush1.bf16.msra.mxu1 %v6827_v58  ;;  %v6887_v58 = vld [vmem:[#allocation10 + $0x190] ss:$8 sps:$4 sm:$0xff]  }
 0x58b   :  { %5245 = vmatprep.subr.bf16.mxu1 %v6832_v59  ;;  %v6892_v59 = vld [vmem:[#allocation10 + $0x1a4] ss:$8 sps:$4 sm:$0xff]  }
 0x58e   :  { %5246 = vmatpush1.bf16.msra.mxu1 %v6830_v38  ;;  %v6890_v38 = vld [vmem:[#allocation10 + $0x1a0] ss:$8 sps:$4 sm:$0xff]  }
 0x58f   :  { %5247 = vmatprep.subr.bf16.mxu1 %v6835_v47  ;;  %v6895_v47 = vld [vmem:[#allocation10 + $0x1b4] ss:$8 sps:$4 sm:$0xff]  }
 0x592   :  { %5248 = vmatpush1.bf16.msra.mxu1 %v6833_v60  ;;  %v6893_v60 = vld [vmem:[#allocation10 + $0x1b0] ss:$8 sps:$4 sm:$0xff]  }
 0x593   :  { %5249 = vmatprep.subr.bf16.mxu1 %v6838_v61  ;;  %v6898_v61 = vld [vmem:[#allocation10 + $0x1c4] ss:$8 sps:$4 sm:$0xff]  }
 0x596   :  { %5250 = vmatpush1.bf16.msra.mxu1 %v6836_v62  ;;  %v6896_v62 = vld [vmem:[#allocation10 + $0x1c0] ss:$8 sps:$4 sm:$0xff]  }
 0x597   :  { %5251 = vmatprep.subr.bf16.mxu1 %v6841_v63  ;;  %v6901_v63 = vld [vmem:[#allocation10 + $0x1d4] ss:$8 sps:$4 sm:$0xff]  }
 0x59a   :  { %5252 = vmatpush1.bf16.msra.mxu1 %v6839_v0  ;;  %v6899_v0 = vld [vmem:[#allocation10 + $0x1d0] ss:$8 sps:$4 sm:$0xff]  }
 0x59b   :  { %5253 = vmatprep.subr.bf16.mxu1 %v6844_v1  ;;  %v4578_v1 = vrot.slane %v7357_v50, %v7289_v37 }
 0x59e   :  { %5254 = vmatpush1.bf16.msra.mxu1 %v6842_v2  ;;  %v6904_v2 = vld [vmem:[#allocation10 + $0x1e4] ss:$8 sps:$4 sm:$0xff]  }
 0x59f   :  { %5255 = vmatprep.subr.bf16.mxu1 %v6847_v3  ;;  %v6902_v3 = vld [vmem:[#allocation10 + $0x1e0] ss:$8 sps:$4 sm:$0xff]  }
 0x5a2   :  { %5256 = vmatpush1.bf16.msra.mxu1 %v6845_v4 }
 0x5a3   :  { %5257 = vmatprep.subr.bf16.mxu1 %v6850_v5  ;;  %v6907_v5 = vld [vmem:[#allocation10 + $0x1f4] ss:$8 sps:$4 sm:$0xff]  }
 0x5a6   :  { %5258 = vmatpush1.bf16.msra.mxu1 %v6848_v6  ;;  %v6905_v6 = vld [vmem:[#allocation10 + $0x1f0] ss:$8 sps:$4 sm:$0xff]  }
 0x5a7   :  { %5259 = vmatprep.subr.bf16.mxu1 %v6853_v7 }
 0x5aa   :  { %5260 = vmatpush1.bf16.msra.mxu1 %v6851_v8 }
 0x5ab   :  { %5261 = vmatprep.subr.bf16.mxu1 %v6856_v9  ;;  %v4901_v9 = vld [vmem:[%s7391_s13] sm:$0x3] }
 0x5ac   :  { %v4906_v37 = vrot.slane %v4901_v9, %v7272_v23 }
 0x5ae   :  { %5262 = vmatpush1.bf16.msra.mxu1 %v6854_v10  ;;  %v4910_v10 = vrot.slane %v4901_v9, %v7275_v25 }
 0x5af   :  { %5263 = vmatprep.subr.bf16.mxu1 %v6859_v13 }
 0x5b2   :  { %5264 = vmatpush1.bf16.msra.mxu1 %v6857_v14 }
 0x5b3   :  { %5274 = vmatprep.subr.bf16.mxu1 %v6862_v17 }
 0x648   :  { %v4781_v55 = vpop.f32.mrb[20].mxu0  ;;  %v7365_v21 = vpop.f32.mrb[16].mxu1 }
 0x649   :  { %v4782_v24 = vadd.f32 %v4781_v55, %v4570_v18  ;;  %v4783_v26 = vpop.f32.mrb[21].mxu0  ;;  %v4824_v27 = vpop.f32.mrb[17].mxu1  ;;  %v4823_v4 = vadd.f32 %v7365_v21, %v4578_v1 }
 0x64a   :  { %v4784_v28 = vadd.f32 %v4783_v26, %v4574_v19  ;;  %v4825_v56 = vadd.f32 %v4824_v27, %v4582_v20  ;;  %v4785_v15 = vpop.f32.mrb[22].mxu0  ;;  %v4826_v29 = vpop.f32.mrb[18].mxu1 }
 0x64b   :  { %v4829_v30 = vmax.f32 %v4782_v24, 0.0  ;;  %v4786_v31 = vpop.f32.mrb[23].mxu0  ;;  %v4827_v32 = vpop.f32.mrb[19].mxu1  ;;  %v4831_v7 = vmax.f32 %v4823_v4, 0.0 }
 0x64c   :  { %v4830_v33 = vmax.f32 %v4784_v28, 0.0  ;;  %v4832_v16 = vmax.f32 %v4825_v56, 0.0 }
 0x64d   :  { %v4833_v36 = vpack.c.bf16 %v4829_v30, %v4829_v30  ;;  %v4835_v8 = vpack.c.bf16 %v4831_v7, %v4831_v7 }
 0x64e   :  { %v4834_v34 = vpack.c.bf16 %v4830_v33, %v4830_v33  ;;  %v4836_v39 = vpack.c.bf16 %v4832_v16, %v4832_v16 }
 0x650   :  { %5265 = vmatprep.mubr.bf16.mxu1 %v4834_v34 }
 0x651   :  { %5266 = vmatmul.mubr.bf16.vlgmr.msra.gmra.mrb[20].mxu1 %v4833_v36 }
 0x652   :  { %5275 = vmatpush1.bf16.msra.mxu1 %v6860_v35  ;;  %5306 = vmatprep.mubr.bf16.mxu1 %v4836_v39 }
 0x653   :  { %5276 = vmatprep.subr.bf16.mxu1 %v6865_v40 }
 0x656   :  { %5277 = vmatpush1.bf16.msra.mxu1 %v6863_v41 }
 0x657   :  { %5278 = vmatprep.subr.bf16.mxu1 %v6868_v22 }
 0x65a   :  { %5279 = vmatpush1.bf16.msra.mxu1 %v6866_v42 }
 0x65b   :  { %5280 = vmatprep.subr.bf16.mxu1 %v6871_v11 }
 0x65e   :  { %5281 = vmatpush1.bf16.msra.mxu1 %v6869_v43 }
 0x65f   :  { %5282 = vmatprep.subr.bf16.mxu1 %v6874_v44 }
 0x662   :  { %5283 = vmatpush1.bf16.msra.mxu1 %v6872_v12 }
 0x663   :  { %5284 = vmatprep.subr.bf16.mxu1 %v6877_v45 }
 0x666   :  { %5285 = vmatpush1.bf16.msra.mxu1 %v6875_v46 }
 0x667   :  { %5286 = vmatprep.subr.bf16.mxu1 %v6880_v48 }
 0x66a   :  { %5287 = vmatpush1.bf16.msra.mxu1 %v6878_v49 }
 0x66b   :  { %5288 = vmatprep.subr.bf16.mxu1 %v6883_v51 }
 0x66e   :  { %5289 = vmatpush1.bf16.msra.mxu1 %v6881_v52 }
 0x66f   :  { %5290 = vmatprep.subr.bf16.mxu1 %v6886_v53 }
 0x672   :  { %5291 = vmatpush1.bf16.msra.mxu1 %v6884_v54 }
 0x673   :  { %5292 = vmatprep.subr.bf16.mxu1 %v6889_v57 }
 0x676   :  { %5293 = vmatpush1.bf16.msra.mxu1 %v6887_v58 }
 0x677   :  { %5294 = vmatprep.subr.bf16.mxu1 %v6892_v59 }
 0x67a   :  { %5295 = vmatpush1.bf16.msra.mxu1 %v6890_v38 }
 0x67b   :  { %5296 = vmatprep.subr.bf16.mxu1 %v6895_v47 }
 0x67e   :  { %5297 = vmatpush1.bf16.msra.mxu1 %v6893_v60 }
 0x67f   :  { %5298 = vmatprep.subr.bf16.mxu1 %v6898_v61 }
 0x682   :  { %5299 = vmatpush1.bf16.msra.mxu1 %v6896_v62 }
 0x683   :  { %5300 = vmatprep.subr.bf16.mxu1 %v6901_v63 }
 0x686   :  { %5301 = vmatpush1.bf16.msra.mxu1 %v6899_v0 }
 0x687   :  { %5302 = vmatprep.subr.bf16.mxu1 %v6904_v2 }
 0x68a   :  { %5303 = vmatpush1.bf16.msra.mxu1 %v6902_v3 }
 0x68b   :  { %5304 = vmatprep.subr.bf16.mxu1 %v6907_v5 }
 0x68e   :  { %5305 = vmatpush1.bf16.msra.mxu1 %v6905_v6 }
 0x691   :  { %5307 = vmatmul.mubr.bf16.vlgmr.msra.gmra.mrb[20].mxu1 %v4835_v8 }
 0x764   :  { %v5308_v13 = vpop.f32.mrb[20].mxu1 }
 0x765   :  { %v6036_v14 = vadd.f32 %v5308_v13, %v4906_v37  ;;  %v5310_v17 = vpop.f32.mrb[21].mxu1 }
 0x766   :  { %v6037_v50 = vadd.f32 %v5310_v17, %v4910_v10  ;;  %v5312_v18 = vpop.f32.mrb[22].mxu1 }
 0x767   :  { %v5315_v19 = vsub.f32 0.0, %v6036_v14  ;;  %v5313_v20 = vpop.f32.mrb[23].mxu1 }
 0x768   :  { %v5316_v55 = vsub.f32 0.0, %v6037_v50 }
 0x769   :  { %v5317_v21 = vmul.f32 1.442695, %v5315_v19 }
 0x76a   :  { %v5319_v24 = vmul.f32 1.442695, %v5316_v55 }
 0x76b   :  { %6910 = vpow2.f32 %v5317_v21 }
 0x76c   :  { %6912 = vpow2.f32 %v5319_v24 }
 0x775   :  { %v6911_v26 = vpop.eup %6910 }
 0x776   :  { %v6913_v27 = vpop.eup %6912  ;;  %v5321_v28 = vadd.f32 1.0, %v6911_v26 }
 0x777   :  { %v5322_v56 = vadd.f32 1.0, %v6913_v27 }
 0x778   :  { %6914 = vrcp.f32 %v5321_v28 }
 0x779   :  { %6916 = vrcp.f32 %v5322_v56 }
 0x782   :  { %v6915_v23 = vpop.eup %6914 }
 0x783   :  { %v6917_v25 = vpop.eup %6916 }
 0x784   :  { %v5329_v15 = vcombine.low %v6915_v23, %v6917_v25 }
 0x786   :  { %6025 = vst.sshfl [vmem:[%s7393_s15] sm:$0x33 pattern:$0x76325410] %v5329_v15 }
 0x787   :  { %5347 = vsyncpa [#allocation3], 1 }
 0x788   :  { %5348 = vsyncpa [#allocation5], 1 }
 0x789   :  { %5349 = vsyncpa [#allocation8], 1 }
 0x78a   :  { %5350 = vsyncpa [#allocation11], 1 }

</bundles_post_ra>
